<compile_context>
chip_gen: v7x
topology: tpu7x:2x2x1
jax: 0.10.0
libtpu: 0.0.40
codegen_flags: <defaults>
</compile_context>

<pallas_src>
import jax
import jax.numpy as jnp
from jax import lax
from jax.experimental import pallas as pl
from jax.experimental.pallas import tpu as pltpu

GATE_SLOT = 64            # lanes reserved per gate (requires hidden_dim <= 64)
STATE = 2 * GATE_SLOT     # 128-lane h/c state layout: [slot0 | slot1]
GATES_W = 4 * GATE_SLOT   # 256 packed gate columns: [0.5*i | 0.5*f || g | 0.5*o]


# ----------------------------------------------------------------------------
# Fused kernel: in-kernel token gather + unrolled LSTM recurrence (last cell
# state) + ResidualMLP epilogue
# ----------------------------------------------------------------------------
def fused_lstm_mlp_kernel(ids_ref, table_ref, whh_ref,
                          w_in_ref, b_in_ref, w1_ref, b1_ref,
                          w2_ref, b2_ref, w_out_ref, b_out_ref,
                          o_ref, xg_ref):
    """ids_ref   : SMEM (Bp*T,) int32, batch-major (row = b*T + t).
       table_ref : VMEM (V, 1, 256) f32  — embedding folded through W_ih^T + bias,
                   packed/prescaled gate layout.
       whh_ref   : VMEM (128, 256) bf16 — W_hh^T in the same layout, rows H..128 = 0.
       MLP refs  : zero-padded to 128 rows/cols (bf16 weights, f32 biases).
       o_ref     : VMEM (Bp, OUT) f32.
       xg_ref    : VMEM scratch (T, Bp, 256) f32 — gathered gate pre-activations."""
    T, Bp, _ = xg_ref.shape
    GW = whh_ref.shape[0]          # 128 = state lanes (one packed gate-pair half)
    GS = GW // 2                   # 64  = lanes per gate slot; half-rotation shift

    # ---- in-kernel token gather: xg[t, b] = table[ids[b, t]] -----------------
    for t in range(T):
        for b in range(Bp):
            tok = ids_ref[b * T + t]                       # SMEM scalar
            xg_ref[t, pl.ds(b, 1), :] = table_ref[tok]     # (1, 256) row gather

    # ---- LSTM recurrence, fully unrolled; only c_n is needed -----------------
    def step(t, carry):
        h, c = carry                                       # (Bp, 128) f32 each
        gates = xg_ref[t] + jnp.dot(h.astype(jnp.bfloat16), whh_ref[...],
                                    preferred_element_type=jnp.float32)  # (Bp, 256)
        ta = jnp.tanh(gates[:, :GW])      # [tanh(.5*i_pre) | tanh(.5*f_pre)]
        tc = jnp.tanh(gates[:, GW:])      # [tanh(g_pre)    | tanh(.5*o_pre)]
        sa = 0.5 * ta + 0.5               # [sigmoid(i)     | sigmoid(f)]
        sc = 0.5 * tc + 0.5               # [ (unused)      | sigmoid(o)]
        f_al = pltpu.roll(sa, GS, 1)      # [sigmoid(f) | sigmoid(i)]  (half-rotation)
        o_al = pltpu.roll(sc, GS, 1)      # [sigmoid(o) |  ...      ]
        # slot0 lanes hold the real update; slot1 / pad lanes carry bounded junk
        # (all factors are sigmoid/tanh outputs) that is later multiplied by zero
        # weight rows, so it can never reach a real lane.
        c = f_al * c + sa * tc            # slot0: f*c + i*g
        h = o_al * jnp.tanh(c)            # slot0: o*tanh(c)
        return h, c

    zeros = jnp.zeros((Bp, GW), jnp.float32)
    _, c_last = lax.fori_loop(0, T, step, (zeros, zeros), unroll=True)

    # ---- ResidualMLP epilogue on c_n (junk lanes hit zero weight rows) -------
    def bdot(x, w_ref):
        return jnp.dot(x.astype(jnp.bfloat16), w_ref[...],
                       preferred_element_type=jnp.float32)

    x = jnp.maximum(bdot(c_last, w_in_ref) + b_in_ref[...], 0.0)
    res = x
    y = jnp.maximum(bdot(x, w1_ref) + b1_ref[...], 0.0)
    y = bdot(y, w2_ref) + b2_ref[...]
    x = y + res
    # Dropout(p=0.1): identity in inference mode.
    o_ref[...] = (bdot(x, w_out_ref) + b_out_ref[...]).astype(o_ref.dtype)


def fused_forward_call(ids_flat, fused, Bp, T):
    out_dim = fused["b_out"].shape[1]
    smem = pl.BlockSpec(memory_space=pltpu.MemorySpace.SMEM)
    vmem = pl.BlockSpec(memory_space=pltpu.MemorySpace.VMEM)
    return pl.pallas_call(
        fused_lstm_mlp_kernel,
        out_shape=jax.ShapeDtypeStruct((Bp, out_dim), jnp.float32),
        in_specs=[smem] + [vmem] * 10,
        out_specs=vmem,
        scratch_shapes=[pltpu.VMEM((T, Bp, GATES_W), jnp.float32)],
    )(ids_flat, fused["table_p"], fused["whh_p"],
      fused["w_in_p"], fused["b_in_p"], fused["w1_p"], fused["b1_p"],
      fused["w2_p"], fused["b2_p"], fused["w_out_p"], fused["b_out"])


# ----------------------------------------------------------------------------
# One-time parameter preprocessing (frozen embedding folded through W_ih + bias,
# packed/prescaled gate layout, bf16 weights, zero-padded rows/cols)
# ----------------------------------------------------------------------------
def _gates_to_kernel_layout(a, H):
    """(..., 4H) in PyTorch gate order [i, f, g, o] -> (..., 256) kernel layout
       [0.5*i | 0.5*f | g | 0.5*o], each gate zero-padded to GATE_SLOT lanes.
       The 0.5 prescale on the sigmoid gates lets the kernel evaluate
       sigmoid(z) = 0.5*tanh(0.5*z) + 0.5 with one EUP tanh per 128-lane half."""
    lead = a.shape[:-1]
    a4 = a.reshape(lead + (4, H))
    i, f, g, o = (a4[..., k, :] for k in range(4))
    pad = [(0, 0)] * len(lead) + [(0, GATE_SLOT - H)]
    parts = [0.5 * i, 0.5 * f, g, 0.5 * o]
    return jnp.concatenate([jnp.pad(p, pad) for p in parts], axis=-1)


def prepare_fused_params(embed_table, lstm_params, mlp_params, hidden_dim):
    H = hidden_dim
    assert H <= GATE_SLOT
    hi = jax.lax.Precision.HIGHEST

    # Frozen embedding folded through the LSTM input projection + combined bias:
    # the kernel's per-token input becomes a single row gather of this table.
    table_gates = (jnp.dot(embed_table, lstm_params["w_ih_t"], precision=hi)
                   + lstm_params["bias"])                                   # (V, 4H)
    table_p = _gates_to_kernel_layout(table_gates, H)[:, None, :]           # (V, 1, 256)

    whh = _gates_to_kernel_layout(lstm_params["w_hh_t"], H)                 # (H, 256)
    whh_p = jnp.pad(whh, ((0, STATE - H), (0, 0)))                          # (128, 256)

    def pad_mat(w):   # (H, H) -> (128, 128)
        return jnp.pad(w, ((0, STATE - H), (0, STATE - H)))

    def pad_vec(b):   # (1, H) -> (1, 128)
        return jnp.pad(b, ((0, 0), (0, STATE - H)))

    f32, bf16 = jnp.float32, jnp.bfloat16
    return {
        "table_p": table_p.astype(f32),
        "whh_p": whh_p.astype(bf16),
        "w_in_p": pad_mat(mlp_params["w_in"]).astype(bf16),
        "b_in_p": pad_vec(mlp_params["b_in"]).astype(f32),
        "w1_p": pad_mat(mlp_params["w1"]).astype(bf16),
        "b1_p": pad_vec(mlp_params["b1"]).astype(f32),
        "w2_p": pad_mat(mlp_params["w2"]).astype(bf16),
        "b2_p": pad_vec(mlp_params["b2"]).astype(f32),
        "w_out_p": jnp.pad(mlp_params["w_out"],
                           ((0, STATE - H), (0, 0))).astype(bf16),
        "b_out": mlp_params["b_out"].astype(f32),
    }


# ----------------------------------------------------------------------------
# Full forward: pad batch to a sublane tile, everything else inside the kernel
# ----------------------------------------------------------------------------
@jax.jit
def forward(token_ids, fused):
    B, T = token_ids.shape
    Bp = max(8, -(-B // 8) * 8)   # batch padded to a full sublane tile (item 4)
    ids = jnp.pad(token_ids.astype(jnp.int32), ((0, Bp - B), (0, 0)))
    out = fused_forward_call(ids.reshape(-1), fused, Bp, T)
    return out[:B]


# ----------------------------------------------------------------------------
# Pure-JAX reference (same math, unpadded, f32) for a numerical sanity check
# ----------------------------------------------------------------------------
def reference_forward(token_ids, embed_table, lstm_params, mlp_params):
    emb = jnp.take(embed_table, token_ids, axis=0)              # (B, T, E)
    B, T, _ = emb.shape
    H = lstm_params["w_hh_t"].shape[0]
    h = jnp.zeros((B, H), jnp.float32)
    c = jnp.zeros((B, H), jnp.float32)
    for t in range(T):
        gates = (emb[:, t, :] @ lstm_params["w_ih_t"]
                 + h @ lstm_params["w_hh_t"] + lstm_params["bias"])
        i = jax.nn.sigmoid(gates[:, 0 * H:1 * H])
        f = jax.nn.sigmoid(gates[:, 1 * H:2 * H])
        g = jnp.tanh(gates[:, 2 * H:3 * H])
        o = jax.nn.sigmoid(gates[:, 3 * H:4 * H])
        c = f * c + i * g
        h = o * jnp.tanh(c)
    x = jnp.maximum(c @ mlp_params["w_in"] + mlp_params["b_in"], 0.0)
    res = x
    y = jnp.maximum(x @ mlp_params["w1"] + mlp_params["b1"], 0.0)
    y = y @ mlp_params["w2"] + mlp_params["b2"]
    x = y + res
    return x @ mlp_params["w_out"] + mlp_params["b_out"]


# ----------------------------------------------------------------------------
# Deterministic synthetic parameter construction
# ----------------------------------------------------------------------------
def make_params(key, vocab_size, emb_dim, hidden_dim, output_dim):
    ks = jax.random.split(key, 12)
    s = 0.05
    embed_table = s * jax.random.normal(ks[0], (vocab_size, emb_dim), jnp.float32)
    lstm_params = {
        # stored transposed so x @ W_ih^T / h @ W_hh^T are direct matmuls
        "w_ih_t": s * jax.random.normal(ks[1], (emb_dim, 4 * hidden_dim), jnp.float32),
        "w_hh_t": s * jax.random.normal(ks[2], (hidden_dim, 4 * hidden_dim), jnp.float32),
        "bias":   s * jax.random.normal(ks[3], (1, 4 * hidden_dim), jnp.float32),  # b_ih + b_hh
    }
    mlp_params = {
        "w_in":  s * jax.random.normal(ks[4], (hidden_dim, hidden_dim), jnp.float32),
        "b_in":  s * jax.random.normal(ks[5], (1, hidden_dim), jnp.float32),
        "w1":    s * jax.random.normal(ks[6], (hidden_dim, hidden_dim), jnp.float32),
        "b1":    s * jax.random.normal(ks[7], (1, hidden_dim), jnp.float32),
        "w2":    s * jax.random.normal(ks[8], (hidden_dim, hidden_dim), jnp.float32),
        "b2":    s * jax.random.normal(ks[9], (1, hidden_dim), jnp.float32),
        "w_out": s * jax.random.normal(ks[10], (hidden_dim, output_dim), jnp.float32),
        "b_out": s * jax.random.normal(ks[11], (1, output_dim), jnp.float32),
    }
    return embed_table, lstm_params, mlp_params


if __name__ == "__main__":
    B, T = 2, 8
    EMB = 300           # glove dim (fixed by the module)
    HIDDEN = 32
    OUT = 4
    N_SPECIAL = 2
    VOCAB = 20 + N_SPECIAL

    key = jax.random.PRNGKey(0)
    k_tok, k_params = jax.random.split(key)
    token_ids = jax.random.randint(k_tok, (B, T), 0, VOCAB, dtype=jnp.int32)
    embed_table, lstm_params, mlp_params = make_params(
        k_params, VOCAB, EMB, HIDDEN, OUT)

    fused = prepare_fused_params(embed_table, lstm_params, mlp_params, HIDDEN)

    out = forward(token_ids, fused)
    out = jax.block_until_ready(out)
    assert out.shape == (B, OUT), out.shape

    # Numerical sanity check against the unfused, unpadded, all-f32 reference.
    # Tolerance tightened vs. the previous 1e-2: remaining error is dominated by
    # the bf16 weight/activation operands of the MXU matmuls (expected ~1e-3).
    with jax.default_matmul_precision("float32"):
        ref = reference_forward(token_ids, embed_table, lstm_params, mlp_params)
    ref = jax.block_until_ready(ref)
    max_diff = float(jnp.max(jnp.abs(out - ref)))
    assert max_diff < 5e-3, f"max |diff| = {max_diff}"
    print("KERNEL_OK")
</pallas_src>

<mosaic_0001>
module attributes {stable_mosaic.version = 11 : i64} {
  func.func @fused_lstm_mlp_kernel(%arg0: memref<64xi32, #tpu.memory_space<smem>>, %arg1: memref<22x1x256xf32, #tpu.memory_space<vmem>>, %arg2: memref<128x256xbf16, #tpu.memory_space<vmem>>, %arg3: memref<128x128xbf16, #tpu.memory_space<vmem>>, %arg4: memref<1x128xf32, #tpu.memory_space<vmem>>, %arg5: memref<128x128xbf16, #tpu.memory_space<vmem>>, %arg6: memref<1x128xf32, #tpu.memory_space<vmem>>, %arg7: memref<128x128xbf16, #tpu.memory_space<vmem>>, %arg8: memref<1x128xf32, #tpu.memory_space<vmem>>, %arg9: memref<128x4xbf16, #tpu.memory_space<vmem>>, %arg10: memref<1x4xf32, #tpu.memory_space<vmem>>, %arg11: memref<8x4xf32, #tpu.memory_space<vmem>>, %arg12: memref<8x8x256xf32, #tpu.memory_space<vmem>>) attributes {dimension_semantics = [], scalar_prefetch = 0 : i64, scratch_operands = 1 : i64, tpu.core_type = #tpu.core_type<tc>} {
    %c0 = arith.constant 0 : index
    %0 = memref.load %arg0[%c0] : memref<64xi32, #tpu.memory_space<smem>>
    %1 = arith.index_cast %0 : i32 to index
    %c0_0 = arith.constant 0 : index
    %c0_1 = arith.constant 0 : index
    %2 = vector.load %arg1[%1, %c0_0, %c0_1] : memref<22x1x256xf32, #tpu.memory_space<vmem>>, vector<1x1x256xf32>
    %3 = vector.shape_cast %2 : vector<1x1x256xf32> to vector<1x256xf32>
    %c0_2 = arith.constant 0 : index
    %c0_3 = arith.constant 0 : index
    %c0_4 = arith.constant 0 : index
    %4 = vector.load %arg12[%c0_2, %c0_3, %c0_4] : memref<8x8x256xf32, #tpu.memory_space<vmem>>, vector<1x1x256xf32>
    %5 = vector.shape_cast %4 : vector<1x1x256xf32> to vector<1x256xf32>
    %6 = vector.shape_cast %3 : vector<1x256xf32> to vector<1x1x256xf32>
    tpu.vector_store %arg12[%c0_2, %c0_3, %c0_4], %6 {strides = array<i32>} : memref<8x8x256xf32, #tpu.memory_space<vmem>>, vector<1x1x256xf32>,
    %c8 = arith.constant 8 : index
    %7 = memref.load %arg0[%c8] : memref<64xi32, #tpu.memory_space<smem>>
    %8 = arith.index_cast %7 : i32 to index
    %c0_5 = arith.constant 0 : index
    %c0_6 = arith.constant 0 : index
    %9 = vector.load %arg1[%8, %c0_5, %c0_6] : memref<22x1x256xf32, #tpu.memory_space<vmem>>, vector<1x1x256xf32>
    %10 = vector.shape_cast %9 : vector<1x1x256xf32> to vector<1x256xf32>
    %c0_7 = arith.constant 0 : index
    %c1 = arith.constant 1 : index
    %c0_8 = arith.constant 0 : index
    %11 = vector.load %arg12[%c0_7, %c1, %c0_8] : memref<8x8x256xf32, #tpu.memory_space<vmem>>, vector<1x1x256xf32>
    %12 = vector.shape_cast %11 : vector<1x1x256xf32> to vector<1x256xf32>
    %13 = vector.shape_cast %10 : vector<1x256xf32> to vector<1x1x256xf32>
    tpu.vector_store %arg12[%c0_7, %c1, %c0_8], %13 {strides = array<i32>} : memref<8x8x256xf32, #tpu.memory_space<vmem>>, vector<1x1x256xf32>,
    %c16 = arith.constant 16 : index
    %14 = memref.load %arg0[%c16] : memref<64xi32, #tpu.memory_space<smem>>
    %15 = arith.index_cast %14 : i32 to index
    %c0_9 = arith.constant 0 : index
    %c0_10 = arith.constant 0 : index
    %16 = vector.load %arg1[%15, %c0_9, %c0_10] : memref<22x1x256xf32, #tpu.memory_space<vmem>>, vector<1x1x256xf32>
    %17 = vector.shape_cast %16 : vector<1x1x256xf32> to vector<1x256xf32>
    %c0_11 = arith.constant 0 : index
    %c2 = arith.constant 2 : index
    %c0_12 = arith.constant 0 : index
    %18 = vector.load %arg12[%c0_11, %c2, %c0_12] : memref<8x8x256xf32, #tpu.memory_space<vmem>>, vector<1x1x256xf32>
    %19 = vector.shape_cast %18 : vector<1x1x256xf32> to vector<1x256xf32>
    %20 = vector.shape_cast %17 : vector<1x256xf32> to vector<1x1x256xf32>
    tpu.vector_store %arg12[%c0_11, %c2, %c0_12], %20 {strides = array<i32>} : memref<8x8x256xf32, #tpu.memory_space<vmem>>, vector<1x1x256xf32>,
    %c24 = arith.constant 24 : index
    %21 = memref.load %arg0[%c24] : memref<64xi32, #tpu.memory_space<smem>>
    %22 = arith.index_cast %21 : i32 to index
    %c0_13 = arith.constant 0 : index
    %c0_14 = arith.constant 0 : index
    %23 = vector.load %arg1[%22, %c0_13, %c0_14] : memref<22x1x256xf32, #tpu.memory_space<vmem>>, vector<1x1x256xf32>
    %24 = vector.shape_cast %23 : vector<1x1x256xf32> to vector<1x256xf32>
    %c0_15 = arith.constant 0 : index
    %c3 = arith.constant 3 : index
    %c0_16 = arith.constant 0 : index
    %25 = vector.load %arg12[%c0_15, %c3, %c0_16] : memref<8x8x256xf32, #tpu.memory_space<vmem>>, vector<1x1x256xf32>
    %26 = vector.shape_cast %25 : vector<1x1x256xf32> to vector<1x256xf32>
    %27 = vector.shape_cast %24 : vector<1x256xf32> to vector<1x1x256xf32>
    tpu.vector_store %arg12[%c0_15, %c3, %c0_16], %27 {strides = array<i32>} : memref<8x8x256xf32, #tpu.memory_space<vmem>>, vector<1x1x256xf32>,
    %c32 = arith.constant 32 : index
    %28 = memref.load %arg0[%c32] : memref<64xi32, #tpu.memory_space<smem>>
    %29 = arith.index_cast %28 : i32 to index
    %c0_17 = arith.constant 0 : index
    %c0_18 = arith.constant 0 : index
    %30 = vector.load %arg1[%29, %c0_17, %c0_18] : memref<22x1x256xf32, #tpu.memory_space<vmem>>, vector<1x1x256xf32>
    %31 = vector.shape_cast %30 : vector<1x1x256xf32> to vector<1x256xf32>
    %c0_19 = arith.constant 0 : index
    %c4 = arith.constant 4 : index
    %c0_20 = arith.constant 0 : index
    %32 = vector.load %arg12[%c0_19, %c4, %c0_20] : memref<8x8x256xf32, #tpu.memory_space<vmem>>, vector<1x1x256xf32>
    %33 = vector.shape_cast %32 : vector<1x1x256xf32> to vector<1x256xf32>
    %34 = vector.shape_cast %31 : vector<1x256xf32> to vector<1x1x256xf32>
    tpu.vector_store %arg12[%c0_19, %c4, %c0_20], %34 {strides = array<i32>} : memref<8x8x256xf32, #tpu.memory_space<vmem>>, vector<1x1x256xf32>,
    %c40 = arith.constant 40 : index
    %35 = memref.load %arg0[%c40] : memref<64xi32, #tpu.memory_space<smem>>
    %36 = arith.index_cast %35 : i32 to index
    %c0_21 = arith.constant 0 : index
    %c0_22 = arith.constant 0 : index
    %37 = vector.load %arg1[%36, %c0_21, %c0_22] : memref<22x1x256xf32, #tpu.memory_space<vmem>>, vector<1x1x256xf32>
    %38 = vector.shape_cast %37 : vector<1x1x256xf32> to vector<1x256xf32>
    %c0_23 = arith.constant 0 : index
    %c5 = arith.constant 5 : index
    %c0_24 = arith.constant 0 : index
    %39 = vector.load %arg12[%c0_23, %c5, %c0_24] : memref<8x8x256xf32, #tpu.memory_space<vmem>>, vector<1x1x256xf32>
    %40 = vector.shape_cast %39 : vector<1x1x256xf32> to vector<1x256xf32>
    %41 = vector.shape_cast %38 : vector<1x256xf32> to vector<1x1x256xf32>
    tpu.vector_store %arg12[%c0_23, %c5, %c0_24], %41 {strides = array<i32>} : memref<8x8x256xf32, #tpu.memory_space<vmem>>, vector<1x1x256xf32>,
    %c48 = arith.constant 48 : index
    %42 = memref.load %arg0[%c48] : memref<64xi32, #tpu.memory_space<smem>>
    %43 = arith.index_cast %42 : i32 to index
    %c0_25 = arith.constant 0 : index
    %c0_26 = arith.constant 0 : index
    %44 = vector.load %arg1[%43, %c0_25, %c0_26] : memref<22x1x256xf32, #tpu.memory_space<vmem>>, vector<1x1x256xf32>
    %45 = vector.shape_cast %44 : vector<1x1x256xf32> to vector<1x256xf32>
    %c0_27 = arith.constant 0 : index
    %c6 = arith.constant 6 : index
    %c0_28 = arith.constant 0 : index
    %46 = vector.load %arg12[%c0_27, %c6, %c0_28] : memref<8x8x256xf32, #tpu.memory_space<vmem>>, vector<1x1x256xf32>
    %47 = vector.shape_cast %46 : vector<1x1x256xf32> to vector<1x256xf32>
    %48 = vector.shape_cast %45 : vector<1x256xf32> to vector<1x1x256xf32>
    tpu.vector_store %arg12[%c0_27, %c6, %c0_28], %48 {strides = array<i32>} : memref<8x8x256xf32, #tpu.memory_space<vmem>>, vector<1x1x256xf32>,
    %c56 = arith.constant 56 : index
    %49 = memref.load %arg0[%c56] : memref<64xi32, #tpu.memory_space<smem>>
    %50 = arith.index_cast %49 : i32 to index
    %c0_29 = arith.constant 0 : index
    %c0_30 = arith.constant 0 : index
    %51 = vector.load %arg1[%50, %c0_29, %c0_30] : memref<22x1x256xf32, #tpu.memory_space<vmem>>, vector<1x1x256xf32>
    %52 = vector.shape_cast %51 : vector<1x1x256xf32> to vector<1x256xf32>
    %c0_31 = arith.constant 0 : index
    %c7 = arith.constant 7 : index
    %c0_32 = arith.constant 0 : index
    %53 = vector.load %arg12[%c0_31, %c7, %c0_32] : memref<8x8x256xf32, #tpu.memory_space<vmem>>, vector<1x1x256xf32>
    %54 = vector.shape_cast %53 : vector<1x1x256xf32> to vector<1x256xf32>
    %55 = vector.shape_cast %52 : vector<1x256xf32> to vector<1x1x256xf32>
    tpu.vector_store %arg12[%c0_31, %c7, %c0_32], %55 {strides = array<i32>} : memref<8x8x256xf32, #tpu.memory_space<vmem>>, vector<1x1x256xf32>,
    %c1_33 = arith.constant 1 : index
    %56 = memref.load %arg0[%c1_33] : memref<64xi32, #tpu.memory_space<smem>>
    %57 = arith.index_cast %56 : i32 to index
    %c0_34 = arith.constant 0 : index
    %c0_35 = arith.constant 0 : index
    %58 = vector.load %arg1[%57, %c0_34, %c0_35] : memref<22x1x256xf32, #tpu.memory_space<vmem>>, vector<1x1x256xf32>
    %59 = vector.shape_cast %58 : vector<1x1x256xf32> to vector<1x256xf32>
    %c1_36 = arith.constant 1 : index
    %c0_37 = arith.constant 0 : index
    %c0_38 = arith.constant 0 : index
    %60 = vector.load %arg12[%c1_36, %c0_37, %c0_38] : memref<8x8x256xf32, #tpu.memory_space<vmem>>, vector<1x1x256xf32>
    %61 = vector.shape_cast %60 : vector<1x1x256xf32> to vector<1x256xf32>
    %62 = vector.shape_cast %59 : vector<1x256xf32> to vector<1x1x256xf32>
    tpu.vector_store %arg12[%c1_36, %c0_37, %c0_38], %62 {strides = array<i32>} : memref<8x8x256xf32, #tpu.memory_space<vmem>>, vector<1x1x256xf32>,
    %c9 = arith.constant 9 : index
    %63 = memref.load %arg0[%c9] : memref<64xi32, #tpu.memory_space<smem>>
    %64 = arith.index_cast %63 : i32 to index
    %c0_39 = arith.constant 0 : index
    %c0_40 = arith.constant 0 : index
    %65 = vector.load %arg1[%64, %c0_39, %c0_40] : memref<22x1x256xf32, #tpu.memory_space<vmem>>, vector<1x1x256xf32>
    %66 = vector.shape_cast %65 : vector<1x1x256xf32> to vector<1x256xf32>
    %c1_41 = arith.constant 1 : index
    %c1_42 = arith.constant 1 : index
    %c0_43 = arith.constant 0 : index
    %67 = vector.load %arg12[%c1_41, %c1_42, %c0_43] : memref<8x8x256xf32, #tpu.memory_space<vmem>>, vector<1x1x256xf32>
    %68 = vector.shape_cast %67 : vector<1x1x256xf32> to vector<1x256xf32>
    %69 = vector.shape_cast %66 : vector<1x256xf32> to vector<1x1x256xf32>
    tpu.vector_store %arg12[%c1_41, %c1_42, %c0_43], %69 {strides = array<i32>} : memref<8x8x256xf32, #tpu.memory_space<vmem>>, vector<1x1x256xf32>,
    %c17 = arith.constant 17 : index
    %70 = memref.load %arg0[%c17] : memref<64xi32, #tpu.memory_space<smem>>
    %71 = arith.index_cast %70 : i32 to index
    %c0_44 = arith.constant 0 : index
    %c0_45 = arith.constant 0 : index
    %72 = vector.load %arg1[%71, %c0_44, %c0_45] : memref<22x1x256xf32, #tpu.memory_space<vmem>>, vector<1x1x256xf32>
    %73 = vector.shape_cast %72 : vector<1x1x256xf32> to vector<1x256xf32>
    %c1_46 = arith.constant 1 : index
    %c2_47 = arith.constant 2 : index
    %c0_48 = arith.constant 0 : index
    %74 = vector.load %arg12[%c1_46, %c2_47, %c0_48] : memref<8x8x256xf32, #tpu.memory_space<vmem>>, vector<1x1x256xf32>
    %75 = vector.shape_cast %74 : vector<1x1x256xf32> to vector<1x256xf32>
    %76 = vector.shape_cast %73 : vector<1x256xf32> to vector<1x1x256xf32>
    tpu.vector_store %arg12[%c1_46, %c2_47, %c0_48], %76 {strides = array<i32>} : memref<8x8x256xf32, #tpu.memory_space<vmem>>, vector<1x1x256xf32>,
    %c25 = arith.constant 25 : index
    %77 = memref.load %arg0[%c25] : memref<64xi32, #tpu.memory_space<smem>>
    %78 = arith.index_cast %77 : i32 to index
    %c0_49 = arith.constant 0 : index
    %c0_50 = arith.constant 0 : index
    %79 = vector.load %arg1[%78, %c0_49, %c0_50] : memref<22x1x256xf32, #tpu.memory_space<vmem>>, vector<1x1x256xf32>
    %80 = vector.shape_cast %79 : vector<1x1x256xf32> to vector<1x256xf32>
    %c1_51 = arith.constant 1 : index
    %c3_52 = arith.constant 3 : index
    %c0_53 = arith.constant 0 : index
    %81 = vector.load %arg12[%c1_51, %c3_52, %c0_53] : memref<8x8x256xf32, #tpu.memory_space<vmem>>, vector<1x1x256xf32>
    %82 = vector.shape_cast %81 : vector<1x1x256xf32> to vector<1x256xf32>
    %83 = vector.shape_cast %80 : vector<1x256xf32> to vector<1x1x256xf32>
    tpu.vector_store %arg12[%c1_51, %c3_52, %c0_53], %83 {strides = array<i32>} : memref<8x8x256xf32, #tpu.memory_space<vmem>>, vector<1x1x256xf32>,
    %c33 = arith.constant 33 : index
    %84 = memref.load %arg0[%c33] : memref<64xi32, #tpu.memory_space<smem>>
    %85 = arith.index_cast %84 : i32 to index
    %c0_54 = arith.constant 0 : index
    %c0_55 = arith.constant 0 : index
    %86 = vector.load %arg1[%85, %c0_54, %c0_55] : memref<22x1x256xf32, #tpu.memory_space<vmem>>, vector<1x1x256xf32>
    %87 = vector.shape_cast %86 : vector<1x1x256xf32> to vector<1x256xf32>
    %c1_56 = arith.constant 1 : index
    %c4_57 = arith.constant 4 : index
    %c0_58 = arith.constant 0 : index
    %88 = vector.load %arg12[%c1_56, %c4_57, %c0_58] : memref<8x8x256xf32, #tpu.memory_space<vmem>>, vector<1x1x256xf32>
    %89 = vector.shape_cast %88 : vector<1x1x256xf32> to vector<1x256xf32>
    %90 = vector.shape_cast %87 : vector<1x256xf32> to vector<1x1x256xf32>
    tpu.vector_store %arg12[%c1_56, %c4_57, %c0_58], %90 {strides = array<i32>} : memref<8x8x256xf32, #tpu.memory_space<vmem>>, vector<1x1x256xf32>,
    %c41 = arith.constant 41 : index
    %91 = memref.load %arg0[%c41] : memref<64xi32, #tpu.memory_space<smem>>
    %92 = arith.index_cast %91 : i32 to index
    %c0_59 = arith.constant 0 : index
    %c0_60 = arith.constant 0 : index
    %93 = vector.load %arg1[%92, %c0_59, %c0_60] : memref<22x1x256xf32, #tpu.memory_space<vmem>>, vector<1x1x256xf32>
    %94 = vector.shape_cast %93 : vector<1x1x256xf32> to vector<1x256xf32>
    %c1_61 = arith.constant 1 : index
    %c5_62 = arith.constant 5 : index
    %c0_63 = arith.constant 0 : index
    %95 = vector.load %arg12[%c1_61, %c5_62, %c0_63] : memref<8x8x256xf32, #tpu.memory_space<vmem>>, vector<1x1x256xf32>
    %96 = vector.shape_cast %95 : vector<1x1x256xf32> to vector<1x256xf32>
    %97 = vector.shape_cast %94 : vector<1x256xf32> to vector<1x1x256xf32>
    tpu.vector_store %arg12[%c1_61, %c5_62, %c0_63], %97 {strides = array<i32>} : memref<8x8x256xf32, #tpu.memory_space<vmem>>, vector<1x1x256xf32>,
    %c49 = arith.constant 49 : index
    %98 = memref.load %arg0[%c49] : memref<64xi32, #tpu.memory_space<smem>>
    %99 = arith.index_cast %98 : i32 to index
    %c0_64 = arith.constant 0 : index
    %c0_65 = arith.constant 0 : index
    %100 = vector.load %arg1[%99, %c0_64, %c0_65] : memref<22x1x256xf32, #tpu.memory_space<vmem>>, vector<1x1x256xf32>
    %101 = vector.shape_cast %100 : vector<1x1x256xf32> to vector<1x256xf32>
    %c1_66 = arith.constant 1 : index
    %c6_67 = arith.constant 6 : index
    %c0_68 = arith.constant 0 : index
    %102 = vector.load %arg12[%c1_66, %c6_67, %c0_68] : memref<8x8x256xf32, #tpu.memory_space<vmem>>, vector<1x1x256xf32>
    %103 = vector.shape_cast %102 : vector<1x1x256xf32> to vector<1x256xf32>
    %104 = vector.shape_cast %101 : vector<1x256xf32> to vector<1x1x256xf32>
    tpu.vector_store %arg12[%c1_66, %c6_67, %c0_68], %104 {strides = array<i32>} : memref<8x8x256xf32, #tpu.memory_space<vmem>>, vector<1x1x256xf32>,
    %c57 = arith.constant 57 : index
    %105 = memref.load %arg0[%c57] : memref<64xi32, #tpu.memory_space<smem>>
    %106 = arith.index_cast %105 : i32 to index
    %c0_69 = arith.constant 0 : index
    %c0_70 = arith.constant 0 : index
    %107 = vector.load %arg1[%106, %c0_69, %c0_70] : memref<22x1x256xf32, #tpu.memory_space<vmem>>, vector<1x1x256xf32>
    %108 = vector.shape_cast %107 : vector<1x1x256xf32> to vector<1x256xf32>
    %c1_71 = arith.constant 1 : index
    %c7_72 = arith.constant 7 : index
    %c0_73 = arith.constant 0 : index
    %109 = vector.load %arg12[%c1_71, %c7_72, %c0_73] : memref<8x8x256xf32, #tpu.memory_space<vmem>>, vector<1x1x256xf32>
    %110 = vector.shape_cast %109 : vector<1x1x256xf32> to vector<1x256xf32>
    %111 = vector.shape_cast %108 : vector<1x256xf32> to vector<1x1x256xf32>
    tpu.vector_store %arg12[%c1_71, %c7_72, %c0_73], %111 {strides = array<i32>} : memref<8x8x256xf32, #tpu.memory_space<vmem>>, vector<1x1x256xf32>,
    %c2_74 = arith.constant 2 : index
    %112 = memref.load %arg0[%c2_74] : memref<64xi32, #tpu.memory_space<smem>>
    %113 = arith.index_cast %112 : i32 to index
    %c0_75 = arith.constant 0 : index
    %c0_76 = arith.constant 0 : index
    %114 = vector.load %arg1[%113, %c0_75, %c0_76] : memref<22x1x256xf32, #tpu.memory_space<vmem>>, vector<1x1x256xf32>
    %115 = vector.shape_cast %114 : vector<1x1x256xf32> to vector<1x256xf32>
    %c2_77 = arith.constant 2 : index
    %c0_78 = arith.constant 0 : index
    %c0_79 = arith.constant 0 : index
    %116 = vector.load %arg12[%c2_77, %c0_78, %c0_79] : memref<8x8x256xf32, #tpu.memory_space<vmem>>, vector<1x1x256xf32>
    %117 = vector.shape_cast %116 : vector<1x1x256xf32> to vector<1x256xf32>
    %118 = vector.shape_cast %115 : vector<1x256xf32> to vector<1x1x256xf32>
    tpu.vector_store %arg12[%c2_77, %c0_78, %c0_79], %118 {strides = array<i32>} : memref<8x8x256xf32, #tpu.memory_space<vmem>>, vector<1x1x256xf32>,
    %c10 = arith.constant 10 : index
    %119 = memref.load %arg0[%c10] : memref<64xi32, #tpu.memory_space<smem>>
    %120 = arith.index_cast %119 : i32 to index
    %c0_80 = arith.constant 0 : index
    %c0_81 = arith.constant 0 : index
    %121 = vector.load %arg1[%120, %c0_80, %c0_81] : memref<22x1x256xf32, #tpu.memory_space<vmem>>, vector<1x1x256xf32>
    %122 = vector.shape_cast %121 : vector<1x1x256xf32> to vector<1x256xf32>
    %c2_82 = arith.constant 2 : index
    %c1_83 = arith.constant 1 : index
    %c0_84 = arith.constant 0 : index
    %123 = vector.load %arg12[%c2_82, %c1_83, %c0_84] : memref<8x8x256xf32, #tpu.memory_space<vmem>>, vector<1x1x256xf32>
    %124 = vector.shape_cast %123 : vector<1x1x256xf32> to vector<1x256xf32>
    %125 = vector.shape_cast %122 : vector<1x256xf32> to vector<1x1x256xf32>
    tpu.vector_store %arg12[%c2_82, %c1_83, %c0_84], %125 {strides = array<i32>} : memref<8x8x256xf32, #tpu.memory_space<vmem>>, vector<1x1x256xf32>,
    %c18 = arith.constant 18 : index
    %126 = memref.load %arg0[%c18] : memref<64xi32, #tpu.memory_space<smem>>
    %127 = arith.index_cast %126 : i32 to index
    %c0_85 = arith.constant 0 : index
    %c0_86 = arith.constant 0 : index
    %128 = vector.load %arg1[%127, %c0_85, %c0_86] : memref<22x1x256xf32, #tpu.memory_space<vmem>>, vector<1x1x256xf32>
    %129 = vector.shape_cast %128 : vector<1x1x256xf32> to vector<1x256xf32>
    %c2_87 = arith.constant 2 : index
    %c2_88 = arith.constant 2 : index
    %c0_89 = arith.constant 0 : index
    %130 = vector.load %arg12[%c2_87, %c2_88, %c0_89] : memref<8x8x256xf32, #tpu.memory_space<vmem>>, vector<1x1x256xf32>
    %131 = vector.shape_cast %130 : vector<1x1x256xf32> to vector<1x256xf32>
    %132 = vector.shape_cast %129 : vector<1x256xf32> to vector<1x1x256xf32>
    tpu.vector_store %arg12[%c2_87, %c2_88, %c0_89], %132 {strides = array<i32>} : memref<8x8x256xf32, #tpu.memory_space<vmem>>, vector<1x1x256xf32>,
    %c26 = arith.constant 26 : index
    %133 = memref.load %arg0[%c26] : memref<64xi32, #tpu.memory_space<smem>>
    %134 = arith.index_cast %133 : i32 to index
    %c0_90 = arith.constant 0 : index
    %c0_91 = arith.constant 0 : index
    %135 = vector.load %arg1[%134, %c0_90, %c0_91] : memref<22x1x256xf32, #tpu.memory_space<vmem>>, vector<1x1x256xf32>
    %136 = vector.shape_cast %135 : vector<1x1x256xf32> to vector<1x256xf32>
    %c2_92 = arith.constant 2 : index
    %c3_93 = arith.constant 3 : index
    %c0_94 = arith.constant 0 : index
    %137 = vector.load %arg12[%c2_92, %c3_93, %c0_94] : memref<8x8x256xf32, #tpu.memory_space<vmem>>, vector<1x1x256xf32>
    %138 = vector.shape_cast %137 : vector<1x1x256xf32> to vector<1x256xf32>
    %139 = vector.shape_cast %136 : vector<1x256xf32> to vector<1x1x256xf32>
    tpu.vector_store %arg12[%c2_92, %c3_93, %c0_94], %139 {strides = array<i32>} : memref<8x8x256xf32, #tpu.memory_space<vmem>>, vector<1x1x256xf32>,
    %c34 = arith.constant 34 : index
    %140 = memref.load %arg0[%c34] : memref<64xi32, #tpu.memory_space<smem>>
    %141 = arith.index_cast %140 : i32 to index
    %c0_95 = arith.constant 0 : index
    %c0_96 = arith.constant 0 : index
    %142 = vector.load %arg1[%141, %c0_95, %c0_96] : memref<22x1x256xf32, #tpu.memory_space<vmem>>, vector<1x1x256xf32>
    %143 = vector.shape_cast %142 : vector<1x1x256xf32> to vector<1x256xf32>
    %c2_97 = arith.constant 2 : index
    %c4_98 = arith.constant 4 : index
    %c0_99 = arith.constant 0 : index
    %144 = vector.load %arg12[%c2_97, %c4_98, %c0_99] : memref<8x8x256xf32, #tpu.memory_space<vmem>>, vector<1x1x256xf32>
    %145 = vector.shape_cast %144 : vector<1x1x256xf32> to vector<1x256xf32>
    %146 = vector.shape_cast %143 : vector<1x256xf32> to vector<1x1x256xf32>
    tpu.vector_store %arg12[%c2_97, %c4_98, %c0_99], %146 {strides = array<i32>} : memref<8x8x256xf32, #tpu.memory_space<vmem>>, vector<1x1x256xf32>,
    %c42 = arith.constant 42 : index
    %147 = memref.load %arg0[%c42] : memref<64xi32, #tpu.memory_space<smem>>
    %148 = arith.index_cast %147 : i32 to index
    %c0_100 = arith.constant 0 : index
    %c0_101 = arith.constant 0 : index
    %149 = vector.load %arg1[%148, %c0_100, %c0_101] : memref<22x1x256xf32, #tpu.memory_space<vmem>>, vector<1x1x256xf32>
    %150 = vector.shape_cast %149 : vector<1x1x256xf32> to vector<1x256xf32>
    %c2_102 = arith.constant 2 : index
    %c5_103 = arith.constant 5 : index
    %c0_104 = arith.constant 0 : index
    %151 = vector.load %arg12[%c2_102, %c5_103, %c0_104] : memref<8x8x256xf32, #tpu.memory_space<vmem>>, vector<1x1x256xf32>
    %152 = vector.shape_cast %151 : vector<1x1x256xf32> to vector<1x256xf32>
    %153 = vector.shape_cast %150 : vector<1x256xf32> to vector<1x1x256xf32>
    tpu.vector_store %arg12[%c2_102, %c5_103, %c0_104], %153 {strides = array<i32>} : memref<8x8x256xf32, #tpu.memory_space<vmem>>, vector<1x1x256xf32>,
    %c50 = arith.constant 50 : index
    %154 = memref.load %arg0[%c50] : memref<64xi32, #tpu.memory_space<smem>>
    %155 = arith.index_cast %154 : i32 to index
    %c0_105 = arith.constant 0 : index
    %c0_106 = arith.constant 0 : index
    %156 = vector.load %arg1[%155, %c0_105, %c0_106] : memref<22x1x256xf32, #tpu.memory_space<vmem>>, vector<1x1x256xf32>
    %157 = vector.shape_cast %156 : vector<1x1x256xf32> to vector<1x256xf32>
    %c2_107 = arith.constant 2 : index
    %c6_108 = arith.constant 6 : index
    %c0_109 = arith.constant 0 : index
    %158 = vector.load %arg12[%c2_107, %c6_108, %c0_109] : memref<8x8x256xf32, #tpu.memory_space<vmem>>, vector<1x1x256xf32>
    %159 = vector.shape_cast %158 : vector<1x1x256xf32> to vector<1x256xf32>
    %160 = vector.shape_cast %157 : vector<1x256xf32> to vector<1x1x256xf32>
    tpu.vector_store %arg12[%c2_107, %c6_108, %c0_109], %160 {strides = array<i32>} : memref<8x8x256xf32, #tpu.memory_space<vmem>>, vector<1x1x256xf32>,
    %c58 = arith.constant 58 : index
    %161 = memref.load %arg0[%c58] : memref<64xi32, #tpu.memory_space<smem>>
    %162 = arith.index_cast %161 : i32 to index
    %c0_110 = arith.constant 0 : index
    %c0_111 = arith.constant 0 : index
    %163 = vector.load %arg1[%162, %c0_110, %c0_111] : memref<22x1x256xf32, #tpu.memory_space<vmem>>, vector<1x1x256xf32>
    %164 = vector.shape_cast %163 : vector<1x1x256xf32> to vector<1x256xf32>
    %c2_112 = arith.constant 2 : index
    %c7_113 = arith.constant 7 : index
    %c0_114 = arith.constant 0 : index
    %165 = vector.load %arg12[%c2_112, %c7_113, %c0_114] : memref<8x8x256xf32, #tpu.memory_space<vmem>>, vector<1x1x256xf32>
    %166 = vector.shape_cast %165 : vector<1x1x256xf32> to vector<1x256xf32>
    %167 = vector.shape_cast %164 : vector<1x256xf32> to vector<1x1x256xf32>
    tpu.vector_store %arg12[%c2_112, %c7_113, %c0_114], %167 {strides = array<i32>} : memref<8x8x256xf32, #tpu.memory_space<vmem>>, vector<1x1x256xf32>,
    %c3_115 = arith.constant 3 : index
    %168 = memref.load %arg0[%c3_115] : memref<64xi32, #tpu.memory_space<smem>>
    %169 = arith.index_cast %168 : i32 to index
    %c0_116 = arith.constant 0 : index
    %c0_117 = arith.constant 0 : index
    %170 = vector.load %arg1[%169, %c0_116, %c0_117] : memref<22x1x256xf32, #tpu.memory_space<vmem>>, vector<1x1x256xf32>
    %171 = vector.shape_cast %170 : vector<1x1x256xf32> to vector<1x256xf32>
    %c3_118 = arith.constant 3 : index
    %c0_119 = arith.constant 0 : index
    %c0_120 = arith.constant 0 : index
    %172 = vector.load %arg12[%c3_118, %c0_119, %c0_120] : memref<8x8x256xf32, #tpu.memory_space<vmem>>, vector<1x1x256xf32>
    %173 = vector.shape_cast %172 : vector<1x1x256xf32> to vector<1x256xf32>
    %174 = vector.shape_cast %171 : vector<1x256xf32> to vector<1x1x256xf32>
    tpu.vector_store %arg12[%c3_118, %c0_119, %c0_120], %174 {strides = array<i32>} : memref<8x8x256xf32, #tpu.memory_space<vmem>>, vector<1x1x256xf32>,
    %c11 = arith.constant 11 : index
    %175 = memref.load %arg0[%c11] : memref<64xi32, #tpu.memory_space<smem>>
    %176 = arith.index_cast %175 : i32 to index
    %c0_121 = arith.constant 0 : index
    %c0_122 = arith.constant 0 : index
    %177 = vector.load %arg1[%176, %c0_121, %c0_122] : memref<22x1x256xf32, #tpu.memory_space<vmem>>, vector<1x1x256xf32>
    %178 = vector.shape_cast %177 : vector<1x1x256xf32> to vector<1x256xf32>
    %c3_123 = arith.constant 3 : index
    %c1_124 = arith.constant 1 : index
    %c0_125 = arith.constant 0 : index
    %179 = vector.load %arg12[%c3_123, %c1_124, %c0_125] : memref<8x8x256xf32, #tpu.memory_space<vmem>>, vector<1x1x256xf32>
    %180 = vector.shape_cast %179 : vector<1x1x256xf32> to vector<1x256xf32>
    %181 = vector.shape_cast %178 : vector<1x256xf32> to vector<1x1x256xf32>
    tpu.vector_store %arg12[%c3_123, %c1_124, %c0_125], %181 {strides = array<i32>} : memref<8x8x256xf32, #tpu.memory_space<vmem>>, vector<1x1x256xf32>,
    %c19 = arith.constant 19 : index
    %182 = memref.load %arg0[%c19] : memref<64xi32, #tpu.memory_space<smem>>
    %183 = arith.index_cast %182 : i32 to index
    %c0_126 = arith.constant 0 : index
    %c0_127 = arith.constant 0 : index
    %184 = vector.load %arg1[%183, %c0_126, %c0_127] : memref<22x1x256xf32, #tpu.memory_space<vmem>>, vector<1x1x256xf32>
    %185 = vector.shape_cast %184 : vector<1x1x256xf32> to vector<1x256xf32>
    %c3_128 = arith.constant 3 : index
    %c2_129 = arith.constant 2 : index
    %c0_130 = arith.constant 0 : index
    %186 = vector.load %arg12[%c3_128, %c2_129, %c0_130] : memref<8x8x256xf32, #tpu.memory_space<vmem>>, vector<1x1x256xf32>
    %187 = vector.shape_cast %186 : vector<1x1x256xf32> to vector<1x256xf32>
    %188 = vector.shape_cast %185 : vector<1x256xf32> to vector<1x1x256xf32>
    tpu.vector_store %arg12[%c3_128, %c2_129, %c0_130], %188 {strides = array<i32>} : memref<8x8x256xf32, #tpu.memory_space<vmem>>, vector<1x1x256xf32>,
    %c27 = arith.constant 27 : index
    %189 = memref.load %arg0[%c27] : memref<64xi32, #tpu.memory_space<smem>>
    %190 = arith.index_cast %189 : i32 to index
    %c0_131 = arith.constant 0 : index
    %c0_132 = arith.constant 0 : index
    %191 = vector.load %arg1[%190, %c0_131, %c0_132] : memref<22x1x256xf32, #tpu.memory_space<vmem>>, vector<1x1x256xf32>
    %192 = vector.shape_cast %191 : vector<1x1x256xf32> to vector<1x256xf32>
    %c3_133 = arith.constant 3 : index
    %c3_134 = arith.constant 3 : index
    %c0_135 = arith.constant 0 : index
    %193 = vector.load %arg12[%c3_133, %c3_134, %c0_135] : memref<8x8x256xf32, #tpu.memory_space<vmem>>, vector<1x1x256xf32>
    %194 = vector.shape_cast %193 : vector<1x1x256xf32> to vector<1x256xf32>
    %195 = vector.shape_cast %192 : vector<1x256xf32> to vector<1x1x256xf32>
    tpu.vector_store %arg12[%c3_133, %c3_134, %c0_135], %195 {strides = array<i32>} : memref<8x8x256xf32, #tpu.memory_space<vmem>>, vector<1x1x256xf32>,
    %c35 = arith.constant 35 : index
    %196 = memref.load %arg0[%c35] : memref<64xi32, #tpu.memory_space<smem>>
    %197 = arith.index_cast %196 : i32 to index
    %c0_136 = arith.constant 0 : index
    %c0_137 = arith.constant 0 : index
    %198 = vector.load %arg1[%197, %c0_136, %c0_137] : memref<22x1x256xf32, #tpu.memory_space<vmem>>, vector<1x1x256xf32>
    %199 = vector.shape_cast %198 : vector<1x1x256xf32> to vector<1x256xf32>
    %c3_138 = arith.constant 3 : index
    %c4_139 = arith.constant 4 : index
    %c0_140 = arith.constant 0 : index
    %200 = vector.load %arg12[%c3_138, %c4_139, %c0_140] : memref<8x8x256xf32, #tpu.memory_space<vmem>>, vector<1x1x256xf32>
    %201 = vector.shape_cast %200 : vector<1x1x256xf32> to vector<1x256xf32>
    %202 = vector.shape_cast %199 : vector<1x256xf32> to vector<1x1x256xf32>
    tpu.vector_store %arg12[%c3_138, %c4_139, %c0_140], %202 {strides = array<i32>} : memref<8x8x256xf32, #tpu.memory_space<vmem>>, vector<1x1x256xf32>,
    %c43 = arith.constant 43 : index
    %203 = memref.load %arg0[%c43] : memref<64xi32, #tpu.memory_space<smem>>
    %204 = arith.index_cast %203 : i32 to index
    %c0_141 = arith.constant 0 : index
    %c0_142 = arith.constant 0 : index
    %205 = vector.load %arg1[%204, %c0_141, %c0_142] : memref<22x1x256xf32, #tpu.memory_space<vmem>>, vector<1x1x256xf32>
    %206 = vector.shape_cast %205 : vector<1x1x256xf32> to vector<1x256xf32>
    %c3_143 = arith.constant 3 : index
    %c5_144 = arith.constant 5 : index
    %c0_145 = arith.constant 0 : index
    %207 = vector.load %arg12[%c3_143, %c5_144, %c0_145] : memref<8x8x256xf32, #tpu.memory_space<vmem>>, vector<1x1x256xf32>
    %208 = vector.shape_cast %207 : vector<1x1x256xf32> to vector<1x256xf32>
    %209 = vector.shape_cast %206 : vector<1x256xf32> to vector<1x1x256xf32>
    tpu.vector_store %arg12[%c3_143, %c5_144, %c0_145], %209 {strides = array<i32>} : memref<8x8x256xf32, #tpu.memory_space<vmem>>, vector<1x1x256xf32>,
    %c51 = arith.constant 51 : index
    %210 = memref.load %arg0[%c51] : memref<64xi32, #tpu.memory_space<smem>>
    %211 = arith.index_cast %210 : i32 to index
    %c0_146 = arith.constant 0 : index
    %c0_147 = arith.constant 0 : index
    %212 = vector.load %arg1[%211, %c0_146, %c0_147] : memref<22x1x256xf32, #tpu.memory_space<vmem>>, vector<1x1x256xf32>
    %213 = vector.shape_cast %212 : vector<1x1x256xf32> to vector<1x256xf32>
    %c3_148 = arith.constant 3 : index
    %c6_149 = arith.constant 6 : index
    %c0_150 = arith.constant 0 : index
    %214 = vector.load %arg12[%c3_148, %c6_149, %c0_150] : memref<8x8x256xf32, #tpu.memory_space<vmem>>, vector<1x1x256xf32>
    %215 = vector.shape_cast %214 : vector<1x1x256xf32> to vector<1x256xf32>
    %216 = vector.shape_cast %213 : vector<1x256xf32> to vector<1x1x256xf32>
    tpu.vector_store %arg12[%c3_148, %c6_149, %c0_150], %216 {strides = array<i32>} : memref<8x8x256xf32, #tpu.memory_space<vmem>>, vector<1x1x256xf32>,
    %c59 = arith.constant 59 : index
    %217 = memref.load %arg0[%c59] : memref<64xi32, #tpu.memory_space<smem>>
    %218 = arith.index_cast %217 : i32 to index
    %c0_151 = arith.constant 0 : index
    %c0_152 = arith.constant 0 : index
    %219 = vector.load %arg1[%218, %c0_151, %c0_152] : memref<22x1x256xf32, #tpu.memory_space<vmem>>, vector<1x1x256xf32>
    %220 = vector.shape_cast %219 : vector<1x1x256xf32> to vector<1x256xf32>
    %c3_153 = arith.constant 3 : index
    %c7_154 = arith.constant 7 : index
    %c0_155 = arith.constant 0 : index
    %221 = vector.load %arg12[%c3_153, %c7_154, %c0_155] : memref<8x8x256xf32, #tpu.memory_space<vmem>>, vector<1x1x256xf32>
    %222 = vector.shape_cast %221 : vector<1x1x256xf32> to vector<1x256xf32>
    %223 = vector.shape_cast %220 : vector<1x256xf32> to vector<1x1x256xf32>
    tpu.vector_store %arg12[%c3_153, %c7_154, %c0_155], %223 {strides = array<i32>} : memref<8x8x256xf32, #tpu.memory_space<vmem>>, vector<1x1x256xf32>,
    %c4_156 = arith.constant 4 : index
    %224 = memref.load %arg0[%c4_156] : memref<64xi32, #tpu.memory_space<smem>>
    %225 = arith.index_cast %224 : i32 to index
    %c0_157 = arith.constant 0 : index
    %c0_158 = arith.constant 0 : index
    %226 = vector.load %arg1[%225, %c0_157, %c0_158] : memref<22x1x256xf32, #tpu.memory_space<vmem>>, vector<1x1x256xf32>
    %227 = vector.shape_cast %226 : vector<1x1x256xf32> to vector<1x256xf32>
    %c4_159 = arith.constant 4 : index
    %c0_160 = arith.constant 0 : index
    %c0_161 = arith.constant 0 : index
    %228 = vector.load %arg12[%c4_159, %c0_160, %c0_161] : memref<8x8x256xf32, #tpu.memory_space<vmem>>, vector<1x1x256xf32>
    %229 = vector.shape_cast %228 : vector<1x1x256xf32> to vector<1x256xf32>
    %230 = vector.shape_cast %227 : vector<1x256xf32> to vector<1x1x256xf32>
    tpu.vector_store %arg12[%c4_159, %c0_160, %c0_161], %230 {strides = array<i32>} : memref<8x8x256xf32, #tpu.memory_space<vmem>>, vector<1x1x256xf32>,
    %c12 = arith.constant 12 : index
    %231 = memref.load %arg0[%c12] : memref<64xi32, #tpu.memory_space<smem>>
    %232 = arith.index_cast %231 : i32 to index
    %c0_162 = arith.constant 0 : index
    %c0_163 = arith.constant 0 : index
    %233 = vector.load %arg1[%232, %c0_162, %c0_163] : memref<22x1x256xf32, #tpu.memory_space<vmem>>, vector<1x1x256xf32>
    %234 = vector.shape_cast %233 : vector<1x1x256xf32> to vector<1x256xf32>
    %c4_164 = arith.constant 4 : index
    %c1_165 = arith.constant 1 : index
    %c0_166 = arith.constant 0 : index
    %235 = vector.load %arg12[%c4_164, %c1_165, %c0_166] : memref<8x8x256xf32, #tpu.memory_space<vmem>>, vector<1x1x256xf32>
    %236 = vector.shape_cast %235 : vector<1x1x256xf32> to vector<1x256xf32>
    %237 = vector.shape_cast %234 : vector<1x256xf32> to vector<1x1x256xf32>
    tpu.vector_store %arg12[%c4_164, %c1_165, %c0_166], %237 {strides = array<i32>} : memref<8x8x256xf32, #tpu.memory_space<vmem>>, vector<1x1x256xf32>,
    %c20 = arith.constant 20 : index
    %238 = memref.load %arg0[%c20] : memref<64xi32, #tpu.memory_space<smem>>
    %239 = arith.index_cast %238 : i32 to index
    %c0_167 = arith.constant 0 : index
    %c0_168 = arith.constant 0 : index
    %240 = vector.load %arg1[%239, %c0_167, %c0_168] : memref<22x1x256xf32, #tpu.memory_space<vmem>>, vector<1x1x256xf32>
    %241 = vector.shape_cast %240 : vector<1x1x256xf32> to vector<1x256xf32>
    %c4_169 = arith.constant 4 : index
    %c2_170 = arith.constant 2 : index
    %c0_171 = arith.constant 0 : index
    %242 = vector.load %arg12[%c4_169, %c2_170, %c0_171] : memref<8x8x256xf32, #tpu.memory_space<vmem>>, vector<1x1x256xf32>
    %243 = vector.shape_cast %242 : vector<1x1x256xf32> to vector<1x256xf32>
    %244 = vector.shape_cast %241 : vector<1x256xf32> to vector<1x1x256xf32>
    tpu.vector_store %arg12[%c4_169, %c2_170, %c0_171], %244 {strides = array<i32>} : memref<8x8x256xf32, #tpu.memory_space<vmem>>, vector<1x1x256xf32>,
    %c28 = arith.constant 28 : index
    %245 = memref.load %arg0[%c28] : memref<64xi32, #tpu.memory_space<smem>>
    %246 = arith.index_cast %245 : i32 to index
    %c0_172 = arith.constant 0 : index
    %c0_173 = arith.constant 0 : index
    %247 = vector.load %arg1[%246, %c0_172, %c0_173] : memref<22x1x256xf32, #tpu.memory_space<vmem>>, vector<1x1x256xf32>
    %248 = vector.shape_cast %247 : vector<1x1x256xf32> to vector<1x256xf32>
    %c4_174 = arith.constant 4 : index
    %c3_175 = arith.constant 3 : index
    %c0_176 = arith.constant 0 : index
    %249 = vector.load %arg12[%c4_174, %c3_175, %c0_176] : memref<8x8x256xf32, #tpu.memory_space<vmem>>, vector<1x1x256xf32>
    %250 = vector.shape_cast %249 : vector<1x1x256xf32> to vector<1x256xf32>
    %251 = vector.shape_cast %248 : vector<1x256xf32> to vector<1x1x256xf32>
    tpu.vector_store %arg12[%c4_174, %c3_175, %c0_176], %251 {strides = array<i32>} : memref<8x8x256xf32, #tpu.memory_space<vmem>>, vector<1x1x256xf32>,
    %c36 = arith.constant 36 : index
    %252 = memref.load %arg0[%c36] : memref<64xi32, #tpu.memory_space<smem>>
    %253 = arith.index_cast %252 : i32 to index
    %c0_177 = arith.constant 0 : index
    %c0_178 = arith.constant 0 : index
    %254 = vector.load %arg1[%253, %c0_177, %c0_178] : memref<22x1x256xf32, #tpu.memory_space<vmem>>, vector<1x1x256xf32>
    %255 = vector.shape_cast %254 : vector<1x1x256xf32> to vector<1x256xf32>
    %c4_179 = arith.constant 4 : index
    %c4_180 = arith.constant 4 : index
    %c0_181 = arith.constant 0 : index
    %256 = vector.load %arg12[%c4_179, %c4_180, %c0_181] : memref<8x8x256xf32, #tpu.memory_space<vmem>>, vector<1x1x256xf32>
    %257 = vector.shape_cast %256 : vector<1x1x256xf32> to vector<1x256xf32>
    %258 = vector.shape_cast %255 : vector<1x256xf32> to vector<1x1x256xf32>
    tpu.vector_store %arg12[%c4_179, %c4_180, %c0_181], %258 {strides = array<i32>} : memref<8x8x256xf32, #tpu.memory_space<vmem>>, vector<1x1x256xf32>,
    %c44 = arith.constant 44 : index
    %259 = memref.load %arg0[%c44] : memref<64xi32, #tpu.memory_space<smem>>
    %260 = arith.index_cast %259 : i32 to index
    %c0_182 = arith.constant 0 : index
    %c0_183 = arith.constant 0 : index
    %261 = vector.load %arg1[%260, %c0_182, %c0_183] : memref<22x1x256xf32, #tpu.memory_space<vmem>>, vector<1x1x256xf32>
    %262 = vector.shape_cast %261 : vector<1x1x256xf32> to vector<1x256xf32>
    %c4_184 = arith.constant 4 : index
    %c5_185 = arith.constant 5 : index
    %c0_186 = arith.constant 0 : index
    %263 = vector.load %arg12[%c4_184, %c5_185, %c0_186] : memref<8x8x256xf32, #tpu.memory_space<vmem>>, vector<1x1x256xf32>
    %264 = vector.shape_cast %263 : vector<1x1x256xf32> to vector<1x256xf32>
    %265 = vector.shape_cast %262 : vector<1x256xf32> to vector<1x1x256xf32>
    tpu.vector_store %arg12[%c4_184, %c5_185, %c0_186], %265 {strides = array<i32>} : memref<8x8x256xf32, #tpu.memory_space<vmem>>, vector<1x1x256xf32>,
    %c52 = arith.constant 52 : index
    %266 = memref.load %arg0[%c52] : memref<64xi32, #tpu.memory_space<smem>>
    %267 = arith.index_cast %266 : i32 to index
    %c0_187 = arith.constant 0 : index
    %c0_188 = arith.constant 0 : index
    %268 = vector.load %arg1[%267, %c0_187, %c0_188] : memref<22x1x256xf32, #tpu.memory_space<vmem>>, vector<1x1x256xf32>
    %269 = vector.shape_cast %268 : vector<1x1x256xf32> to vector<1x256xf32>
    %c4_189 = arith.constant 4 : index
    %c6_190 = arith.constant 6 : index
    %c0_191 = arith.constant 0 : index
    %270 = vector.load %arg12[%c4_189, %c6_190, %c0_191] : memref<8x8x256xf32, #tpu.memory_space<vmem>>, vector<1x1x256xf32>
    %271 = vector.shape_cast %270 : vector<1x1x256xf32> to vector<1x256xf32>
    %272 = vector.shape_cast %269 : vector<1x256xf32> to vector<1x1x256xf32>
    tpu.vector_store %arg12[%c4_189, %c6_190, %c0_191], %272 {strides = array<i32>} : memref<8x8x256xf32, #tpu.memory_space<vmem>>, vector<1x1x256xf32>,
    %c60 = arith.constant 60 : index
    %273 = memref.load %arg0[%c60] : memref<64xi32, #tpu.memory_space<smem>>
    %274 = arith.index_cast %273 : i32 to index
    %c0_192 = arith.constant 0 : index
    %c0_193 = arith.constant 0 : index
    %275 = vector.load %arg1[%274, %c0_192, %c0_193] : memref<22x1x256xf32, #tpu.memory_space<vmem>>, vector<1x1x256xf32>
    %276 = vector.shape_cast %275 : vector<1x1x256xf32> to vector<1x256xf32>
    %c4_194 = arith.constant 4 : index
    %c7_195 = arith.constant 7 : index
    %c0_196 = arith.constant 0 : index
    %277 = vector.load %arg12[%c4_194, %c7_195, %c0_196] : memref<8x8x256xf32, #tpu.memory_space<vmem>>, vector<1x1x256xf32>
    %278 = vector.shape_cast %277 : vector<1x1x256xf32> to vector<1x256xf32>
    %279 = vector.shape_cast %276 : vector<1x256xf32> to vector<1x1x256xf32>
    tpu.vector_store %arg12[%c4_194, %c7_195, %c0_196], %279 {strides = array<i32>} : memref<8x8x256xf32, #tpu.memory_space<vmem>>, vector<1x1x256xf32>,
    %c5_197 = arith.constant 5 : index
    %280 = memref.load %arg0[%c5_197] : memref<64xi32, #tpu.memory_space<smem>>
    %281 = arith.index_cast %280 : i32 to index
    %c0_198 = arith.constant 0 : index
    %c0_199 = arith.constant 0 : index
    %282 = vector.load %arg1[%281, %c0_198, %c0_199] : memref<22x1x256xf32, #tpu.memory_space<vmem>>, vector<1x1x256xf32>
    %283 = vector.shape_cast %282 : vector<1x1x256xf32> to vector<1x256xf32>
    %c5_200 = arith.constant 5 : index
    %c0_201 = arith.constant 0 : index
    %c0_202 = arith.constant 0 : index
    %284 = vector.load %arg12[%c5_200, %c0_201, %c0_202] : memref<8x8x256xf32, #tpu.memory_space<vmem>>, vector<1x1x256xf32>
    %285 = vector.shape_cast %284 : vector<1x1x256xf32> to vector<1x256xf32>
    %286 = vector.shape_cast %283 : vector<1x256xf32> to vector<1x1x256xf32>
    tpu.vector_store %arg12[%c5_200, %c0_201, %c0_202], %286 {strides = array<i32>} : memref<8x8x256xf32, #tpu.memory_space<vmem>>, vector<1x1x256xf32>,
    %c13 = arith.constant 13 : index
    %287 = memref.load %arg0[%c13] : memref<64xi32, #tpu.memory_space<smem>>
    %288 = arith.index_cast %287 : i32 to index
    %c0_203 = arith.constant 0 : index
    %c0_204 = arith.constant 0 : index
    %289 = vector.load %arg1[%288, %c0_203, %c0_204] : memref<22x1x256xf32, #tpu.memory_space<vmem>>, vector<1x1x256xf32>
    %290 = vector.shape_cast %289 : vector<1x1x256xf32> to vector<1x256xf32>
    %c5_205 = arith.constant 5 : index
    %c1_206 = arith.constant 1 : index
    %c0_207 = arith.constant 0 : index
    %291 = vector.load %arg12[%c5_205, %c1_206, %c0_207] : memref<8x8x256xf32, #tpu.memory_space<vmem>>, vector<1x1x256xf32>
    %292 = vector.shape_cast %291 : vector<1x1x256xf32> to vector<1x256xf32>
    %293 = vector.shape_cast %290 : vector<1x256xf32> to vector<1x1x256xf32>
    tpu.vector_store %arg12[%c5_205, %c1_206, %c0_207], %293 {strides = array<i32>} : memref<8x8x256xf32, #tpu.memory_space<vmem>>, vector<1x1x256xf32>,
    %c21 = arith.constant 21 : index
    %294 = memref.load %arg0[%c21] : memref<64xi32, #tpu.memory_space<smem>>
    %295 = arith.index_cast %294 : i32 to index
    %c0_208 = arith.constant 0 : index
    %c0_209 = arith.constant 0 : index
    %296 = vector.load %arg1[%295, %c0_208, %c0_209] : memref<22x1x256xf32, #tpu.memory_space<vmem>>, vector<1x1x256xf32>
    %297 = vector.shape_cast %296 : vector<1x1x256xf32> to vector<1x256xf32>
    %c5_210 = arith.constant 5 : index
    %c2_211 = arith.constant 2 : index
    %c0_212 = arith.constant 0 : index
    %298 = vector.load %arg12[%c5_210, %c2_211, %c0_212] : memref<8x8x256xf32, #tpu.memory_space<vmem>>, vector<1x1x256xf32>
    %299 = vector.shape_cast %298 : vector<1x1x256xf32> to vector<1x256xf32>
    %300 = vector.shape_cast %297 : vector<1x256xf32> to vector<1x1x256xf32>
    tpu.vector_store %arg12[%c5_210, %c2_211, %c0_212], %300 {strides = array<i32>} : memref<8x8x256xf32, #tpu.memory_space<vmem>>, vector<1x1x256xf32>,
    %c29 = arith.constant 29 : index
    %301 = memref.load %arg0[%c29] : memref<64xi32, #tpu.memory_space<smem>>
    %302 = arith.index_cast %301 : i32 to index
    %c0_213 = arith.constant 0 : index
    %c0_214 = arith.constant 0 : index
    %303 = vector.load %arg1[%302, %c0_213, %c0_214] : memref<22x1x256xf32, #tpu.memory_space<vmem>>, vector<1x1x256xf32>
    %304 = vector.shape_cast %303 : vector<1x1x256xf32> to vector<1x256xf32>
    %c5_215 = arith.constant 5 : index
    %c3_216 = arith.constant 3 : index
    %c0_217 = arith.constant 0 : index
    %305 = vector.load %arg12[%c5_215, %c3_216, %c0_217] : memref<8x8x256xf32, #tpu.memory_space<vmem>>, vector<1x1x256xf32>
    %306 = vector.shape_cast %305 : vector<1x1x256xf32> to vector<1x256xf32>
    %307 = vector.shape_cast %304 : vector<1x256xf32> to vector<1x1x256xf32>
    tpu.vector_store %arg12[%c5_215, %c3_216, %c0_217], %307 {strides = array<i32>} : memref<8x8x256xf32, #tpu.memory_space<vmem>>, vector<1x1x256xf32>,
    %c37 = arith.constant 37 : index
    %308 = memref.load %arg0[%c37] : memref<64xi32, #tpu.memory_space<smem>>
    %309 = arith.index_cast %308 : i32 to index
    %c0_218 = arith.constant 0 : index
    %c0_219 = arith.constant 0 : index
    %310 = vector.load %arg1[%309, %c0_218, %c0_219] : memref<22x1x256xf32, #tpu.memory_space<vmem>>, vector<1x1x256xf32>
    %311 = vector.shape_cast %310 : vector<1x1x256xf32> to vector<1x256xf32>
    %c5_220 = arith.constant 5 : index
    %c4_221 = arith.constant 4 : index
    %c0_222 = arith.constant 0 : index
    %312 = vector.load %arg12[%c5_220, %c4_221, %c0_222] : memref<8x8x256xf32, #tpu.memory_space<vmem>>, vector<1x1x256xf32>
    %313 = vector.shape_cast %312 : vector<1x1x256xf32> to vector<1x256xf32>
    %314 = vector.shape_cast %311 : vector<1x256xf32> to vector<1x1x256xf32>
    tpu.vector_store %arg12[%c5_220, %c4_221, %c0_222], %314 {strides = array<i32>} : memref<8x8x256xf32, #tpu.memory_space<vmem>>, vector<1x1x256xf32>,
    %c45 = arith.constant 45 : index
    %315 = memref.load %arg0[%c45] : memref<64xi32, #tpu.memory_space<smem>>
    %316 = arith.index_cast %315 : i32 to index
    %c0_223 = arith.constant 0 : index
    %c0_224 = arith.constant 0 : index
    %317 = vector.load %arg1[%316, %c0_223, %c0_224] : memref<22x1x256xf32, #tpu.memory_space<vmem>>, vector<1x1x256xf32>
    %318 = vector.shape_cast %317 : vector<1x1x256xf32> to vector<1x256xf32>
    %c5_225 = arith.constant 5 : index
    %c5_226 = arith.constant 5 : index
    %c0_227 = arith.constant 0 : index
    %319 = vector.load %arg12[%c5_225, %c5_226, %c0_227] : memref<8x8x256xf32, #tpu.memory_space<vmem>>, vector<1x1x256xf32>
    %320 = vector.shape_cast %319 : vector<1x1x256xf32> to vector<1x256xf32>
    %321 = vector.shape_cast %318 : vector<1x256xf32> to vector<1x1x256xf32>
    tpu.vector_store %arg12[%c5_225, %c5_226, %c0_227], %321 {strides = array<i32>} : memref<8x8x256xf32, #tpu.memory_space<vmem>>, vector<1x1x256xf32>,
    %c53 = arith.constant 53 : index
    %322 = memref.load %arg0[%c53] : memref<64xi32, #tpu.memory_space<smem>>
    %323 = arith.index_cast %322 : i32 to index
    %c0_228 = arith.constant 0 : index
    %c0_229 = arith.constant 0 : index
    %324 = vector.load %arg1[%323, %c0_228, %c0_229] : memref<22x1x256xf32, #tpu.memory_space<vmem>>, vector<1x1x256xf32>
    %325 = vector.shape_cast %324 : vector<1x1x256xf32> to vector<1x256xf32>
    %c5_230 = arith.constant 5 : index
    %c6_231 = arith.constant 6 : index
    %c0_232 = arith.constant 0 : index
    %326 = vector.load %arg12[%c5_230, %c6_231, %c0_232] : memref<8x8x256xf32, #tpu.memory_space<vmem>>, vector<1x1x256xf32>
    %327 = vector.shape_cast %326 : vector<1x1x256xf32> to vector<1x256xf32>
    %328 = vector.shape_cast %325 : vector<1x256xf32> to vector<1x1x256xf32>
    tpu.vector_store %arg12[%c5_230, %c6_231, %c0_232], %328 {strides = array<i32>} : memref<8x8x256xf32, #tpu.memory_space<vmem>>, vector<1x1x256xf32>,
    %c61 = arith.constant 61 : index
    %329 = memref.load %arg0[%c61] : memref<64xi32, #tpu.memory_space<smem>>
    %330 = arith.index_cast %329 : i32 to index
    %c0_233 = arith.constant 0 : index
    %c0_234 = arith.constant 0 : index
    %331 = vector.load %arg1[%330, %c0_233, %c0_234] : memref<22x1x256xf32, #tpu.memory_space<vmem>>, vector<1x1x256xf32>
    %332 = vector.shape_cast %331 : vector<1x1x256xf32> to vector<1x256xf32>
    %c5_235 = arith.constant 5 : index
    %c7_236 = arith.constant 7 : index
    %c0_237 = arith.constant 0 : index
    %333 = vector.load %arg12[%c5_235, %c7_236, %c0_237] : memref<8x8x256xf32, #tpu.memory_space<vmem>>, vector<1x1x256xf32>
    %334 = vector.shape_cast %333 : vector<1x1x256xf32> to vector<1x256xf32>
    %335 = vector.shape_cast %332 : vector<1x256xf32> to vector<1x1x256xf32>
    tpu.vector_store %arg12[%c5_235, %c7_236, %c0_237], %335 {strides = array<i32>} : memref<8x8x256xf32, #tpu.memory_space<vmem>>, vector<1x1x256xf32>,
    %c6_238 = arith.constant 6 : index
    %336 = memref.load %arg0[%c6_238] : memref<64xi32, #tpu.memory_space<smem>>
    %337 = arith.index_cast %336 : i32 to index
    %c0_239 = arith.constant 0 : index
    %c0_240 = arith.constant 0 : index
    %338 = vector.load %arg1[%337, %c0_239, %c0_240] : memref<22x1x256xf32, #tpu.memory_space<vmem>>, vector<1x1x256xf32>
    %339 = vector.shape_cast %338 : vector<1x1x256xf32> to vector<1x256xf32>
    %c6_241 = arith.constant 6 : index
    %c0_242 = arith.constant 0 : index
    %c0_243 = arith.constant 0 : index
    %340 = vector.load %arg12[%c6_241, %c0_242, %c0_243] : memref<8x8x256xf32, #tpu.memory_space<vmem>>, vector<1x1x256xf32>
    %341 = vector.shape_cast %340 : vector<1x1x256xf32> to vector<1x256xf32>
    %342 = vector.shape_cast %339 : vector<1x256xf32> to vector<1x1x256xf32>
    tpu.vector_store %arg12[%c6_241, %c0_242, %c0_243], %342 {strides = array<i32>} : memref<8x8x256xf32, #tpu.memory_space<vmem>>, vector<1x1x256xf32>,
    %c14 = arith.constant 14 : index
    %343 = memref.load %arg0[%c14] : memref<64xi32, #tpu.memory_space<smem>>
    %344 = arith.index_cast %343 : i32 to index
    %c0_244 = arith.constant 0 : index
    %c0_245 = arith.constant 0 : index
    %345 = vector.load %arg1[%344, %c0_244, %c0_245] : memref<22x1x256xf32, #tpu.memory_space<vmem>>, vector<1x1x256xf32>
    %346 = vector.shape_cast %345 : vector<1x1x256xf32> to vector<1x256xf32>
    %c6_246 = arith.constant 6 : index
    %c1_247 = arith.constant 1 : index
    %c0_248 = arith.constant 0 : index
    %347 = vector.load %arg12[%c6_246, %c1_247, %c0_248] : memref<8x8x256xf32, #tpu.memory_space<vmem>>, vector<1x1x256xf32>
    %348 = vector.shape_cast %347 : vector<1x1x256xf32> to vector<1x256xf32>
    %349 = vector.shape_cast %346 : vector<1x256xf32> to vector<1x1x256xf32>
    tpu.vector_store %arg12[%c6_246, %c1_247, %c0_248], %349 {strides = array<i32>} : memref<8x8x256xf32, #tpu.memory_space<vmem>>, vector<1x1x256xf32>,
    %c22 = arith.constant 22 : index
    %350 = memref.load %arg0[%c22] : memref<64xi32, #tpu.memory_space<smem>>
    %351 = arith.index_cast %350 : i32 to index
    %c0_249 = arith.constant 0 : index
    %c0_250 = arith.constant 0 : index
    %352 = vector.load %arg1[%351, %c0_249, %c0_250] : memref<22x1x256xf32, #tpu.memory_space<vmem>>, vector<1x1x256xf32>
    %353 = vector.shape_cast %352 : vector<1x1x256xf32> to vector<1x256xf32>
    %c6_251 = arith.constant 6 : index
    %c2_252 = arith.constant 2 : index
    %c0_253 = arith.constant 0 : index
    %354 = vector.load %arg12[%c6_251, %c2_252, %c0_253] : memref<8x8x256xf32, #tpu.memory_space<vmem>>, vector<1x1x256xf32>
    %355 = vector.shape_cast %354 : vector<1x1x256xf32> to vector<1x256xf32>
    %356 = vector.shape_cast %353 : vector<1x256xf32> to vector<1x1x256xf32>
    tpu.vector_store %arg12[%c6_251, %c2_252, %c0_253], %356 {strides = array<i32>} : memref<8x8x256xf32, #tpu.memory_space<vmem>>, vector<1x1x256xf32>,
    %c30 = arith.constant 30 : index
    %357 = memref.load %arg0[%c30] : memref<64xi32, #tpu.memory_space<smem>>
    %358 = arith.index_cast %357 : i32 to index
    %c0_254 = arith.constant 0 : index
    %c0_255 = arith.constant 0 : index
    %359 = vector.load %arg1[%358, %c0_254, %c0_255] : memref<22x1x256xf32, #tpu.memory_space<vmem>>, vector<1x1x256xf32>
    %360 = vector.shape_cast %359 : vector<1x1x256xf32> to vector<1x256xf32>
    %c6_256 = arith.constant 6 : index
    %c3_257 = arith.constant 3 : index
    %c0_258 = arith.constant 0 : index
    %361 = vector.load %arg12[%c6_256, %c3_257, %c0_258] : memref<8x8x256xf32, #tpu.memory_space<vmem>>, vector<1x1x256xf32>
    %362 = vector.shape_cast %361 : vector<1x1x256xf32> to vector<1x256xf32>
    %363 = vector.shape_cast %360 : vector<1x256xf32> to vector<1x1x256xf32>
    tpu.vector_store %arg12[%c6_256, %c3_257, %c0_258], %363 {strides = array<i32>} : memref<8x8x256xf32, #tpu.memory_space<vmem>>, vector<1x1x256xf32>,
    %c38 = arith.constant 38 : index
    %364 = memref.load %arg0[%c38] : memref<64xi32, #tpu.memory_space<smem>>
    %365 = arith.index_cast %364 : i32 to index
    %c0_259 = arith.constant 0 : index
    %c0_260 = arith.constant 0 : index
    %366 = vector.load %arg1[%365, %c0_259, %c0_260] : memref<22x1x256xf32, #tpu.memory_space<vmem>>, vector<1x1x256xf32>
    %367 = vector.shape_cast %366 : vector<1x1x256xf32> to vector<1x256xf32>
    %c6_261 = arith.constant 6 : index
    %c4_262 = arith.constant 4 : index
    %c0_263 = arith.constant 0 : index
    %368 = vector.load %arg12[%c6_261, %c4_262, %c0_263] : memref<8x8x256xf32, #tpu.memory_space<vmem>>, vector<1x1x256xf32>
    %369 = vector.shape_cast %368 : vector<1x1x256xf32> to vector<1x256xf32>
    %370 = vector.shape_cast %367 : vector<1x256xf32> to vector<1x1x256xf32>
    tpu.vector_store %arg12[%c6_261, %c4_262, %c0_263], %370 {strides = array<i32>} : memref<8x8x256xf32, #tpu.memory_space<vmem>>, vector<1x1x256xf32>,
    %c46 = arith.constant 46 : index
    %371 = memref.load %arg0[%c46] : memref<64xi32, #tpu.memory_space<smem>>
    %372 = arith.index_cast %371 : i32 to index
    %c0_264 = arith.constant 0 : index
    %c0_265 = arith.constant 0 : index
    %373 = vector.load %arg1[%372, %c0_264, %c0_265] : memref<22x1x256xf32, #tpu.memory_space<vmem>>, vector<1x1x256xf32>
    %374 = vector.shape_cast %373 : vector<1x1x256xf32> to vector<1x256xf32>
    %c6_266 = arith.constant 6 : index
    %c5_267 = arith.constant 5 : index
    %c0_268 = arith.constant 0 : index
    %375 = vector.load %arg12[%c6_266, %c5_267, %c0_268] : memref<8x8x256xf32, #tpu.memory_space<vmem>>, vector<1x1x256xf32>
    %376 = vector.shape_cast %375 : vector<1x1x256xf32> to vector<1x256xf32>
    %377 = vector.shape_cast %374 : vector<1x256xf32> to vector<1x1x256xf32>
    tpu.vector_store %arg12[%c6_266, %c5_267, %c0_268], %377 {strides = array<i32>} : memref<8x8x256xf32, #tpu.memory_space<vmem>>, vector<1x1x256xf32>,
    %c54 = arith.constant 54 : index
    %378 = memref.load %arg0[%c54] : memref<64xi32, #tpu.memory_space<smem>>
    %379 = arith.index_cast %378 : i32 to index
    %c0_269 = arith.constant 0 : index
    %c0_270 = arith.constant 0 : index
    %380 = vector.load %arg1[%379, %c0_269, %c0_270] : memref<22x1x256xf32, #tpu.memory_space<vmem>>, vector<1x1x256xf32>
    %381 = vector.shape_cast %380 : vector<1x1x256xf32> to vector<1x256xf32>
    %c6_271 = arith.constant 6 : index
    %c6_272 = arith.constant 6 : index
    %c0_273 = arith.constant 0 : index
    %382 = vector.load %arg12[%c6_271, %c6_272, %c0_273] : memref<8x8x256xf32, #tpu.memory_space<vmem>>, vector<1x1x256xf32>
    %383 = vector.shape_cast %382 : vector<1x1x256xf32> to vector<1x256xf32>
    %384 = vector.shape_cast %381 : vector<1x256xf32> to vector<1x1x256xf32>
    tpu.vector_store %arg12[%c6_271, %c6_272, %c0_273], %384 {strides = array<i32>} : memref<8x8x256xf32, #tpu.memory_space<vmem>>, vector<1x1x256xf32>,
    %c62 = arith.constant 62 : index
    %385 = memref.load %arg0[%c62] : memref<64xi32, #tpu.memory_space<smem>>
    %386 = arith.index_cast %385 : i32 to index
    %c0_274 = arith.constant 0 : index
    %c0_275 = arith.constant 0 : index
    %387 = vector.load %arg1[%386, %c0_274, %c0_275] : memref<22x1x256xf32, #tpu.memory_space<vmem>>, vector<1x1x256xf32>
    %388 = vector.shape_cast %387 : vector<1x1x256xf32> to vector<1x256xf32>
    %c6_276 = arith.constant 6 : index
    %c7_277 = arith.constant 7 : index
    %c0_278 = arith.constant 0 : index
    %389 = vector.load %arg12[%c6_276, %c7_277, %c0_278] : memref<8x8x256xf32, #tpu.memory_space<vmem>>, vector<1x1x256xf32>
    %390 = vector.shape_cast %389 : vector<1x1x256xf32> to vector<1x256xf32>
    %391 = vector.shape_cast %388 : vector<1x256xf32> to vector<1x1x256xf32>
    tpu.vector_store %arg12[%c6_276, %c7_277, %c0_278], %391 {strides = array<i32>} : memref<8x8x256xf32, #tpu.memory_space<vmem>>, vector<1x1x256xf32>,
    %c7_279 = arith.constant 7 : index
    %392 = memref.load %arg0[%c7_279] : memref<64xi32, #tpu.memory_space<smem>>
    %393 = arith.index_cast %392 : i32 to index
    %c0_280 = arith.constant 0 : index
    %c0_281 = arith.constant 0 : index
    %394 = vector.load %arg1[%393, %c0_280, %c0_281] : memref<22x1x256xf32, #tpu.memory_space<vmem>>, vector<1x1x256xf32>
    %395 = vector.shape_cast %394 : vector<1x1x256xf32> to vector<1x256xf32>
    %c7_282 = arith.constant 7 : index
    %c0_283 = arith.constant 0 : index
    %c0_284 = arith.constant 0 : index
    %396 = vector.load %arg12[%c7_282, %c0_283, %c0_284] : memref<8x8x256xf32, #tpu.memory_space<vmem>>, vector<1x1x256xf32>
    %397 = vector.shape_cast %396 : vector<1x1x256xf32> to vector<1x256xf32>
    %398 = vector.shape_cast %395 : vector<1x256xf32> to vector<1x1x256xf32>
    tpu.vector_store %arg12[%c7_282, %c0_283, %c0_284], %398 {strides = array<i32>} : memref<8x8x256xf32, #tpu.memory_space<vmem>>, vector<1x1x256xf32>,
    %c15 = arith.constant 15 : index
    %399 = memref.load %arg0[%c15] : memref<64xi32, #tpu.memory_space<smem>>
    %400 = arith.index_cast %399 : i32 to index
    %c0_285 = arith.constant 0 : index
    %c0_286 = arith.constant 0 : index
    %401 = vector.load %arg1[%400, %c0_285, %c0_286] : memref<22x1x256xf32, #tpu.memory_space<vmem>>, vector<1x1x256xf32>
    %402 = vector.shape_cast %401 : vector<1x1x256xf32> to vector<1x256xf32>
    %c7_287 = arith.constant 7 : index
    %c1_288 = arith.constant 1 : index
    %c0_289 = arith.constant 0 : index
    %403 = vector.load %arg12[%c7_287, %c1_288, %c0_289] : memref<8x8x256xf32, #tpu.memory_space<vmem>>, vector<1x1x256xf32>
    %404 = vector.shape_cast %403 : vector<1x1x256xf32> to vector<1x256xf32>
    %405 = vector.shape_cast %402 : vector<1x256xf32> to vector<1x1x256xf32>
    tpu.vector_store %arg12[%c7_287, %c1_288, %c0_289], %405 {strides = array<i32>} : memref<8x8x256xf32, #tpu.memory_space<vmem>>, vector<1x1x256xf32>,
    %c23 = arith.constant 23 : index
    %406 = memref.load %arg0[%c23] : memref<64xi32, #tpu.memory_space<smem>>
    %407 = arith.index_cast %406 : i32 to index
    %c0_290 = arith.constant 0 : index
    %c0_291 = arith.constant 0 : index
    %408 = vector.load %arg1[%407, %c0_290, %c0_291] : memref<22x1x256xf32, #tpu.memory_space<vmem>>, vector<1x1x256xf32>
    %409 = vector.shape_cast %408 : vector<1x1x256xf32> to vector<1x256xf32>
    %c7_292 = arith.constant 7 : index
    %c2_293 = arith.constant 2 : index
    %c0_294 = arith.constant 0 : index
    %410 = vector.load %arg12[%c7_292, %c2_293, %c0_294] : memref<8x8x256xf32, #tpu.memory_space<vmem>>, vector<1x1x256xf32>
    %411 = vector.shape_cast %410 : vector<1x1x256xf32> to vector<1x256xf32>
    %412 = vector.shape_cast %409 : vector<1x256xf32> to vector<1x1x256xf32>
    tpu.vector_store %arg12[%c7_292, %c2_293, %c0_294], %412 {strides = array<i32>} : memref<8x8x256xf32, #tpu.memory_space<vmem>>, vector<1x1x256xf32>,
    %c31 = arith.constant 31 : index
    %413 = memref.load %arg0[%c31] : memref<64xi32, #tpu.memory_space<smem>>
    %414 = arith.index_cast %413 : i32 to index
    %c0_295 = arith.constant 0 : index
    %c0_296 = arith.constant 0 : index
    %415 = vector.load %arg1[%414, %c0_295, %c0_296] : memref<22x1x256xf32, #tpu.memory_space<vmem>>, vector<1x1x256xf32>
    %416 = vector.shape_cast %415 : vector<1x1x256xf32> to vector<1x256xf32>
    %c7_297 = arith.constant 7 : index
    %c3_298 = arith.constant 3 : index
    %c0_299 = arith.constant 0 : index
    %417 = vector.load %arg12[%c7_297, %c3_298, %c0_299] : memref<8x8x256xf32, #tpu.memory_space<vmem>>, vector<1x1x256xf32>
    %418 = vector.shape_cast %417 : vector<1x1x256xf32> to vector<1x256xf32>
    %419 = vector.shape_cast %416 : vector<1x256xf32> to vector<1x1x256xf32>
    tpu.vector_store %arg12[%c7_297, %c3_298, %c0_299], %419 {strides = array<i32>} : memref<8x8x256xf32, #tpu.memory_space<vmem>>, vector<1x1x256xf32>,
    %c39 = arith.constant 39 : index
    %420 = memref.load %arg0[%c39] : memref<64xi32, #tpu.memory_space<smem>>
    %421 = arith.index_cast %420 : i32 to index
    %c0_300 = arith.constant 0 : index
    %c0_301 = arith.constant 0 : index
    %422 = vector.load %arg1[%421, %c0_300, %c0_301] : memref<22x1x256xf32, #tpu.memory_space<vmem>>, vector<1x1x256xf32>
    %423 = vector.shape_cast %422 : vector<1x1x256xf32> to vector<1x256xf32>
    %c7_302 = arith.constant 7 : index
    %c4_303 = arith.constant 4 : index
    %c0_304 = arith.constant 0 : index
    %424 = vector.load %arg12[%c7_302, %c4_303, %c0_304] : memref<8x8x256xf32, #tpu.memory_space<vmem>>, vector<1x1x256xf32>
    %425 = vector.shape_cast %424 : vector<1x1x256xf32> to vector<1x256xf32>
    %426 = vector.shape_cast %423 : vector<1x256xf32> to vector<1x1x256xf32>
    tpu.vector_store %arg12[%c7_302, %c4_303, %c0_304], %426 {strides = array<i32>} : memref<8x8x256xf32, #tpu.memory_space<vmem>>, vector<1x1x256xf32>,
    %c47 = arith.constant 47 : index
    %427 = memref.load %arg0[%c47] : memref<64xi32, #tpu.memory_space<smem>>
    %428 = arith.index_cast %427 : i32 to index
    %c0_305 = arith.constant 0 : index
    %c0_306 = arith.constant 0 : index
    %429 = vector.load %arg1[%428, %c0_305, %c0_306] : memref<22x1x256xf32, #tpu.memory_space<vmem>>, vector<1x1x256xf32>
    %430 = vector.shape_cast %429 : vector<1x1x256xf32> to vector<1x256xf32>
    %c7_307 = arith.constant 7 : index
    %c5_308 = arith.constant 5 : index
    %c0_309 = arith.constant 0 : index
    %431 = vector.load %arg12[%c7_307, %c5_308, %c0_309] : memref<8x8x256xf32, #tpu.memory_space<vmem>>, vector<1x1x256xf32>
    %432 = vector.shape_cast %431 : vector<1x1x256xf32> to vector<1x256xf32>
    %433 = vector.shape_cast %430 : vector<1x256xf32> to vector<1x1x256xf32>
    tpu.vector_store %arg12[%c7_307, %c5_308, %c0_309], %433 {strides = array<i32>} : memref<8x8x256xf32, #tpu.memory_space<vmem>>, vector<1x1x256xf32>,
    %c55 = arith.constant 55 : index
    %434 = memref.load %arg0[%c55] : memref<64xi32, #tpu.memory_space<smem>>
    %435 = arith.index_cast %434 : i32 to index
    %c0_310 = arith.constant 0 : index
    %c0_311 = arith.constant 0 : index
    %436 = vector.load %arg1[%435, %c0_310, %c0_311] : memref<22x1x256xf32, #tpu.memory_space<vmem>>, vector<1x1x256xf32>
    %437 = vector.shape_cast %436 : vector<1x1x256xf32> to vector<1x256xf32>
    %c7_312 = arith.constant 7 : index
    %c6_313 = arith.constant 6 : index
    %c0_314 = arith.constant 0 : index
    %438 = vector.load %arg12[%c7_312, %c6_313, %c0_314] : memref<8x8x256xf32, #tpu.memory_space<vmem>>, vector<1x1x256xf32>
    %439 = vector.shape_cast %438 : vector<1x1x256xf32> to vector<1x256xf32>
    %440 = vector.shape_cast %437 : vector<1x256xf32> to vector<1x1x256xf32>
    tpu.vector_store %arg12[%c7_312, %c6_313, %c0_314], %440 {strides = array<i32>} : memref<8x8x256xf32, #tpu.memory_space<vmem>>, vector<1x1x256xf32>,
    %c63 = arith.constant 63 : index
    %441 = memref.load %arg0[%c63] : memref<64xi32, #tpu.memory_space<smem>>
    %442 = arith.index_cast %441 : i32 to index
    %c0_315 = arith.constant 0 : index
    %c0_316 = arith.constant 0 : index
    %443 = vector.load %arg1[%442, %c0_315, %c0_316] : memref<22x1x256xf32, #tpu.memory_space<vmem>>, vector<1x1x256xf32>
    %444 = vector.shape_cast %443 : vector<1x1x256xf32> to vector<1x256xf32>
    %c7_317 = arith.constant 7 : index
    %c7_318 = arith.constant 7 : index
    %c0_319 = arith.constant 0 : index
    %445 = vector.load %arg12[%c7_317, %c7_318, %c0_319] : memref<8x8x256xf32, #tpu.memory_space<vmem>>, vector<1x1x256xf32>
    %446 = vector.shape_cast %445 : vector<1x1x256xf32> to vector<1x256xf32>
    %447 = vector.shape_cast %444 : vector<1x256xf32> to vector<1x1x256xf32>
    tpu.vector_store %arg12[%c7_317, %c7_318, %c0_319], %447 {strides = array<i32>} : memref<8x8x256xf32, #tpu.memory_space<vmem>>, vector<1x1x256xf32>,
    %cst = arith.constant 0.000000e+00 : f32
    %448 = vector.broadcast %cst : f32 to vector<8x128xf32>
    %c0_i32 = arith.constant 0 : i32
    %449 = arith.index_cast %c0_i32 : i32 to index
    %c0_320 = arith.constant 0 : index
    %c0_321 = arith.constant 0 : index
    %450 = vector.load %arg12[%449, %c0_320, %c0_321] : memref<8x8x256xf32, #tpu.memory_space<vmem>>, vector<1x8x256xf32>
    %451 = vector.shape_cast %450 : vector<1x8x256xf32> to vector<8x256xf32>
    %452 = arith.truncf %448 : vector<8x128xf32> to vector<8x128xbf16>
    %c0_322 = arith.constant 0 : index
    %c0_323 = arith.constant 0 : index
    %453 = vector.load %arg2[%c0_322, %c0_323] : memref<128x256xbf16, #tpu.memory_space<vmem>>, vector<128x256xbf16>
    %cst_324 = arith.constant dense<0.000000e+00> : vector<8x256xf32>
    %454 = tpu.matmul %452, %453, %cst_324 {dimension_numbers = #tpu.dot_dimension_numbers<[1], [0], [0], [1], [0, 0, 1, 1], [], []>} : vector<8x128xbf16>, vector<128x256xbf16>, vector<8x256xf32> -> vector<8x256xf32>
    %455 = arith.addf %451, %454 : vector<8x256xf32>
    %456 = vector.extract_strided_slice %455 {offsets = [0, 0], sizes = [8, 128], strides = [1, 1]} : vector<8x256xf32> to vector<8x128xf32>
    %457 = math.tanh %456 : vector<8x128xf32>
    %458 = vector.extract_strided_slice %455 {offsets = [0, 128], sizes = [8, 128], strides = [1, 1]} : vector<8x256xf32> to vector<8x128xf32>
    %459 = math.tanh %458 : vector<8x128xf32>
    %cst_325 = arith.constant 5.000000e-01 : f32
    %460 = vector.broadcast %cst_325 : f32 to vector<8x128xf32>
    %461 = arith.mulf %460, %457 : vector<8x128xf32>
    %cst_326 = arith.constant 5.000000e-01 : f32
    %462 = vector.broadcast %cst_326 : f32 to vector<8x128xf32>
    %463 = arith.addf %461, %462 : vector<8x128xf32>
    %cst_327 = arith.constant 5.000000e-01 : f32
    %464 = vector.broadcast %cst_327 : f32 to vector<8x128xf32>
    %465 = arith.mulf %464, %459 : vector<8x128xf32>
    %cst_328 = arith.constant 5.000000e-01 : f32
    %466 = vector.broadcast %cst_328 : f32 to vector<8x128xf32>
    %467 = arith.addf %465, %466 : vector<8x128xf32>
    %c64_i32 = arith.constant 64 : i32
    %468 = tpu.dynamic_rotate %463 by %c64_i32 dim 1 : vector<8x128xf32>, i32 -> vector<8x128xf32>
    %c64_i32_329 = arith.constant 64 : i32
    %469 = tpu.dynamic_rotate %467 by %c64_i32_329 dim 1 : vector<8x128xf32>, i32 -> vector<8x128xf32>
    %470 = arith.mulf %468, %448 : vector<8x128xf32>
    %471 = arith.mulf %463, %459 : vector<8x128xf32>
    %472 = arith.addf %470, %471 : vector<8x128xf32>
    %473 = math.tanh %472 : vector<8x128xf32>
    %474 = arith.mulf %469, %473 : vector<8x128xf32>
    %c1_i32 = arith.constant 1 : i32
    %475 = arith.index_cast %c1_i32 : i32 to index
    %c0_330 = arith.constant 0 : index
    %c0_331 = arith.constant 0 : index
    %476 = vector.load %arg12[%475, %c0_330, %c0_331] : memref<8x8x256xf32, #tpu.memory_space<vmem>>, vector<1x8x256xf32>
    %477 = vector.shape_cast %476 : vector<1x8x256xf32> to vector<8x256xf32>
    %478 = arith.truncf %474 : vector<8x128xf32> to vector<8x128xbf16>
    %c0_332 = arith.constant 0 : index
    %c0_333 = arith.constant 0 : index
    %479 = vector.load %arg2[%c0_332, %c0_333] : memref<128x256xbf16, #tpu.memory_space<vmem>>, vector<128x256xbf16>
    %cst_334 = arith.constant dense<0.000000e+00> : vector<8x256xf32>
    %480 = tpu.matmul %478, %479, %cst_334 {dimension_numbers = #tpu.dot_dimension_numbers<[1], [0], [0], [1], [0, 0, 1, 1], [], []>} : vector<8x128xbf16>, vector<128x256xbf16>, vector<8x256xf32> -> vector<8x256xf32>
    %481 = arith.addf %477, %480 : vector<8x256xf32>
    %482 = vector.extract_strided_slice %481 {offsets = [0, 0], sizes = [8, 128], strides = [1, 1]} : vector<8x256xf32> to vector<8x128xf32>
    %483 = math.tanh %482 : vector<8x128xf32>
    %484 = vector.extract_strided_slice %481 {offsets = [0, 128], sizes = [8, 128], strides = [1, 1]} : vector<8x256xf32> to vector<8x128xf32>
    %485 = math.tanh %484 : vector<8x128xf32>
    %cst_335 = arith.constant 5.000000e-01 : f32
    %486 = vector.broadcast %cst_335 : f32 to vector<8x128xf32>
    %487 = arith.mulf %486, %483 : vector<8x128xf32>
    %cst_336 = arith.constant 5.000000e-01 : f32
    %488 = vector.broadcast %cst_336 : f32 to vector<8x128xf32>
    %489 = arith.addf %487, %488 : vector<8x128xf32>
    %cst_337 = arith.constant 5.000000e-01 : f32
    %490 = vector.broadcast %cst_337 : f32 to vector<8x128xf32>
    %491 = arith.mulf %490, %485 : vector<8x128xf32>
    %cst_338 = arith.constant 5.000000e-01 : f32
    %492 = vector.broadcast %cst_338 : f32 to vector<8x128xf32>
    %493 = arith.addf %491, %492 : vector<8x128xf32>
    %c64_i32_339 = arith.constant 64 : i32
    %494 = tpu.dynamic_rotate %489 by %c64_i32_339 dim 1 : vector<8x128xf32>, i32 -> vector<8x128xf32>
    %c64_i32_340 = arith.constant 64 : i32
    %495 = tpu.dynamic_rotate %493 by %c64_i32_340 dim 1 : vector<8x128xf32>, i32 -> vector<8x128xf32>
    %496 = arith.mulf %494, %472 : vector<8x128xf32>
    %497 = arith.mulf %489, %485 : vector<8x128xf32>
    %498 = arith.addf %496, %497 : vector<8x128xf32>
    %499 = math.tanh %498 : vector<8x128xf32>
    %500 = arith.mulf %495, %499 : vector<8x128xf32>
    %c2_i32 = arith.constant 2 : i32
    %501 = arith.index_cast %c2_i32 : i32 to index
    %c0_341 = arith.constant 0 : index
    %c0_342 = arith.constant 0 : index
    %502 = vector.load %arg12[%501, %c0_341, %c0_342] : memref<8x8x256xf32, #tpu.memory_space<vmem>>, vector<1x8x256xf32>
    %503 = vector.shape_cast %502 : vector<1x8x256xf32> to vector<8x256xf32>
    %504 = arith.truncf %500 : vector<8x128xf32> to vector<8x128xbf16>
    %c0_343 = arith.constant 0 : index
    %c0_344 = arith.constant 0 : index
    %505 = vector.load %arg2[%c0_343, %c0_344] : memref<128x256xbf16, #tpu.memory_space<vmem>>, vector<128x256xbf16>
    %cst_345 = arith.constant dense<0.000000e+00> : vector<8x256xf32>
    %506 = tpu.matmul %504, %505, %cst_345 {dimension_numbers = #tpu.dot_dimension_numbers<[1], [0], [0], [1], [0, 0, 1, 1], [], []>} : vector<8x128xbf16>, vector<128x256xbf16>, vector<8x256xf32> -> vector<8x256xf32>
    %507 = arith.addf %503, %506 : vector<8x256xf32>
    %508 = vector.extract_strided_slice %507 {offsets = [0, 0], sizes = [8, 128], strides = [1, 1]} : vector<8x256xf32> to vector<8x128xf32>
    %509 = math.tanh %508 : vector<8x128xf32>
    %510 = vector.extract_strided_slice %507 {offsets = [0, 128], sizes = [8, 128], strides = [1, 1]} : vector<8x256xf32> to vector<8x128xf32>
    %511 = math.tanh %510 : vector<8x128xf32>
    %cst_346 = arith.constant 5.000000e-01 : f32
    %512 = vector.broadcast %cst_346 : f32 to vector<8x128xf32>
    %513 = arith.mulf %512, %509 : vector<8x128xf32>
    %cst_347 = arith.constant 5.000000e-01 : f32
    %514 = vector.broadcast %cst_347 : f32 to vector<8x128xf32>
    %515 = arith.addf %513, %514 : vector<8x128xf32>
    %cst_348 = arith.constant 5.000000e-01 : f32
    %516 = vector.broadcast %cst_348 : f32 to vector<8x128xf32>
    %517 = arith.mulf %516, %511 : vector<8x128xf32>
    %cst_349 = arith.constant 5.000000e-01 : f32
    %518 = vector.broadcast %cst_349 : f32 to vector<8x128xf32>
    %519 = arith.addf %517, %518 : vector<8x128xf32>
    %c64_i32_350 = arith.constant 64 : i32
    %520 = tpu.dynamic_rotate %515 by %c64_i32_350 dim 1 : vector<8x128xf32>, i32 -> vector<8x128xf32>
    %c64_i32_351 = arith.constant 64 : i32
    %521 = tpu.dynamic_rotate %519 by %c64_i32_351 dim 1 : vector<8x128xf32>, i32 -> vector<8x128xf32>
    %522 = arith.mulf %520, %498 : vector<8x128xf32>
    %523 = arith.mulf %515, %511 : vector<8x128xf32>
    %524 = arith.addf %522, %523 : vector<8x128xf32>
    %525 = math.tanh %524 : vector<8x128xf32>
    %526 = arith.mulf %521, %525 : vector<8x128xf32>
    %c3_i32 = arith.constant 3 : i32
    %527 = arith.index_cast %c3_i32 : i32 to index
    %c0_352 = arith.constant 0 : index
    %c0_353 = arith.constant 0 : index
    %528 = vector.load %arg12[%527, %c0_352, %c0_353] : memref<8x8x256xf32, #tpu.memory_space<vmem>>, vector<1x8x256xf32>
    %529 = vector.shape_cast %528 : vector<1x8x256xf32> to vector<8x256xf32>
    %530 = arith.truncf %526 : vector<8x128xf32> to vector<8x128xbf16>
    %c0_354 = arith.constant 0 : index
    %c0_355 = arith.constant 0 : index
    %531 = vector.load %arg2[%c0_354, %c0_355] : memref<128x256xbf16, #tpu.memory_space<vmem>>, vector<128x256xbf16>
    %cst_356 = arith.constant dense<0.000000e+00> : vector<8x256xf32>
    %532 = tpu.matmul %530, %531, %cst_356 {dimension_numbers = #tpu.dot_dimension_numbers<[1], [0], [0], [1], [0, 0, 1, 1], [], []>} : vector<8x128xbf16>, vector<128x256xbf16>, vector<8x256xf32> -> vector<8x256xf32>
    %533 = arith.addf %529, %532 : vector<8x256xf32>
    %534 = vector.extract_strided_slice %533 {offsets = [0, 0], sizes = [8, 128], strides = [1, 1]} : vector<8x256xf32> to vector<8x128xf32>
    %535 = math.tanh %534 : vector<8x128xf32>
    %536 = vector.extract_strided_slice %533 {offsets = [0, 128], sizes = [8, 128], strides = [1, 1]} : vector<8x256xf32> to vector<8x128xf32>
    %537 = math.tanh %536 : vector<8x128xf32>
    %cst_357 = arith.constant 5.000000e-01 : f32
    %538 = vector.broadcast %cst_357 : f32 to vector<8x128xf32>
    %539 = arith.mulf %538, %535 : vector<8x128xf32>
    %cst_358 = arith.constant 5.000000e-01 : f32
    %540 = vector.broadcast %cst_358 : f32 to vector<8x128xf32>
    %541 = arith.addf %539, %540 : vector<8x128xf32>
    %cst_359 = arith.constant 5.000000e-01 : f32
    %542 = vector.broadcast %cst_359 : f32 to vector<8x128xf32>
    %543 = arith.mulf %542, %537 : vector<8x128xf32>
    %cst_360 = arith.constant 5.000000e-01 : f32
    %544 = vector.broadcast %cst_360 : f32 to vector<8x128xf32>
    %545 = arith.addf %543, %544 : vector<8x128xf32>
    %c64_i32_361 = arith.constant 64 : i32
    %546 = tpu.dynamic_rotate %541 by %c64_i32_361 dim 1 : vector<8x128xf32>, i32 -> vector<8x128xf32>
    %c64_i32_362 = arith.constant 64 : i32
    %547 = tpu.dynamic_rotate %545 by %c64_i32_362 dim 1 : vector<8x128xf32>, i32 -> vector<8x128xf32>
    %548 = arith.mulf %546, %524 : vector<8x128xf32>
    %549 = arith.mulf %541, %537 : vector<8x128xf32>
    %550 = arith.addf %548, %549 : vector<8x128xf32>
    %551 = math.tanh %550 : vector<8x128xf32>
    %552 = arith.mulf %547, %551 : vector<8x128xf32>
    %c4_i32 = arith.constant 4 : i32
    %553 = arith.index_cast %c4_i32 : i32 to index
    %c0_363 = arith.constant 0 : index
    %c0_364 = arith.constant 0 : index
    %554 = vector.load %arg12[%553, %c0_363, %c0_364] : memref<8x8x256xf32, #tpu.memory_space<vmem>>, vector<1x8x256xf32>
    %555 = vector.shape_cast %554 : vector<1x8x256xf32> to vector<8x256xf32>
    %556 = arith.truncf %552 : vector<8x128xf32> to vector<8x128xbf16>
    %c0_365 = arith.constant 0 : index
    %c0_366 = arith.constant 0 : index
    %557 = vector.load %arg2[%c0_365, %c0_366] : memref<128x256xbf16, #tpu.memory_space<vmem>>, vector<128x256xbf16>
    %cst_367 = arith.constant dense<0.000000e+00> : vector<8x256xf32>
    %558 = tpu.matmul %556, %557, %cst_367 {dimension_numbers = #tpu.dot_dimension_numbers<[1], [0], [0], [1], [0, 0, 1, 1], [], []>} : vector<8x128xbf16>, vector<128x256xbf16>, vector<8x256xf32> -> vector<8x256xf32>
    %559 = arith.addf %555, %558 : vector<8x256xf32>
    %560 = vector.extract_strided_slice %559 {offsets = [0, 0], sizes = [8, 128], strides = [1, 1]} : vector<8x256xf32> to vector<8x128xf32>
    %561 = math.tanh %560 : vector<8x128xf32>
    %562 = vector.extract_strided_slice %559 {offsets = [0, 128], sizes = [8, 128], strides = [1, 1]} : vector<8x256xf32> to vector<8x128xf32>
    %563 = math.tanh %562 : vector<8x128xf32>
    %cst_368 = arith.constant 5.000000e-01 : f32
    %564 = vector.broadcast %cst_368 : f32 to vector<8x128xf32>
    %565 = arith.mulf %564, %561 : vector<8x128xf32>
    %cst_369 = arith.constant 5.000000e-01 : f32
    %566 = vector.broadcast %cst_369 : f32 to vector<8x128xf32>
    %567 = arith.addf %565, %566 : vector<8x128xf32>
    %cst_370 = arith.constant 5.000000e-01 : f32
    %568 = vector.broadcast %cst_370 : f32 to vector<8x128xf32>
    %569 = arith.mulf %568, %563 : vector<8x128xf32>
    %cst_371 = arith.constant 5.000000e-01 : f32
    %570 = vector.broadcast %cst_371 : f32 to vector<8x128xf32>
    %571 = arith.addf %569, %570 : vector<8x128xf32>
    %c64_i32_372 = arith.constant 64 : i32
    %572 = tpu.dynamic_rotate %567 by %c64_i32_372 dim 1 : vector<8x128xf32>, i32 -> vector<8x128xf32>
    %c64_i32_373 = arith.constant 64 : i32
    %573 = tpu.dynamic_rotate %571 by %c64_i32_373 dim 1 : vector<8x128xf32>, i32 -> vector<8x128xf32>
    %574 = arith.mulf %572, %550 : vector<8x128xf32>
    %575 = arith.mulf %567, %563 : vector<8x128xf32>
    %576 = arith.addf %574, %575 : vector<8x128xf32>
    %577 = math.tanh %576 : vector<8x128xf32>
    %578 = arith.mulf %573, %577 : vector<8x128xf32>
    %c5_i32 = arith.constant 5 : i32
    %579 = arith.index_cast %c5_i32 : i32 to index
    %c0_374 = arith.constant 0 : index
    %c0_375 = arith.constant 0 : index
    %580 = vector.load %arg12[%579, %c0_374, %c0_375] : memref<8x8x256xf32, #tpu.memory_space<vmem>>, vector<1x8x256xf32>
    %581 = vector.shape_cast %580 : vector<1x8x256xf32> to vector<8x256xf32>
    %582 = arith.truncf %578 : vector<8x128xf32> to vector<8x128xbf16>
    %c0_376 = arith.constant 0 : index
    %c0_377 = arith.constant 0 : index
    %583 = vector.load %arg2[%c0_376, %c0_377] : memref<128x256xbf16, #tpu.memory_space<vmem>>, vector<128x256xbf16>
    %cst_378 = arith.constant dense<0.000000e+00> : vector<8x256xf32>
    %584 = tpu.matmul %582, %583, %cst_378 {dimension_numbers = #tpu.dot_dimension_numbers<[1], [0], [0], [1], [0, 0, 1, 1], [], []>} : vector<8x128xbf16>, vector<128x256xbf16>, vector<8x256xf32> -> vector<8x256xf32>
    %585 = arith.addf %581, %584 : vector<8x256xf32>
    %586 = vector.extract_strided_slice %585 {offsets = [0, 0], sizes = [8, 128], strides = [1, 1]} : vector<8x256xf32> to vector<8x128xf32>
    %587 = math.tanh %586 : vector<8x128xf32>
    %588 = vector.extract_strided_slice %585 {offsets = [0, 128], sizes = [8, 128], strides = [1, 1]} : vector<8x256xf32> to vector<8x128xf32>
    %589 = math.tanh %588 : vector<8x128xf32>
    %cst_379 = arith.constant 5.000000e-01 : f32
    %590 = vector.broadcast %cst_379 : f32 to vector<8x128xf32>
    %591 = arith.mulf %590, %587 : vector<8x128xf32>
    %cst_380 = arith.constant 5.000000e-01 : f32
    %592 = vector.broadcast %cst_380 : f32 to vector<8x128xf32>
    %593 = arith.addf %591, %592 : vector<8x128xf32>
    %cst_381 = arith.constant 5.000000e-01 : f32
    %594 = vector.broadcast %cst_381 : f32 to vector<8x128xf32>
    %595 = arith.mulf %594, %589 : vector<8x128xf32>
    %cst_382 = arith.constant 5.000000e-01 : f32
    %596 = vector.broadcast %cst_382 : f32 to vector<8x128xf32>
    %597 = arith.addf %595, %596 : vector<8x128xf32>
    %c64_i32_383 = arith.constant 64 : i32
    %598 = tpu.dynamic_rotate %593 by %c64_i32_383 dim 1 : vector<8x128xf32>, i32 -> vector<8x128xf32>
    %c64_i32_384 = arith.constant 64 : i32
    %599 = tpu.dynamic_rotate %597 by %c64_i32_384 dim 1 : vector<8x128xf32>, i32 -> vector<8x128xf32>
    %600 = arith.mulf %598, %576 : vector<8x128xf32>
    %601 = arith.mulf %593, %589 : vector<8x128xf32>
    %602 = arith.addf %600, %601 : vector<8x128xf32>
    %603 = math.tanh %602 : vector<8x128xf32>
    %604 = arith.mulf %599, %603 : vector<8x128xf32>
    %c6_i32 = arith.constant 6 : i32
    %605 = arith.index_cast %c6_i32 : i32 to index
    %c0_385 = arith.constant 0 : index
    %c0_386 = arith.constant 0 : index
    %606 = vector.load %arg12[%605, %c0_385, %c0_386] : memref<8x8x256xf32, #tpu.memory_space<vmem>>, vector<1x8x256xf32>
    %607 = vector.shape_cast %606 : vector<1x8x256xf32> to vector<8x256xf32>
    %608 = arith.truncf %604 : vector<8x128xf32> to vector<8x128xbf16>
    %c0_387 = arith.constant 0 : index
    %c0_388 = arith.constant 0 : index
    %609 = vector.load %arg2[%c0_387, %c0_388] : memref<128x256xbf16, #tpu.memory_space<vmem>>, vector<128x256xbf16>
    %cst_389 = arith.constant dense<0.000000e+00> : vector<8x256xf32>
    %610 = tpu.matmul %608, %609, %cst_389 {dimension_numbers = #tpu.dot_dimension_numbers<[1], [0], [0], [1], [0, 0, 1, 1], [], []>} : vector<8x128xbf16>, vector<128x256xbf16>, vector<8x256xf32> -> vector<8x256xf32>
    %611 = arith.addf %607, %610 : vector<8x256xf32>
    %612 = vector.extract_strided_slice %611 {offsets = [0, 0], sizes = [8, 128], strides = [1, 1]} : vector<8x256xf32> to vector<8x128xf32>
    %613 = math.tanh %612 : vector<8x128xf32>
    %614 = vector.extract_strided_slice %611 {offsets = [0, 128], sizes = [8, 128], strides = [1, 1]} : vector<8x256xf32> to vector<8x128xf32>
    %615 = math.tanh %614 : vector<8x128xf32>
    %cst_390 = arith.constant 5.000000e-01 : f32
    %616 = vector.broadcast %cst_390 : f32 to vector<8x128xf32>
    %617 = arith.mulf %616, %613 : vector<8x128xf32>
    %cst_391 = arith.constant 5.000000e-01 : f32
    %618 = vector.broadcast %cst_391 : f32 to vector<8x128xf32>
    %619 = arith.addf %617, %618 : vector<8x128xf32>
    %cst_392 = arith.constant 5.000000e-01 : f32
    %620 = vector.broadcast %cst_392 : f32 to vector<8x128xf32>
    %621 = arith.mulf %620, %615 : vector<8x128xf32>
    %cst_393 = arith.constant 5.000000e-01 : f32
    %622 = vector.broadcast %cst_393 : f32 to vector<8x128xf32>
    %623 = arith.addf %621, %622 : vector<8x128xf32>
    %c64_i32_394 = arith.constant 64 : i32
    %624 = tpu.dynamic_rotate %619 by %c64_i32_394 dim 1 : vector<8x128xf32>, i32 -> vector<8x128xf32>
    %c64_i32_395 = arith.constant 64 : i32
    %625 = tpu.dynamic_rotate %623 by %c64_i32_395 dim 1 : vector<8x128xf32>, i32 -> vector<8x128xf32>
    %626 = arith.mulf %624, %602 : vector<8x128xf32>
    %627 = arith.mulf %619, %615 : vector<8x128xf32>
    %628 = arith.addf %626, %627 : vector<8x128xf32>
    %629 = math.tanh %628 : vector<8x128xf32>
    %630 = arith.mulf %625, %629 : vector<8x128xf32>
    %c7_i32 = arith.constant 7 : i32
    %631 = arith.index_cast %c7_i32 : i32 to index
    %c0_396 = arith.constant 0 : index
    %c0_397 = arith.constant 0 : index
    %632 = vector.load %arg12[%631, %c0_396, %c0_397] : memref<8x8x256xf32, #tpu.memory_space<vmem>>, vector<1x8x256xf32>
    %633 = vector.shape_cast %632 : vector<1x8x256xf32> to vector<8x256xf32>
    %634 = arith.truncf %630 : vector<8x128xf32> to vector<8x128xbf16>
    %c0_398 = arith.constant 0 : index
    %c0_399 = arith.constant 0 : index
    %635 = vector.load %arg2[%c0_398, %c0_399] : memref<128x256xbf16, #tpu.memory_space<vmem>>, vector<128x256xbf16>
    %cst_400 = arith.constant dense<0.000000e+00> : vector<8x256xf32>
    %636 = tpu.matmul %634, %635, %cst_400 {dimension_numbers = #tpu.dot_dimension_numbers<[1], [0], [0], [1], [0, 0, 1, 1], [], []>} : vector<8x128xbf16>, vector<128x256xbf16>, vector<8x256xf32> -> vector<8x256xf32>
    %637 = arith.addf %633, %636 : vector<8x256xf32>
    %638 = vector.extract_strided_slice %637 {offsets = [0, 0], sizes = [8, 128], strides = [1, 1]} : vector<8x256xf32> to vector<8x128xf32>
    %639 = math.tanh %638 : vector<8x128xf32>
    %640 = vector.extract_strided_slice %637 {offsets = [0, 128], sizes = [8, 128], strides = [1, 1]} : vector<8x256xf32> to vector<8x128xf32>
    %641 = math.tanh %640 : vector<8x128xf32>
    %cst_401 = arith.constant 5.000000e-01 : f32
    %642 = vector.broadcast %cst_401 : f32 to vector<8x128xf32>
    %643 = arith.mulf %642, %639 : vector<8x128xf32>
    %cst_402 = arith.constant 5.000000e-01 : f32
    %644 = vector.broadcast %cst_402 : f32 to vector<8x128xf32>
    %645 = arith.addf %643, %644 : vector<8x128xf32>
    %cst_403 = arith.constant 5.000000e-01 : f32
    %646 = vector.broadcast %cst_403 : f32 to vector<8x128xf32>
    %647 = arith.mulf %646, %641 : vector<8x128xf32>
    %cst_404 = arith.constant 5.000000e-01 : f32
    %648 = vector.broadcast %cst_404 : f32 to vector<8x128xf32>
    %649 = arith.addf %647, %648 : vector<8x128xf32>
    %c64_i32_405 = arith.constant 64 : i32
    %650 = tpu.dynamic_rotate %645 by %c64_i32_405 dim 1 : vector<8x128xf32>, i32 -> vector<8x128xf32>
    %c64_i32_406 = arith.constant 64 : i32
    %651 = tpu.dynamic_rotate %649 by %c64_i32_406 dim 1 : vector<8x128xf32>, i32 -> vector<8x128xf32>
    %652 = arith.mulf %650, %628 : vector<8x128xf32>
    %653 = arith.mulf %645, %641 : vector<8x128xf32>
    %654 = arith.addf %652, %653 : vector<8x128xf32>
    %655 = math.tanh %654 : vector<8x128xf32>
    %656 = arith.mulf %651, %655 : vector<8x128xf32>
    %c8_i32 = arith.constant 8 : i32
    %657 = arith.truncf %654 : vector<8x128xf32> to vector<8x128xbf16>
    %c0_407 = arith.constant 0 : index
    %c0_408 = arith.constant 0 : index
    %658 = vector.load %arg3[%c0_407, %c0_408] : memref<128x128xbf16, #tpu.memory_space<vmem>>, vector<128x128xbf16>
    %cst_409 = arith.constant dense<0.000000e+00> : vector<8x128xf32>
    %659 = tpu.matmul %657, %658, %cst_409 {dimension_numbers = #tpu.dot_dimension_numbers<[1], [0], [0], [1], [0, 0, 1, 1], [], []>} : vector<8x128xbf16>, vector<128x128xbf16>, vector<8x128xf32> -> vector<8x128xf32>
    %c0_410 = arith.constant 0 : index
    %c0_411 = arith.constant 0 : index
    %660 = vector.load %arg4[%c0_410, %c0_411] : memref<1x128xf32, #tpu.memory_space<vmem>>, vector<1x128xf32>
    %661 = vector.broadcast %660 : vector<1x128xf32> to vector<8x128xf32>
    %662 = arith.addf %659, %661 : vector<8x128xf32>
    %cst_412 = arith.constant 0.000000e+00 : f32
    %663 = vector.broadcast %cst_412 : f32 to vector<8x128xf32>
    %664 = arith.maximumf %662, %663 : vector<8x128xf32>
    %665 = arith.truncf %664 : vector<8x128xf32> to vector<8x128xbf16>
    %c0_413 = arith.constant 0 : index
    %c0_414 = arith.constant 0 : index
    %666 = vector.load %arg5[%c0_413, %c0_414] : memref<128x128xbf16, #tpu.memory_space<vmem>>, vector<128x128xbf16>
    %cst_415 = arith.constant dense<0.000000e+00> : vector<8x128xf32>
    %667 = tpu.matmul %665, %666, %cst_415 {dimension_numbers = #tpu.dot_dimension_numbers<[1], [0], [0], [1], [0, 0, 1, 1], [], []>} : vector<8x128xbf16>, vector<128x128xbf16>, vector<8x128xf32> -> vector<8x128xf32>
    %c0_416 = arith.constant 0 : index
    %c0_417 = arith.constant 0 : index
    %668 = vector.load %arg6[%c0_416, %c0_417] : memref<1x128xf32, #tpu.memory_space<vmem>>, vector<1x128xf32>
    %669 = vector.broadcast %668 : vector<1x128xf32> to vector<8x128xf32>
    %670 = arith.addf %667, %669 : vector<8x128xf32>
    %cst_418 = arith.constant 0.000000e+00 : f32
    %671 = vector.broadcast %cst_418 : f32 to vector<8x128xf32>
    %672 = arith.maximumf %670, %671 : vector<8x128xf32>
    %673 = arith.truncf %672 : vector<8x128xf32> to vector<8x128xbf16>
    %c0_419 = arith.constant 0 : index
    %c0_420 = arith.constant 0 : index
    %674 = vector.load %arg7[%c0_419, %c0_420] : memref<128x128xbf16, #tpu.memory_space<vmem>>, vector<128x128xbf16>
    %cst_421 = arith.constant dense<0.000000e+00> : vector<8x128xf32>
    %675 = tpu.matmul %673, %674, %cst_421 {dimension_numbers = #tpu.dot_dimension_numbers<[1], [0], [0], [1], [0, 0, 1, 1], [], []>} : vector<8x128xbf16>, vector<128x128xbf16>, vector<8x128xf32> -> vector<8x128xf32>
    %c0_422 = arith.constant 0 : index
    %c0_423 = arith.constant 0 : index
    %676 = vector.load %arg8[%c0_422, %c0_423] : memref<1x128xf32, #tpu.memory_space<vmem>>, vector<1x128xf32>
    %677 = vector.broadcast %676 : vector<1x128xf32> to vector<8x128xf32>
    %678 = arith.addf %675, %677 : vector<8x128xf32>
    %679 = arith.addf %678, %664 : vector<8x128xf32>
    %680 = arith.truncf %679 : vector<8x128xf32> to vector<8x128xbf16>
    %c0_424 = arith.constant 0 : index
    %c0_425 = arith.constant 0 : index
    %681 = vector.load %arg9[%c0_424, %c0_425] : memref<128x4xbf16, #tpu.memory_space<vmem>>, vector<128x4xbf16>
    %cst_426 = arith.constant dense<0.000000e+00> : vector<8x4xf32>
    %682 = tpu.matmul %680, %681, %cst_426 {dimension_numbers = #tpu.dot_dimension_numbers<[1], [0], [0], [1], [0, 0, 1, 1], [], []>} : vector<8x128xbf16>, vector<128x4xbf16>, vector<8x4xf32> -> vector<8x4xf32>
    %c0_427 = arith.constant 0 : index
    %c0_428 = arith.constant 0 : index
    %683 = vector.load %arg10[%c0_427, %c0_428] : memref<1x4xf32, #tpu.memory_space<vmem>>, vector<1x4xf32>
    %684 = vector.broadcast %683 : vector<1x4xf32> to vector<8x4xf32>
    %685 = arith.addf %682, %684 : vector<8x4xf32>
    %c0_429 = arith.constant 0 : index
    %c0_430 = arith.constant 0 : index
    %686 = vector.load %arg11[%c0_429, %c0_430] : memref<8x4xf32, #tpu.memory_space<vmem>>, vector<8x4xf32>
    tpu.vector_store %arg11[%c0_429, %c0_430], %685 {strides = array<i32>} : memref<8x4xf32, #tpu.memory_space<vmem>>, vector<8x4xf32>,
    return
  }
}

</mosaic_0001>

<bundles_post_ra>
// kernel: forward.1
= control target key start
LH: loop header
LB: loop body
LE: loop exit
PB: predicated region body
PF: predicated region fallthrough
CT: control target
= control target key end

     0   :  { %16 = vsyncpa [#allocation5], 0  ;;  %s3053_s0 = inlined_call_operand.vmem [shape: s32[64], index: 0, kind: input, shape index: {}]   ;;  %s3054_s1 = inlined_call_operand.vmem [shape: f32[22,1,256], index: 1, kind: input, shape index: {}]   ;;  %s3055_s2 = inlined_call_operand.hbm [shape: bf16[128,256], index: 2, kind: input, shape index: {}]   ;;  %s3056_s3 = inlined_call_operand.vmem [shape: bf16[128,128], index: 3, kind: input, shape index: {}]   ;;  %s3057_s4 = inlined_call_operand.vmem [shape: f32[1,128], index: 4, kind: input, shape index: {}]   ;;  %s3058_s5 = inlined_call_operand.hbm [shape: bf16[128,128], index: 5, kind: input, shape index: {}]   ;;  %s3059_s6 = inlined_call_operand.vmem [shape: f32[1,128], index: 6, kind: input, shape index: {}]   ;;  %s3060_s7 = inlined_call_operand.hbm [shape: bf16[128,128], index: 7, kind: input, shape index: {}]   ;;  %s3061_s8 = inlined_call_operand.vmem [shape: f32[1,128], index: 8, kind: input, shape index: {}]   ;;  %s3062_s9 = inlined_call_operand.vmem [shape: bf16[128,4], index: 9, kind: input, shape index: {}]   ;;  %s3063_s10 = inlined_call_operand.vmem [shape: f32[1,4], index: 10, kind: input, shape index: {}]   ;;  %s3064_s11 = inlined_call_operand.vmem [shape: f32[8,4], index: 11, kind: output, shape index: {}]  }
   0x1   :  { %17 = vsyncpa [#allocation4], 0 }
   0x2   :  { %18 = vsyncpa [#allocation8], 0  ;;  %s2262_s17 = smov [#allocation7]   ;;  %s25_s21 = sshll.u32 %s3053_s0, 4  ;;  %s26_s21 = int_to_ptr.vmem [resolvable:$true] %s25_s21 }
   0x3   :  { %s52_s18 = sshll.u32 %s2262_s17, 4  ;;  %s2178_s24 = scalar_lea.hbm %s3058_s5, 1024  ;;  %s53_s18 = int_to_ptr.vmem [resolvable:$true] %s52_s18 }
   0x4   :  { %p2179_p0 = scmp.ne.s32.totalorder %s3058_s5, %s2178_s24  ;;  %p2182_p1 = scmp.lt.u32.totalorder %s2178_s24, %s3058_s5 }
   0x6   :  { %p2184_p2 = pnand %p2182_p1, %p2179_p0 }
   0x8   :  { %2187 = shalt.err (!%p2184_p2)
}
   0x9   :  { %s2188_s29 = scalar_lea.vmem %s53_s18, 1024  ;;  %p2193_p4 = scmp.lt.s32.totalorder %s53_s18, %s53_s18 }
   0xa   :  { %p2189_p3 = scmp.ne.s32.totalorder %s53_s18, %s2188_s29  ;;  %p2194_p5 = scmp.lt.s32.totalorder %s2188_s29, %s2188_s29 }
   0xc   :  { %p2195_p6 = por %p2194_p5, %p2193_p4 }
   0xe   :  { %p2196_p7 = pnand %p2195_p6, %p2189_p3 }
  0x10   :  { %2199 = shalt.err (!%p2196_p7)
}
  0x11   :  { %s2263_s0 = smov 64   ;;  %s2264_s30 = smov 4  }
  0x12   :  { %58 = dma.hbm_to_vmem [thread:$0]  %s3058_s5, 1024, %s53_s18, [#allocation8], %s2263_s0, %s2263_s0, %s2264_s30  }
  0x13   :  { %s2200_s14 = scalar_lea.vmem %s26_s21, 16  ;;  %p2205_p9 = scmp.lt.s32.totalorder %s26_s21, %s26_s21 }
  0x14   :  { %p2201_p8 = scmp.ne.s32.totalorder %s26_s21, %s2200_s14  ;;  %p2206_p10 = scmp.lt.s32.totalorder %s2200_s14, %s2200_s14 }
  0x16   :  { %p2207_p11 = por %p2206_p10, %p2205_p9 }
  0x18   :  { %p2208_p12 = pnand %p2207_p11, %p2201_p8 }
  0x1a   :  { %2211 = shalt.err (!%p2208_p12)
}
  0x1b   :  { %s2265_s15 = smov [#allocation3]   ;;  %s2266_s16 = smov [#allocation6]  }
  0x1c   :  { %28 = dma.vmem_to_smem %s26_s21, 16, %s2265_s15, [#allocation5]  }
  0x1d   :  { %s36_s17 = sshll.u32 %s2266_s16, 4  ;;  %s2212_s22 = scalar_lea.hbm %s3055_s2, 2048  ;;  %s37_s17 = int_to_ptr.vmem [resolvable:$true] %s36_s17 }
  0x1e   :  { %p2213_p13 = scmp.ne.s32.totalorder %s3055_s2, %s2212_s22  ;;  %p2216_p0 = scmp.lt.u32.totalorder %s2212_s22, %s3055_s2 }
  0x20   :  { %p2218_p1 = pnand %p2216_p0, %p2213_p13 }
  0x22   :  { %2221 = shalt.err (!%p2218_p1)
}
  0x23   :  { %s2222_s25 = scalar_lea.vmem %s37_s17, 2048  ;;  %p2227_p3 = scmp.lt.s32.totalorder %s37_s17, %s37_s17 }
  0x24   :  { %p2223_p2 = scmp.ne.s32.totalorder %s37_s17, %s2222_s25  ;;  %p2228_p4 = scmp.lt.s32.totalorder %s2222_s25, %s2222_s25 }
  0x26   :  { %p2229_p5 = por %p2228_p4, %p2227_p3 }
  0x28   :  { %p2230_p6 = pnand %p2229_p5, %p2223_p2 }
  0x2a   :  { %2233 = shalt.err (!%p2230_p6)
}
  0x2b   :  { %s2267_s21 = smov 128   ;;  %s2268_s26 = smov 8  }
  0x2c   :  { %42 = dma.hbm_to_vmem [thread:$0]  %s3055_s2, 2048, %s37_s17, [#allocation4], %s2267_s21, %s2267_s21, %s2268_s26  }
  0x2d   :  { %s2269_s29 = smov [#allocation9]   ;;  %s2234_s15 = scalar_lea.hbm %s3060_s7, 1024 }
  0x2e   :  { %s66_s12 = sshll.u32 %s2269_s29, 4  ;;  %p2235_p7 = scmp.ne.s32.totalorder %s3060_s7, %s2234_s15  ;;  %s67_s12 = int_to_ptr.vmem [resolvable:$true] %s66_s12 }
  0x2f   :  { %p2238_p8 = scmp.lt.u32.totalorder %s2234_s15, %s3060_s7 }
  0x31   :  { %p2240_p9 = pnand %p2238_p8, %p2235_p7 }
  0x33   :  { %2243 = shalt.err (!%p2240_p9)
}
  0x34   :  { %s2244_s23 = scalar_lea.vmem %s67_s12, 1024  ;;  %p2249_p11 = scmp.lt.s32.totalorder %s67_s12, %s67_s12 }
  0x35   :  { %p2245_p10 = scmp.ne.s32.totalorder %s67_s12, %s2244_s23  ;;  %p2250_p12 = scmp.lt.s32.totalorder %s2244_s23, %s2244_s23 }
  0x37   :  { %p2251_p13 = por %p2250_p12, %p2249_p11 }
  0x39   :  { %p2252_p0 = pnand %p2251_p13, %p2245_p10 }
  0x3b   :  { %2255 = shalt.err (!%p2252_p0)
}
  0x3c   :  { %72 = dma.hbm_to_vmem [thread:$0]  %s3060_s7, 1024, %s67_s12, [#allocation8], %s2263_s0, %s2263_s0, %s2264_s30  }
  0x3d   :  { %2256 = dma.done.wait [#allocation5], 16  }
  0x3e   :  { %2257 = vsyncadd [#allocation5], 4294967280 }
  0x3f   :  { %2258 = dma.done.wait [#allocation4], 2048  }
  0x40   :  { %2259 = vsyncadd [#allocation4], 4294965248 }
  0x41   :  { %2260 = dma.done.wait [#allocation8], 2048  }
  0x42   :  { %2261 = vsyncadd [#allocation8], 4294965248 }
  0x43   :  { %91 = sfence }
  0x44   :  { %v2378_v0 = vld [vmem:[#allocation6 + $0x4] ss:$8 sps:$4 sm:$0xff]   ;;  %v2380_v1 = vld [vmem:[#allocation6] ss:$8 sps:$4 sm:$0xff]   ;;  %v2270_v2 = vmov 0   ;;  %s93_s24 = sld [smem:[#allocation3]]  ;;  %v97_v5 = vlaneseq }
  0x45   :  { %674 = vmatprep.mubr.bf16.mxu0 %v2270_v2  ;;  %735 = vmatprep.mubr.bf16.mxu1 %v2270_v2  ;;  %v2385_v3 = vld [vmem:[#allocation6 + $0x14] ss:$8 sps:$4 sm:$0xff]   ;;  %v2389_v4 = vld [vmem:[#allocation6 + $0x10] ss:$8 sps:$4 sm:$0xff]   ;;  %v2393_v6 = vld [vmem:[#allocation6 + $0x24] ss:$8 sps:$4 sm:$0xff]  }
  0x46   :  { %642 = vmatprep.subr.bf16.mxu0 %v2378_v0  ;;  %703 = vmatprep.subr.bf16.mxu1 %v2378_v0  ;;  %s1759_s7 = sld [smem:[#allocation3 + $0x8]]  ;;  %v2397_v7 = vld [vmem:[#allocation6 + $0x20] ss:$8 sps:$4 sm:$0xff]   ;;  %vm2399_vm0 = vcmp.lt.s32.totalorder %v97_v5, 256  ;;  %v2405_v9 = vld [vmem:[#allocation6 + $0x34] ss:$8 sps:$4 sm:$0xff]  }
  0x47   :  { %643 = vmatpush1.bf16.msra.mxu0 %v2380_v1  ;;  %704 = vmatpush1.bf16.msra.mxu1 %v2380_v1  ;;  %s1761_s30 = sld [smem:[#allocation3 + $0x10]]  ;;  %v2413_v10 = vld [vmem:[#allocation6 + $0x30] ss:$8 sps:$4 sm:$0xff]   ;;  %v2415_v11 = vld [vmem:[#allocation6 + $0x44] ss:$8 sps:$4 sm:$0xff]   ;;  %s1777_s2 = sld [smem:[#allocation3 + $0x11]] }
  0x48   :  { %644 = vmatprep.subr.bf16.mxu0 %v2385_v3  ;;  %705 = vmatprep.subr.bf16.mxu1 %v2385_v3  ;;  %s1763_s26 = sld [smem:[#allocation3 + $0x18]]  ;;  %v2429_v13 = vld [vmem:[#allocation6 + $0x40] ss:$8 sps:$4 sm:$0xff]   ;;  %v2431_v16 = vld [vmem:[#allocation6 + $0x54] ss:$8 sps:$4 sm:$0xff]   ;;  %s1779_s17 = sld [smem:[#allocation3 + $0x19]] }
  0x49   :  { %s2411_s27 = sld [smem:[#allocation3 + $0x20]]  ;;  %v2448_v18 = vld [vmem:[#allocation6 + $0x50] ss:$8 sps:$4 sm:$0xff]   ;;  %v2452_v20 = vld [vmem:[#allocation6 + $0x64] ss:$8 sps:$4 sm:$0xff]   ;;  %vm2272_vm1 = vmmov 0  }
  0x4a   :  { %s1758_s5 = sshll.u32 %s93_s24, 1  ;;  %s1767_s20 = sld [smem:[#allocation3 + $0x28]]  ;;  %v2463_v21 = vld [vmem:[#allocation6 + $0x60] ss:$8 sps:$4 sm:$0xff]   ;;  %v2468_v23 = vld [vmem:[#allocation6 + $0x74] ss:$8 sps:$4 sm:$0xff]  }
  0x4b   :  { %645 = vmatpush1.bf16.msra.mxu0 %v2389_v4  ;;  %706 = vmatpush1.bf16.msra.mxu1 %v2389_v4  ;;  %s95_s21 = scalar_lea.vmem %s3054_s1, %s1758_s5  ;;  %s1769_s23 = sld [smem:[#allocation3 + $0x30]]  ;;  %v2481_v26 = vld [vmem:[#allocation6 + $0x70] ss:$8 sps:$4 sm:$0xff]   ;;  %vm1572_vm2 = vcmask 31744  }
  0x4c   :  { %646 = vmatprep.subr.bf16.mxu0 %v2393_v6  ;;  %707 = vmatprep.subr.bf16.mxu1 %v2393_v6  ;;  %v96_v12 = vld [vmem:[%s95_s21] sm:$0x3]  ;;  %s1760_s28 = sshll.u32 %s1759_s7, 1  ;;  %s1771_s25 = sld [smem:[#allocation3 + $0x38]]  ;;  %v2089_v8 = vld [vmem:[%s3056_s3 + $0x8] sm:$0xff]  }
  0x4d   :  { %101 = vst.msk [vmem:[#allocation2] ss:$8 sm:$0x3] %vm2399_vm0, %v96_v12  ;;  %s1762_s29 = sshll.u32 %s1761_s30, 1  ;;  %s105_s14 = scalar_lea.vmem %s3054_s1, %s1760_s28 }
  0x4e   :  { %s112_s19 = scalar_lea.vmem %s3054_s1, %s1762_s29  ;;  %v106_v14 = vld [vmem:[%s105_s14] sm:$0x3]  ;;  %s1764_s22 = sshll.u32 %s1763_s26, 1 }
  0x4f   :  { %647 = vmatpush1.bf16.msra.mxu0 %v2397_v7  ;;  %708 = vmatpush1.bf16.msra.mxu1 %v2397_v7  ;;  %v113_v15 = vld [vmem:[%s112_s19] sm:$0x3]  ;;  %108 = vst.msk [vmem:[#allocation2 + $0x1] ss:$8 sm:$0x3] %vm2399_vm0, %v106_v14  ;;  %s119_s24 = scalar_lea.vmem %s3054_s1, %s1764_s22  ;;  %s1766_s7 = sshll.u32 %s2411_s27, 1 }
  0x50   :  { %648 = vmatprep.subr.bf16.mxu0 %v2405_v9  ;;  %709 = vmatprep.subr.bf16.mxu1 %v2405_v9  ;;  %115 = vst.msk [vmem:[#allocation2 + $0x2] ss:$8 sm:$0x3] %vm2399_vm0, %v113_v15  ;;  %v120_v17 = vld [vmem:[%s119_s24] sm:$0x3]  ;;  %s126_s18 = scalar_lea.vmem %s3054_s1, %s1766_s7  ;;  %s1768_s21 = sshll.u32 %s1767_s20, 1 }
  0x51   :  { %122 = vst.msk [vmem:[#allocation2 + $0x3] ss:$8 sm:$0x3] %vm2399_vm0, %v120_v17  ;;  %v127_v19 = vld [vmem:[%s126_s18] sm:$0x3]  ;;  %s133_s28 = scalar_lea.vmem %s3054_s1, %s1768_s21  ;;  %s1770_s29 = sshll.u32 %s1769_s23, 1 }
  0x52   :  { %129 = vst.msk [vmem:[#allocation2 + $0x4] ss:$8 sm:$0x3] %vm2399_vm0, %v127_v19  ;;  %v134_v22 = vld [vmem:[%s133_s28] sm:$0x3]  ;;  %s140_s14 = scalar_lea.vmem %s3054_s1, %s1770_s29  ;;  %s1772_s15 = sshll.u32 %s1771_s25, 1 }
  0x53   :  { %649 = vmatpush1.bf16.msra.mxu0 %v2413_v10  ;;  %710 = vmatpush1.bf16.msra.mxu1 %v2413_v10  ;;  %136 = vst.msk [vmem:[#allocation2 + $0x5] ss:$8 sm:$0x3] %vm2399_vm0, %v134_v22  ;;  %v141_v24 = vld [vmem:[%s140_s14] sm:$0x3]  ;;  %s147_s20 = scalar_lea.vmem %s3054_s1, %s1772_s15  ;;  %s1773_s22 = sld [smem:[#allocation3 + $0x1]] }
  0x54   :  { %650 = vmatprep.subr.bf16.mxu0 %v2415_v11  ;;  %711 = vmatprep.subr.bf16.mxu1 %v2415_v11  ;;  %143 = vst.msk [vmem:[#allocation2 + $0x6] ss:$8 sm:$0x3] %vm2399_vm0, %v141_v24  ;;  %v148_v25 = vld [vmem:[%s147_s20] sm:$0x3]  ;;  %s1775_s23 = sld [smem:[#allocation3 + $0x9]] }
  0x55   :  { %150 = vst.msk [vmem:[#allocation2 + $0x7] ss:$8 sm:$0x3] %vm2399_vm0, %v148_v25  ;;  %s1781_s24 = sld [smem:[#allocation3 + $0x21]]  ;;  %s1778_s13 = sshll.u32 %s1777_s2, 1 }
  0x56   :  { %s1783_s7 = sld [smem:[#allocation3 + $0x29]]  ;;  %s1780_s14 = sshll.u32 %s1779_s17, 1 }
  0x57   :  { %651 = vmatpush1.bf16.msra.mxu0 %v2429_v13  ;;  %712 = vmatpush1.bf16.msra.mxu1 %v2429_v13  ;;  %s2513_s30 = sld [smem:[#allocation3 + $0x31]]  ;;  %s168_s19 = scalar_lea.vmem %s3054_s1, %s1778_s13 }
  0x58   :  { %652 = vmatprep.subr.bf16.mxu0 %v2431_v16  ;;  %713 = vmatprep.subr.bf16.mxu1 %v2431_v16  ;;  %s2515_s5 = sld [smem:[#allocation3 + $0x39]]  ;;  %v169_v44 = vld [vmem:[%s168_s19] sm:$0x3]  ;;  %s1793_s19 = sld [smem:[#allocation3 + $0x12]] }
  0x59   :  { %s1774_s18 = sshll.u32 %s1773_s22, 1  ;;  %171 = vst.msk [vmem:[#allocation2 + $0x12] ss:$8 sm:$0x3] %vm2399_vm0, %v169_v44  ;;  %s1795_s20 = sld [smem:[#allocation3 + $0x1a]] }
  0x5a   :  { %s1776_s25 = sshll.u32 %s1775_s23, 1  ;;  %s154_s27 = scalar_lea.vmem %s3054_s1, %s1774_s18 }
  0x5b   :  { %653 = vmatpush1.bf16.msra.mxu0 %v2448_v18  ;;  %714 = vmatpush1.bf16.msra.mxu1 %v2448_v18  ;;  %s161_s12 = scalar_lea.vmem %s3054_s1, %s1776_s25  ;;  %v155_v42 = vld [vmem:[%s154_s27] sm:$0x3]  ;;  %s175_s23 = scalar_lea.vmem %s3054_s1, %s1780_s14 }
  0x5c   :  { %654 = vmatprep.subr.bf16.mxu0 %v2452_v20  ;;  %715 = vmatprep.subr.bf16.mxu1 %v2452_v20  ;;  %v544_v27 = vld [vmem:[#allocation2] sm:$0xff]  ;;  %v545_v28 = vld [vmem:[#allocation2 + $0x8] sm:$0xff]  ;;  %157 = vst.msk [vmem:[#allocation2 + $0x10] ss:$8 sm:$0x3] %vm2399_vm0, %v155_v42  ;;  %s1782_s2 = sshll.u32 %s1781_s24, 1 }
  0x5d   :  { %v162_v43 = vld [vmem:[%s161_s12] sm:$0x3]  ;;  %s1784_s18 = sshll.u32 %s1783_s7, 1  ;;  %s182_s21 = scalar_lea.vmem %s3054_s1, %s1782_s2 }
  0x5e   :  { %164 = vst.msk [vmem:[#allocation2 + $0x11] ss:$8 sm:$0x3] %vm2399_vm0, %v162_v43  ;;  %v176_v45 = vld [vmem:[%s175_s23] sm:$0x3]  ;;  %s189_s28 = scalar_lea.vmem %s3054_s1, %s1784_s18  ;;  %s1786_s29 = sshll.u32 %s2513_s30, 1 }
  0x5f   :  { %655 = vmatpush1.bf16.msra.mxu0 %v2463_v21  ;;  %716 = vmatpush1.bf16.msra.mxu1 %v2463_v21  ;;  %178 = vst.msk [vmem:[#allocation2 + $0x13] ss:$8 sm:$0x3] %vm2399_vm0, %v176_v45  ;;  %v183_v46 = vld [vmem:[%s182_s21] sm:$0x3]  ;;  %s1788_s12 = sshll.u32 %s2515_s5, 1  ;;  %s196_s13 = scalar_lea.vmem %s3054_s1, %s1786_s29 }
  0x60   :  { %656 = vmatprep.subr.bf16.mxu0 %v2468_v23  ;;  %717 = vmatprep.subr.bf16.mxu1 %v2468_v23  ;;  %v190_v47 = vld [vmem:[%s189_s28] sm:$0x3]  ;;  %185 = vst.msk [vmem:[#allocation2 + $0x14] ss:$8 sm:$0x3] %vm2399_vm0, %v183_v46  ;;  %s203_s16 = scalar_lea.vmem %s3054_s1, %s1788_s12  ;;  %s1789_s30 = sld [smem:[#allocation3 + $0x2]] }
  0x61   :  { %192 = vst.msk [vmem:[#allocation2 + $0x15] ss:$8 sm:$0x3] %vm2399_vm0, %v190_v47  ;;  %v197_v48 = vld [vmem:[%s196_s13] sm:$0x3]  ;;  %s1791_s5 = sld [smem:[#allocation3 + $0xa]] }
  0x62   :  { %v204_v49 = vld [vmem:[%s203_s16] sm:$0x3]  ;;  %199 = vst.msk [vmem:[#allocation2 + $0x16] ss:$8 sm:$0x3] %vm2399_vm0, %v197_v48  ;;  %s1797_s22 = sld [smem:[#allocation3 + $0x22]] }
  0x63   :  { %657 = vmatpush1.bf16.msra.mxu0 %v2481_v26  ;;  %718 = vmatpush1.bf16.msra.mxu1 %v2481_v26  ;;  %206 = vst.msk [vmem:[#allocation2 + $0x17] ss:$8 sm:$0x3] %vm2399_vm0, %v204_v49  ;;  %s1799_s23 = sld [smem:[#allocation3 + $0x2a]]  ;;  %s1794_s24 = sshll.u32 %s1793_s19, 1 }
  0x64   :  { %764 = vmatprep.subr.bf16.mxu0 %v2378_v0  ;;  %825 = vmatprep.subr.bf16.mxu1 %v2378_v0  ;;  %s2581_s2 = sld [smem:[#allocation3 + $0x32]]  ;;  %s1796_s7 = sshll.u32 %s1795_s20, 1 }
  0x65   :  { %s2583_s18 = sld [smem:[#allocation3 + $0x3a]]  ;;  %s224_s15 = scalar_lea.vmem %s3054_s1, %s1794_s24 }
  0x66   :  { %675 = vmatmul.mubr.bf16.vlgmr.msra.gmra.mrb[0].mxu0 %v2270_v2  ;;  %s1790_s17 = sshll.u32 %s1789_s30, 1  ;;  %s1811_s16 = sld [smem:[#allocation3 + $0x1b]] }
  0x67   :  { %765 = vmatpush1.bf16.msra.mxu0 %v2380_v1  ;;  %796 = vmatprep.mubr.bf16.mxu0 %v2270_v2  ;;  %s1792_s25 = sshll.u32 %s1791_s5, 1  ;;  %s210_s27 = scalar_lea.vmem %s3054_s1, %s1790_s17 }
  0x68   :  { %766 = vmatprep.subr.bf16.mxu0 %v2385_v3  ;;  %s217_s12 = scalar_lea.vmem %s3054_s1, %s1792_s25  ;;  %v211_v25 = vld [vmem:[%s210_s27] sm:$0x3]  ;;  %s231_s5 = scalar_lea.vmem %s3054_s1, %s1796_s7 }
  0x69   :  { %213 = vst.msk [vmem:[#allocation2 + $0x20] ss:$8 sm:$0x3] %vm2399_vm0, %v211_v25  ;;  %s1798_s19 = sshll.u32 %s1797_s22, 1  ;;  %s1800_s17 = sshll.u32 %s1799_s23, 1 }
  0x6a   :  { %v700_v57 = vld [vmem:[#allocation2 + $0x10] sm:$0xff]  ;;  %v701_v58 = vld [vmem:[#allocation2 + $0x18] sm:$0xff]  ;;  %s238_s21 = scalar_lea.vmem %s3054_s1, %s1798_s19  ;;  %s245_s28 = scalar_lea.vmem %s3054_s1, %s1800_s17 }
  0x6b   :  { %767 = vmatpush1.bf16.msra.mxu0 %v2389_v4  ;;  %s1802_s29 = sshll.u32 %s2581_s2, 1  ;;  %s1805_s2 = sld [smem:[#allocation3 + $0x3]] }
  0x6c   :  { %768 = vmatprep.subr.bf16.mxu0 %v2393_v6  ;;  %s252_s24 = scalar_lea.vmem %s3054_s1, %s1802_s29  ;;  %s1813_s30 = sld [smem:[#allocation3 + $0x23]] }
  0x6d   :  { %s2650_s19 = sld [smem:[#allocation3 + $0x33]]  ;;  %s1812_s23 = sshll.u32 %s1811_s16, 1 }
  0x6e   :  { %s2652_s17 = sld [smem:[#allocation3 + $0x3b]] }
  0x6f   :  { %769 = vmatpush1.bf16.msra.mxu0 %v2397_v7 }
  0x70   :  { %770 = vmatprep.subr.bf16.mxu0 %v2405_v9 }
  0x71   :  { %s1806_s20 = sshll.u32 %s1805_s2, 1  ;;  %s1829_s2 = sld [smem:[#allocation3 + $0x24]] }
  0x72   :  { %s266_s27 = scalar_lea.vmem %s3054_s1, %s1806_s20 }
  0x73   :  { %771 = vmatpush1.bf16.msra.mxu0 %v2413_v10  ;;  %s1818_s29 = sshll.u32 %s2650_s19, 1  ;;  %s1821_s19 = sld [smem:[#allocation3 + $0x4]] }
  0x74   :  { %772 = vmatprep.subr.bf16.mxu0 %v2415_v11 }
  0x77   :  { %773 = vmatpush1.bf16.msra.mxu0 %v2429_v13 }
  0x78   :  { %774 = vmatprep.subr.bf16.mxu0 %v2431_v16 }
  0x79   :  { %s1822_s16 = sshll.u32 %s1821_s19, 1  ;;  %s1845_s19 = sld [smem:[#allocation3 + $0x25]] }
  0x7b   :  { %775 = vmatpush1.bf16.msra.mxu0 %v2448_v18 }
  0x7c   :  { %776 = vmatprep.subr.bf16.mxu0 %v2452_v20 }
  0x7f   :  { %777 = vmatpush1.bf16.msra.mxu0 %v2463_v21 }
  0x80   :  { %778 = vmatprep.subr.bf16.mxu0 %v2468_v23 }
  0x83   :  { %779 = vmatpush1.bf16.msra.mxu0 %v2481_v26 }
  0x84   :  { %886 = vmatprep.subr.bf16.mxu0 %v2378_v0 }
 0x139   :  { %v676_v29 = vpop.f32.mrb[0].mxu0 }
 0x13a   :  { %v683_v30 = vadd.f32 %v676_v29, %v544_v27  ;;  %v678_v31 = vpop.f32.mrb[1].mxu0  ;;  %v218_v27 = vld [vmem:[%s217_s12] sm:$0x3]  ;;  %s1804_s12 = sshll.u32 %s2583_s18, 1  ;;  %s1807_s18 = sld [smem:[#allocation3 + $0xb]] }
 0x13b   :  { %v684_v32 = vadd.f32 %v678_v31, %v545_v28  ;;  %v680_v33 = vpop.f32.mrb[2].mxu0  ;;  %220 = vst.msk [vmem:[#allocation2 + $0x21] ss:$8 sm:$0x3] %vm2399_vm0, %v218_v27  ;;  %v225_v28 = vld [vmem:[%s224_s15] sm:$0x3]  ;;  %s259_s14 = scalar_lea.vmem %s3054_s1, %s1804_s12 }
 0x13c   :  { %2120 = vtanh.f32 %v683_v30  ;;  %v681_v34 = vpop.f32.mrb[3].mxu0  ;;  %v232_v29 = vld [vmem:[%s231_s5] sm:$0x3]  ;;  %227 = vst.msk [vmem:[#allocation2 + $0x22] ss:$8 sm:$0x3] %vm2399_vm0, %v225_v28 }
 0x13d   :  { %2122 = vtanh.f32 %v684_v32  ;;  %234 = vst.msk [vmem:[#allocation2 + $0x23] ss:$8 sm:$0x3] %vm2399_vm0, %v232_v29  ;;  %v239_v30 = vld [vmem:[%s238_s21] sm:$0x3]  ;;  %s1809_s15 = sld [smem:[#allocation3 + $0x13]] }
 0x13e   :  { %v246_v31 = vld [vmem:[%s245_s28] sm:$0x3]  ;;  %241 = vst.msk [vmem:[#allocation2 + $0x24] ss:$8 sm:$0x3] %vm2399_vm0, %v239_v30  ;;  %s1815_s5 = sld [smem:[#allocation3 + $0x2b]] }
 0x13f   :  { %248 = vst.msk [vmem:[#allocation2 + $0x25] ss:$8 sm:$0x3] %vm2399_vm0, %v246_v31  ;;  %v253_v32 = vld [vmem:[%s252_s24] sm:$0x3] }
 0x140   :  { %v260_v33 = vld [vmem:[%s259_s14] sm:$0x3]  ;;  %255 = vst.msk [vmem:[#allocation2 + $0x26] ss:$8 sm:$0x3] %vm2399_vm0, %v253_v32  ;;  %s1808_s25 = sshll.u32 %s1807_s18, 1  ;;  %s287_s18 = scalar_lea.vmem %s3054_s1, %s1812_s23 }
 0x141   :  { %262 = vst.msk [vmem:[#allocation2 + $0x27] ss:$8 sm:$0x3] %vm2399_vm0, %v260_v33  ;;  %s273_s12 = scalar_lea.vmem %s3054_s1, %s1808_s25  ;;  %s1827_s14 = sld [smem:[#allocation3 + $0x1c]] }
 0x143   :  { %s1810_s22 = sshll.u32 %s1809_s15, 1  ;;  %s1814_s15 = sshll.u32 %s1813_s30, 1 }
 0x144   :  { %s280_s13 = scalar_lea.vmem %s3054_s1, %s1810_s22  ;;  %s1816_s20 = sshll.u32 %s1815_s5, 1 }
 0x145   :  { %s294_s21 = scalar_lea.vmem %s3054_s1, %s1814_s15  ;;  %s301_s28 = scalar_lea.vmem %s3054_s1, %s1816_s20 }
 0x146   :  { %v2121_v35 = vpop.eup %2120  ;;  %s308_s22 = scalar_lea.vmem %s3054_s1, %s1818_s29  ;;  %s2719_s15 = sld [smem:[#allocation3 + $0x34]] }
 0x147   :  { %v2123_v36 = vpop.eup %2122  ;;  %v687_v37 = vmul.f32 0.5, %v2121_v35  ;;  %s2721_s20 = sld [smem:[#allocation3 + $0x3c]]  ;;  %s1828_s5 = sshll.u32 %s1827_s14, 1 }
 0x148   :  { %v689_v39 = vmul.f32 0.5, %v2123_v36  ;;  %v762_v42 = vld [vmem:[#allocation2 + $0x28] sm:$0xff] }
 0x149   :  { %v688_v38 = vadd.f32 0.5, %v687_v37 }
 0x14a   :  { %v690_v41 = vadd.f32 0.5, %v689_v39 }
 0x14b   :  { %691 = vrot.lane.b32.xlu0 %v688_v38, %s2263_s0  ;;  %v696_v40 = vmul.f32 %v2123_v36, %v688_v38 }
 0x14c   :  { %s1834_s29 = sshll.u32 %s2719_s15, 1  ;;  %s1837_s15 = sld [smem:[#allocation3 + $0x5]] }
 0x14f   :  { %693 = vrot.lane.b32.xlu0 %v690_v41, %s2263_s0  ;;  %v761_v41 = vld [vmem:[#allocation2 + $0x20] sm:$0xff] }
 0x152   :  { %s1838_s14 = sshll.u32 %s1837_s15, 1  ;;  %s1861_s15 = sld [smem:[#allocation3 + $0x26]] }
 0x1bd   :  { %v692_v50 = vpop.permute.xlu0 %691 }
 0x1be   :  { %v695_v51 = vmul.f32 0.0, %v692_v50 }
 0x1c0   :  { %v2559_v52 = vadd.f32 %v696_v40, %v695_v51 }
 0x1c1   :  { %v694_v54 = vpop.permute.xlu0 %693 }
 0x1c2   :  { %2124 = vtanh.f32 %v2559_v52 }
 0x1cc   :  { %v2125_v53 = vpop.eup %2124 }
 0x1cd   :  { %v699_v55 = vmul.f32 %v2125_v53, %v694_v54 }
 0x1cf   :  { %v702_v56 = vpack.c.bf16 %v699_v55, %v699_v55 }
 0x1d1   :  { %736 = vmatmul.mubr.bf16.vlgmr.msra.gmra.mrb[0].mxu1 %v702_v56  ;;  %v267_v56 = vld [vmem:[%s266_s27] sm:$0x3]  ;;  %s322_s27 = scalar_lea.vmem %s3054_s1, %s1822_s16 }
 0x1d2   :  { %826 = vmatpush1.bf16.msra.mxu1 %v2380_v1  ;;  %857 = vmatprep.mubr.bf16.mxu1 %v2270_v2  ;;  %269 = vst.msk [vmem:[#allocation2 + $0x30] ss:$8 sm:$0x3] %vm2399_vm0, %v267_v56 }
 0x1d3   :  { %827 = vmatprep.subr.bf16.mxu1 %v2385_v3 }
 0x1d6   :  { %828 = vmatpush1.bf16.msra.mxu1 %v2389_v4 }
 0x1d7   :  { %829 = vmatprep.subr.bf16.mxu1 %v2393_v6 }
 0x1da   :  { %830 = vmatpush1.bf16.msra.mxu1 %v2397_v7 }
 0x1db   :  { %831 = vmatprep.subr.bf16.mxu1 %v2405_v9 }
 0x1de   :  { %832 = vmatpush1.bf16.msra.mxu1 %v2413_v10 }
 0x1df   :  { %833 = vmatprep.subr.bf16.mxu1 %v2415_v11 }
 0x1e2   :  { %834 = vmatpush1.bf16.msra.mxu1 %v2429_v13 }
 0x1e3   :  { %835 = vmatprep.subr.bf16.mxu1 %v2431_v16 }
 0x1e6   :  { %836 = vmatpush1.bf16.msra.mxu1 %v2448_v18 }
 0x1e7   :  { %837 = vmatprep.subr.bf16.mxu1 %v2452_v20 }
 0x1ea   :  { %838 = vmatpush1.bf16.msra.mxu1 %v2463_v21 }
 0x1eb   :  { %839 = vmatprep.subr.bf16.mxu1 %v2468_v23 }
 0x1ee   :  { %840 = vmatpush1.bf16.msra.mxu1 %v2481_v26 }
 0x1ef   :  { %947 = vmatprep.subr.bf16.mxu1 %v2378_v0 }
 0x2a4   :  { %v737_v59 = vpop.f32.mrb[0].mxu1 }
 0x2a5   :  { %v744_v60 = vadd.f32 %v737_v59, %v700_v57  ;;  %v739_v61 = vpop.f32.mrb[1].mxu1  ;;  %v274_v57 = vld [vmem:[%s273_s12] sm:$0x3]  ;;  %s1820_s12 = sshll.u32 %s2652_s17, 1  ;;  %s1823_s17 = sld [smem:[#allocation3 + $0xc]] }
 0x2a6   :  { %v745_v62 = vadd.f32 %v739_v61, %v701_v58  ;;  %v741_v63 = vpop.f32.mrb[2].mxu1  ;;  %276 = vst.msk [vmem:[#allocation2 + $0x31] ss:$8 sm:$0x3] %vm2399_vm0, %v274_v57  ;;  %v281_v58 = vld [vmem:[%s280_s13] sm:$0x3]  ;;  %s315_s7 = scalar_lea.vmem %s3054_s1, %s1820_s12 }
 0x2a7   :  { %2126 = vtanh.f32 %v744_v60  ;;  %v742_v5 = vpop.f32.mrb[3].mxu1  ;;  %v288_v59 = vld [vmem:[%s287_s18] sm:$0x3]  ;;  %283 = vst.msk [vmem:[#allocation2 + $0x32] ss:$8 sm:$0x3] %vm2399_vm0, %v281_v58 }
 0x2a8   :  { %2128 = vtanh.f32 %v745_v62  ;;  %290 = vst.msk [vmem:[#allocation2 + $0x33] ss:$8 sm:$0x3] %vm2399_vm0, %v288_v59  ;;  %v295_v60 = vld [vmem:[%s294_s21] sm:$0x3]  ;;  %s1825_s13 = sld [smem:[#allocation3 + $0x14]] }
 0x2a9   :  { %v302_v61 = vld [vmem:[%s301_s28] sm:$0x3]  ;;  %297 = vst.msk [vmem:[#allocation2 + $0x34] ss:$8 sm:$0x3] %vm2399_vm0, %v295_v60  ;;  %s1831_s18 = sld [smem:[#allocation3 + $0x2c]] }
 0x2aa   :  { %304 = vst.msk [vmem:[#allocation2 + $0x35] ss:$8 sm:$0x3] %vm2399_vm0, %v302_v61  ;;  %v309_v62 = vld [vmem:[%s308_s22] sm:$0x3] }
 0x2ab   :  { %v316_v63 = vld [vmem:[%s315_s7] sm:$0x3]  ;;  %311 = vst.msk [vmem:[#allocation2 + $0x36] ss:$8 sm:$0x3] %vm2399_vm0, %v309_v62  ;;  %s1824_s25 = sshll.u32 %s1823_s17, 1  ;;  %s343_s17 = scalar_lea.vmem %s3054_s1, %s1828_s5 }
 0x2ac   :  { %318 = vst.msk [vmem:[#allocation2 + $0x37] ss:$8 sm:$0x3] %vm2399_vm0, %v316_v63  ;;  %s329_s12 = scalar_lea.vmem %s3054_s1, %s1824_s25  ;;  %s1843_s7 = sld [smem:[#allocation3 + $0x1d]] }
 0x2ae   :  { %s1826_s30 = sshll.u32 %s1825_s13, 1  ;;  %s1830_s13 = sshll.u32 %s1829_s2, 1 }
 0x2af   :  { %s336_s24 = scalar_lea.vmem %s3054_s1, %s1826_s30  ;;  %s1832_s16 = sshll.u32 %s1831_s18, 1 }
 0x2b0   :  { %s350_s21 = scalar_lea.vmem %s3054_s1, %s1830_s13  ;;  %s357_s28 = scalar_lea.vmem %s3054_s1, %s1832_s16 }
 0x2b1   :  { %v2127_v12 = vpop.eup %2126  ;;  %s364_s30 = scalar_lea.vmem %s3054_s1, %s1834_s29  ;;  %s2789_s13 = sld [smem:[#allocation3 + $0x35]] }
 0x2b2   :  { %v2129_v14 = vpop.eup %2128  ;;  %v748_v15 = vmul.f32 0.5, %v2127_v12  ;;  %s2791_s16 = sld [smem:[#allocation3 + $0x3d]]  ;;  %s1844_s18 = sshll.u32 %s1843_s7, 1 }
 0x2b3   :  { %v750_v19 = vmul.f32 0.5, %v2129_v14 }
 0x2b4   :  { %v749_v17 = vadd.f32 0.5, %v748_v15 }
 0x2b5   :  { %v751_v24 = vadd.f32 0.5, %v750_v19 }
 0x2b6   :  { %752 = vrot.lane.b32.xlu1 %v749_v17, %s2263_s0  ;;  %v757_v22 = vmul.f32 %v2129_v14, %v749_v17 }
 0x2b7   :  { %s1850_s29 = sshll.u32 %s2789_s13, 1  ;;  %s1853_s13 = sld [smem:[#allocation3 + $0x6]] }
 0x2ba   :  { %754 = vrot.lane.b32.xlu1 %v751_v24, %s2263_s0  ;;  %v823_v24 = vld [vmem:[#allocation2 + $0x38] sm:$0xff] }
 0x2bd   :  { %s1854_s7 = sshll.u32 %s1853_s13, 1  ;;  %s1877_s13 = sld [smem:[#allocation3 + $0x27]] }
 0x328   :  { %v753_v34 = vpop.permute.xlu1 %752 }
 0x329   :  { %v756_v35 = vmul.f32 %v753_v34, %v2559_v52 }
 0x32b   :  { %v2628_v36 = vadd.f32 %v757_v22, %v756_v35 }
 0x32c   :  { %v755_v38 = vpop.permute.xlu1 %754 }
 0x32d   :  { %2130 = vtanh.f32 %v2628_v36 }
 0x337   :  { %v2131_v37 = vpop.eup %2130 }
 0x338   :  { %v760_v39 = vmul.f32 %v2131_v37, %v755_v38 }
 0x33a   :  { %v763_v40 = vpack.c.bf16 %v760_v39, %v760_v39  ;;  %v330_v39 = vld [vmem:[%s329_s12] sm:$0x3]  ;;  %s1836_s12 = sshll.u32 %s2721_s20, 1  ;;  %s1839_s20 = sld [smem:[#allocation3 + $0xd]] }
 0x33b   :  { %332 = vst.msk [vmem:[#allocation2 + $0x41] ss:$8 sm:$0x3] %vm2399_vm0, %v330_v39  ;;  %s371_s23 = scalar_lea.vmem %s3054_s1, %s1836_s12 }
 0x33c   :  { %797 = vmatmul.mubr.bf16.vlgmr.msra.gmra.mrb[4].mxu0 %v763_v40  ;;  %v337_v40 = vld [vmem:[%s336_s24] sm:$0x3]  ;;  %s1841_s24 = sld [smem:[#allocation3 + $0x15]] }
 0x33d   :  { %887 = vmatpush1.bf16.msra.mxu0 %v2380_v1  ;;  %918 = vmatprep.mubr.bf16.mxu0 %v2270_v2  ;;  %339 = vst.msk [vmem:[#allocation2 + $0x42] ss:$8 sm:$0x3] %vm2399_vm0, %v337_v40 }
 0x33e   :  { %888 = vmatprep.subr.bf16.mxu0 %v2385_v3 }
 0x340   :  { %s1840_s25 = sshll.u32 %s1839_s20, 1  ;;  %s399_s20 = scalar_lea.vmem %s3054_s1, %s1844_s18 }
 0x341   :  { %889 = vmatpush1.bf16.msra.mxu0 %v2389_v4  ;;  %s385_s12 = scalar_lea.vmem %s3054_s1, %s1840_s25  ;;  %v400_v61 = vld [vmem:[%s399_s20] sm:$0x3]  ;;  %s1863_s20 = sld [smem:[#allocation3 + $0x2e]] }
 0x342   :  { %890 = vmatprep.subr.bf16.mxu0 %v2393_v6  ;;  %v386_v59 = vld [vmem:[%s385_s12] sm:$0x3]  ;;  %s1842_s2 = sshll.u32 %s1841_s24, 1  ;;  %s1846_s24 = sshll.u32 %s1845_s19, 1 }
 0x343   :  { %388 = vst.msk [vmem:[#allocation2 + $0x51] ss:$8 sm:$0x3] %vm2399_vm0, %v386_v59  ;;  %s392_s22 = scalar_lea.vmem %s3054_s1, %s1842_s2  ;;  %402 = vst.msk [vmem:[#allocation2 + $0x53] ss:$8 sm:$0x3] %vm2399_vm0, %v400_v61  ;;  %s420_s2 = scalar_lea.vmem %s3054_s1, %s1850_s29 }
 0x344   :  { %v393_v60 = vld [vmem:[%s392_s22] sm:$0x3]  ;;  %s1852_s12 = sshll.u32 %s2791_s16, 1  ;;  %s1855_s16 = sld [smem:[#allocation3 + $0xe]] }
 0x345   :  { %891 = vmatpush1.bf16.msra.mxu0 %v2397_v7  ;;  %395 = vst.msk [vmem:[#allocation2 + $0x52] ss:$8 sm:$0x3] %vm2399_vm0, %v393_v60  ;;  %s427_s5 = scalar_lea.vmem %s3054_s1, %s1852_s12  ;;  %s1857_s22 = sld [smem:[#allocation3 + $0x16]] }
 0x346   :  { %892 = vmatprep.subr.bf16.mxu0 %v2405_v9 }
 0x349   :  { %893 = vmatpush1.bf16.msra.mxu0 %v2413_v10 }
 0x34a   :  { %894 = vmatprep.subr.bf16.mxu0 %v2415_v11  ;;  %s1856_s25 = sshll.u32 %s1855_s16, 1 }
 0x34b   :  { %s441_s12 = scalar_lea.vmem %s3054_s1, %s1856_s25  ;;  %s1858_s19 = sshll.u32 %s1857_s22, 1 }
 0x34c   :  { %s1862_s22 = sshll.u32 %s1861_s15, 1 }
 0x34d   :  { %895 = vmatpush1.bf16.msra.mxu0 %v2429_v13 }
 0x34e   :  { %896 = vmatprep.subr.bf16.mxu0 %v2431_v16 }
 0x351   :  { %897 = vmatpush1.bf16.msra.mxu0 %v2448_v18 }
 0x352   :  { %898 = vmatprep.subr.bf16.mxu0 %v2452_v20 }
 0x355   :  { %899 = vmatpush1.bf16.msra.mxu0 %v2463_v21 }
 0x356   :  { %900 = vmatprep.subr.bf16.mxu0 %v2468_v23 }
 0x359   :  { %901 = vmatpush1.bf16.msra.mxu0 %v2481_v26 }
 0x35a   :  { %1008 = vmatprep.subr.bf16.mxu0 %v2378_v0 }
 0x40f   :  { %v798_v43 = vpop.f32.mrb[4].mxu0 }
 0x410   :  { %v805_v44 = vadd.f32 %v798_v43, %v761_v41  ;;  %v800_v45 = vpop.f32.mrb[5].mxu0  ;;  %v344_v41 = vld [vmem:[%s343_s17] sm:$0x3]  ;;  %s1847_s17 = sld [smem:[#allocation3 + $0x2d]] }
 0x411   :  { %v806_v46 = vadd.f32 %v800_v45, %v762_v42  ;;  %v802_v47 = vpop.f32.mrb[6].mxu0  ;;  %346 = vst.msk [vmem:[#allocation2 + $0x43] ss:$8 sm:$0x3] %vm2399_vm0, %v344_v41  ;;  %v351_v42 = vld [vmem:[%s350_s21] sm:$0x3]  ;;  %s406_s21 = scalar_lea.vmem %s3054_s1, %s1846_s24 }
 0x412   :  { %2132 = vtanh.f32 %v805_v44  ;;  %v803_v48 = vpop.f32.mrb[7].mxu0  ;;  %v358_v43 = vld [vmem:[%s357_s28] sm:$0x3]  ;;  %353 = vst.msk [vmem:[#allocation2 + $0x44] ss:$8 sm:$0x3] %vm2399_vm0, %v351_v42 }
 0x413   :  { %2134 = vtanh.f32 %v806_v46  ;;  %360 = vst.msk [vmem:[#allocation2 + $0x45] ss:$8 sm:$0x3] %vm2399_vm0, %v358_v43  ;;  %v365_v44 = vld [vmem:[%s364_s30] sm:$0x3]  ;;  %s2846_s24 = sld [smem:[#allocation3 + $0x36]]  ;;  %s448_s30 = scalar_lea.vmem %s3054_s1, %s1858_s19 }
 0x414   :  { %v372_v45 = vld [vmem:[%s371_s23] sm:$0x3]  ;;  %367 = vst.msk [vmem:[#allocation2 + $0x46] ss:$8 sm:$0x3] %vm2399_vm0, %v365_v44  ;;  %s1859_s23 = sld [smem:[#allocation3 + $0x1e]] }
 0x415   :  { %374 = vst.msk [vmem:[#allocation2 + $0x47] ss:$8 sm:$0x3] %vm2399_vm0, %v372_v45  ;;  %v407_v62 = vld [vmem:[%s406_s21] sm:$0x3]  ;;  %s462_s21 = scalar_lea.vmem %s3054_s1, %s1862_s22  ;;  %s2898_s22 = sld [smem:[#allocation3 + $0x37]] }
 0x416   :  { %409 = vst.msk [vmem:[#allocation2 + $0x54] ss:$8 sm:$0x3] %vm2399_vm0, %v407_v62 }
 0x419   :  { %s1866_s29 = sshll.u32 %s2846_s24, 1  ;;  %s1869_s24 = sld [smem:[#allocation3 + $0x7]] }
 0x41a   :  { %s476_s19 = scalar_lea.vmem %s3054_s1, %s1866_s29 }
 0x41b   :  { %s1882_s29 = sshll.u32 %s2898_s22, 1 }
 0x41c   :  { %v2133_v49 = vpop.eup %2132 }
 0x41d   :  { %v2135_v50 = vpop.eup %2134  ;;  %v809_v51 = vmul.f32 0.5, %v2133_v49 }
 0x41e   :  { %v811_v52 = vmul.f32 0.5, %v2135_v50 }
 0x41f   :  { %v810_v53 = vadd.f32 0.5, %v809_v51 }
 0x420   :  { %v812_v54 = vadd.f32 0.5, %v811_v52 }
 0x421   :  { %813 = vrot.lane.b32.xlu0 %v810_v53, %s2263_s0  ;;  %v818_v55 = vmul.f32 %v2135_v50, %v810_v53  ;;  %v2769_v53 = vld [vmem:[#allocation6] ss:$8 sps:$4 sm:$0xff]  }
 0x422   :  { %815 = vrot.lane.b32.xlu1 %v812_v54, %s2263_s0 }
 0x493   :  { %v814_v5 = vpop.permute.xlu0 %813 }
 0x494   :  { %v817_v12 = vmul.f32 %v814_v5, %v2628_v36  ;;  %v816_v17 = vpop.permute.xlu1 %815  ;;  %v421_v5 = vld [vmem:[%s420_s2] sm:$0x3] }
 0x495   :  { %423 = vst.msk [vmem:[#allocation2 + $0x56] ss:$8 sm:$0x3] %vm2399_vm0, %v421_v5 }
 0x496   :  { %v2697_v14 = vadd.f32 %v818_v55, %v817_v12  ;;  %v428_v12 = vld [vmem:[%s427_s5] sm:$0x3]  ;;  %s1875_s5 = sld [smem:[#allocation3 + $0x1f]] }
 0x497   :  { %430 = vst.msk [vmem:[#allocation2 + $0x57] ss:$8 sm:$0x3] %vm2399_vm0, %v428_v12 }
 0x498   :  { %2136 = vtanh.f32 %v2697_v14 }
 0x4a2   :  { %v2137_v15 = vpop.eup %2136 }
 0x4a3   :  { %v821_v19 = vmul.f32 %v2137_v15, %v816_v17 }
 0x4a5   :  { %v824_v22 = vpack.c.bf16 %v821_v19, %v821_v19 }
 0x4a7   :  { %858 = vmatmul.mubr.bf16.vlgmr.msra.gmra.mrb[4].mxu1 %v824_v22 }
 0x4a8   :  { %948 = vmatpush1.bf16.msra.mxu1 %v2380_v1  ;;  %979 = vmatprep.mubr.bf16.mxu1 %v2270_v2  ;;  %v822_v1 = vld [vmem:[#allocation2 + $0x30] sm:$0xff] }
 0x4a9   :  { %949 = vmatprep.subr.bf16.mxu1 %v2385_v3 }
 0x4ac   :  { %950 = vmatpush1.bf16.msra.mxu1 %v2389_v4 }
 0x4ad   :  { %951 = vmatprep.subr.bf16.mxu1 %v2393_v6 }
 0x4b0   :  { %952 = vmatpush1.bf16.msra.mxu1 %v2397_v7 }
 0x4b1   :  { %953 = vmatprep.subr.bf16.mxu1 %v2405_v9 }
 0x4b4   :  { %954 = vmatpush1.bf16.msra.mxu1 %v2413_v10 }
 0x4b5   :  { %955 = vmatprep.subr.bf16.mxu1 %v2415_v11 }
 0x4b8   :  { %956 = vmatpush1.bf16.msra.mxu1 %v2429_v13 }
 0x4b9   :  { %957 = vmatprep.subr.bf16.mxu1 %v2431_v16 }
 0x4bc   :  { %958 = vmatpush1.bf16.msra.mxu1 %v2448_v18 }
 0x4bd   :  { %959 = vmatprep.subr.bf16.mxu1 %v2452_v20 }
 0x4c0   :  { %960 = vmatpush1.bf16.msra.mxu1 %v2463_v21 }
 0x4c1   :  { %961 = vmatprep.subr.bf16.mxu1 %v2468_v23 }
 0x4c4   :  { %962 = vmatpush1.bf16.msra.mxu1 %v2481_v26 }
 0x4c5   :  { %1069 = vmatprep.subr.bf16.mxu1 %v2378_v0  ;;  %v323_v0 = vld [vmem:[%s322_s27] sm:$0x3]  ;;  %s378_s27 = scalar_lea.vmem %s3054_s1, %s1838_s14  ;;  %s1848_s14 = sshll.u32 %s1847_s17, 1 }
 0x4c6   :  { %325 = vst.msk [vmem:[#allocation2 + $0x40] ss:$8 sm:$0x3] %vm2399_vm0, %v323_v0  ;;  %v379_v58 = vld [vmem:[%s378_s27] sm:$0x3]  ;;  %s413_s28 = scalar_lea.vmem %s3054_s1, %s1848_s14  ;;  %s2848_s14 = sld [smem:[#allocation3 + $0x3e]] }
 0x4c7   :  { %381 = vst.msk [vmem:[#allocation2 + $0x50] ss:$8 sm:$0x3] %vm2399_vm0, %v379_v58  ;;  %v414_v63 = vld [vmem:[%s413_s28] sm:$0x3]  ;;  %s434_s27 = scalar_lea.vmem %s3054_s1, %s1854_s7  ;;  %s1860_s17 = sshll.u32 %s1859_s23, 1 }
 0x4c8   :  { %416 = vst.msk [vmem:[#allocation2 + $0x55] ss:$8 sm:$0x3] %vm2399_vm0, %v414_v63  ;;  %s455_s16 = scalar_lea.vmem %s3054_s1, %s1860_s17  ;;  %s1864_s7 = sshll.u32 %s1863_s20, 1 }
 0x4c9   :  { %s469_s28 = scalar_lea.vmem %s3054_s1, %s1864_s7  ;;  %s2900_s7 = sld [smem:[#allocation3 + $0x3f]] }
 0x4ca   :  { %s1870_s23 = sshll.u32 %s1869_s24, 1  ;;  %s1876_s20 = sshll.u32 %s1875_s5, 1 }
 0x57a   :  { %v859_v25 = vpop.f32.mrb[4].mxu1 }
 0x57b   :  { %v866_v27 = vadd.f32 %v859_v25, %v822_v1  ;;  %v861_v28 = vpop.f32.mrb[5].mxu1  ;;  %v2167_v25 = vld [vmem:[#allocation6 + $0x14] ss:$8 sps:$4 sm:$0xff]  }
 0x57c   :  { %v867_v29 = vadd.f32 %v861_v28, %v823_v24  ;;  %v863_v30 = vpop.f32.mrb[6].mxu1  ;;  %v2169_v28 = vld [vmem:[#allocation6 + $0x24] ss:$8 sps:$4 sm:$0xff]  }
 0x57d   :  { %2138 = vtanh.f32 %v866_v27  ;;  %v864_v31 = vpop.f32.mrb[7].mxu1  ;;  %v2168_v27 = vld [vmem:[#allocation6 + $0x10] ss:$8 sps:$4 sm:$0xff]   ;;  %v2171_v30 = vld [vmem:[#allocation6 + $0x34] ss:$8 sps:$4 sm:$0xff]  }
 0x57e   :  { %2140 = vtanh.f32 %v867_v29  ;;  %v2170_v29 = vld [vmem:[#allocation6 + $0x20] ss:$8 sps:$4 sm:$0xff]   ;;  %v2172_v31 = vld [vmem:[#allocation6 + $0x30] ss:$8 sps:$4 sm:$0xff]  }
 0x587   :  { %v2139_v32 = vpop.eup %2138 }
 0x588   :  { %v2141_v33 = vpop.eup %2140  ;;  %v870_v34 = vmul.f32 0.5, %v2139_v32  ;;  %v2173_v32 = vld [vmem:[#allocation6 + $0x44] ss:$8 sps:$4 sm:$0xff]  }
 0x589   :  { %v872_v35 = vmul.f32 0.5, %v2141_v33 }
 0x58a   :  { %v871_v36 = vadd.f32 0.5, %v870_v34  ;;  %v2175_v34 = vld [vmem:[#allocation6 + $0x54] ss:$8 sps:$4 sm:$0xff]  }
 0x58b   :  { %v873_v37 = vadd.f32 0.5, %v872_v35  ;;  %v2176_v35 = vld [vmem:[#allocation6 + $0x50] ss:$8 sps:$4 sm:$0xff]  }
 0x58c   :  { %874 = vrot.lane.b32.xlu0 %v871_v36, %s2263_s0  ;;  %v879_v38 = vmul.f32 %v2141_v33, %v871_v36  ;;  %v2174_v33 = vld [vmem:[#allocation6 + $0x40] ss:$8 sps:$4 sm:$0xff]   ;;  %v944_v36 = vld [vmem:[#allocation2 + $0x50] sm:$0xff] }
 0x58d   :  { %876 = vrot.lane.b32.xlu1 %v873_v37, %s2263_s0  ;;  %v945_v37 = vld [vmem:[#allocation2 + $0x58] sm:$0xff] }
 0x5fe   :  { %v875_v46 = vpop.permute.xlu0 %874 }
 0x5ff   :  { %v878_v47 = vmul.f32 %v875_v46, %v2697_v14  ;;  %v877_v50 = vpop.permute.xlu1 %876 }
 0x601   :  { %v2766_v48 = vadd.f32 %v879_v38, %v878_v47 }
 0x603   :  { %2142 = vtanh.f32 %v2766_v48 }
 0x60d   :  { %v2143_v49 = vpop.eup %2142 }
 0x60e   :  { %v882_v51 = vmul.f32 %v2143_v49, %v877_v50  ;;  %v449_v49 = vld [vmem:[%s448_s30] sm:$0x3]  ;;  %s1873_s30 = sld [smem:[#allocation3 + $0x17]] }
 0x60f   :  { %v456_v50 = vld [vmem:[%s455_s16] sm:$0x3]  ;;  %451 = vst.msk [vmem:[#allocation2 + $0x62] ss:$8 sm:$0x3] %vm2399_vm0, %v449_v49  ;;  %s1879_s16 = sld [smem:[#allocation3 + $0x2f]] }
 0x610   :  { %v885_v52 = vpack.c.bf16 %v882_v51, %v882_v51  ;;  %458 = vst.msk [vmem:[#allocation2 + $0x63] ss:$8 sm:$0x3] %vm2399_vm0, %v456_v50  ;;  %v463_v51 = vld [vmem:[%s462_s21] sm:$0x3] }
 0x611   :  { %465 = vst.msk [vmem:[#allocation2 + $0x64] ss:$8 sm:$0x3] %vm2399_vm0, %v463_v51  ;;  %v2098_v51 = vld [vmem:[#allocation7 + $0x10] sm:$0xff]  }
 0x612   :  { %919 = vmatmul.mubr.bf16.vlgmr.msra.gmra.mrb[8].mxu0 %v885_v52  ;;  %v470_v52 = vld [vmem:[%s469_s28] sm:$0x3] }
 0x613   :  { %1009 = vmatpush1.bf16.msra.mxu0 %v2769_v53  ;;  %1040 = vmatprep.mubr.bf16.mxu0 %v2270_v2  ;;  %472 = vst.msk [vmem:[#allocation2 + $0x65] ss:$8 sm:$0x3] %vm2399_vm0, %v470_v52 }
 0x614   :  { %1010 = vmatprep.subr.bf16.mxu0 %v2385_v3  ;;  %v883_v3 = vld [vmem:[#allocation2 + $0x40] sm:$0xff]  ;;  %s1874_s15 = sshll.u32 %s1873_s30, 1  ;;  %s1878_s30 = sshll.u32 %s1877_s13, 1 }
 0x615   :  { %s504_s2 = scalar_lea.vmem %s3054_s1, %s1874_s15  ;;  %s518_s21 = scalar_lea.vmem %s3054_s1, %s1878_s30 }
 0x616   :  { %s532_s15 = scalar_lea.vmem %s3054_s1, %s1882_s29 }
 0x617   :  { %1011 = vmatpush1.bf16.msra.mxu0 %v2389_v4  ;;  %v884_v4 = vld [vmem:[#allocation2 + $0x48] sm:$0xff] }
 0x618   :  { %1012 = vmatprep.subr.bf16.mxu0 %v2393_v6 }
 0x61b   :  { %1013 = vmatpush1.bf16.msra.mxu0 %v2397_v7 }
 0x61c   :  { %1014 = vmatprep.subr.bf16.mxu0 %v2405_v9 }
 0x61f   :  { %1015 = vmatpush1.bf16.msra.mxu0 %v2413_v10 }
 0x620   :  { %1016 = vmatprep.subr.bf16.mxu0 %v2415_v11 }
 0x623   :  { %1017 = vmatpush1.bf16.msra.mxu0 %v2429_v13 }
 0x624   :  { %1018 = vmatprep.subr.bf16.mxu0 %v2431_v16 }
 0x627   :  { %1019 = vmatpush1.bf16.msra.mxu0 %v2448_v18 }
 0x628   :  { %1020 = vmatprep.subr.bf16.mxu0 %v2452_v20 }
 0x62b   :  { %1021 = vmatpush1.bf16.msra.mxu0 %v2463_v21 }
 0x62c   :  { %1022 = vmatprep.subr.bf16.mxu0 %v2468_v23 }
 0x62f   :  { %1023 = vmatpush1.bf16.msra.mxu0 %v2481_v26 }
 0x6e5   :  { %v920_v6 = vpop.f32.mrb[8].mxu0 }
 0x6e6   :  { %v927_v7 = vadd.f32 %v920_v6, %v883_v3  ;;  %v922_v9 = vpop.f32.mrb[9].mxu0 }
 0x6e7   :  { %v928_v10 = vadd.f32 %v922_v9, %v884_v4  ;;  %v924_v11 = vpop.f32.mrb[10].mxu0 }
 0x6e8   :  { %2144 = vtanh.f32 %v927_v7  ;;  %v925_v13 = vpop.f32.mrb[11].mxu0 }
 0x6e9   :  { %2146 = vtanh.f32 %v928_v10 }
 0x6f2   :  { %v2145_v16 = vpop.eup %2144 }
 0x6f3   :  { %v2147_v18 = vpop.eup %2146  ;;  %v931_v54 = vmul.f32 0.5, %v2145_v16 }
 0x6f4   :  { %v933_v20 = vmul.f32 0.5, %v2147_v18 }
 0x6f5   :  { %v932_v55 = vadd.f32 0.5, %v931_v54 }
 0x6f6   :  { %v934_v56 = vadd.f32 0.5, %v933_v20 }
 0x6f7   :  { %935 = vrot.lane.b32.xlu0 %v932_v55, %s2263_s0  ;;  %v940_v57 = vmul.f32 %v2147_v18, %v932_v55 }
 0x6f8   :  { %937 = vrot.lane.b32.xlu1 %v934_v56, %s2263_s0 }
 0x769   :  { %v936_v14 = vpop.permute.xlu0 %935 }
 0x76a   :  { %v939_v15 = vmul.f32 %v936_v14, %v2766_v48  ;;  %v938_v22 = vpop.permute.xlu1 %937  ;;  %v442_v48 = vld [vmem:[%s441_s12] sm:$0x3]  ;;  %s1868_s12 = sshll.u32 %s2848_s14, 1  ;;  %s1871_s14 = sld [smem:[#allocation3 + $0xf]] }
 0x76b   :  { %444 = vst.msk [vmem:[#allocation2 + $0x61] ss:$8 sm:$0x3] %vm2399_vm0, %v442_v48  ;;  %s483_s18 = scalar_lea.vmem %s3054_s1, %s1868_s12 }
 0x76c   :  { %v2836_v17 = vadd.f32 %v940_v57, %v939_v15  ;;  %v484_v3 = vld [vmem:[%s483_s18] sm:$0x3] }
 0x76d   :  { %486 = vst.msk [vmem:[#allocation2 + $0x67] ss:$8 sm:$0x3] %vm2399_vm0, %v484_v3  ;;  %v2100_v3 = vld [vmem:[#allocation7 + $0x20] sm:$0xff]  }
 0x76e   :  { %2148 = vtanh.f32 %v2836_v17 }
 0x770   :  { %s1872_s25 = sshll.u32 %s1871_s14, 1  ;;  %s511_s14 = scalar_lea.vmem %s3054_s1, %s1876_s20 }
 0x771   :  { %s497_s12 = scalar_lea.vmem %s3054_s1, %s1872_s25 }
 0x772   :  { %v498_v15 = vld [vmem:[%s497_s12] sm:$0x3]  ;;  %s1884_s12 = sshll.u32 %s2900_s7, 1 }
 0x773   :  { %500 = vst.msk [vmem:[#allocation2 + $0x71] ss:$8 sm:$0x3] %vm2399_vm0, %v498_v15  ;;  %s539_s17 = scalar_lea.vmem %s3054_s1, %s1884_s12  ;;  %v2112_v15 = vld [vmem:[%s3062_s9] sm:$0xff]  }
 0x778   :  { %v2149_v19 = vpop.eup %2148 }
 0x779   :  { %v943_v1 = vmul.f32 %v2149_v19, %v938_v22  ;;  %v512_v19 = vld [vmem:[%s511_s14] sm:$0x3] }
 0x77a   :  { %514 = vst.msk [vmem:[#allocation2 + $0x73] ss:$8 sm:$0x3] %vm2399_vm0, %v512_v19  ;;  %v519_v22 = vld [vmem:[%s518_s21] sm:$0x3]  ;;  %v2114_v19 = vld [vmem:[%s3062_s9 + $0x10] sm:$0xff]  }
 0x77b   :  { %v946_v24 = vpack.c.bf16 %v943_v1, %v943_v1  ;;  %521 = vst.msk [vmem:[#allocation2 + $0x74] ss:$8 sm:$0x3] %vm2399_vm0, %v519_v22  ;;  %v2115_v22 = vld [vmem:[%s3062_s9 + $0x18] sm:$0xff]  }
 0x77d   :  { %980 = vmatmul.mubr.bf16.vlgmr.msra.gmra.mrb[8].mxu1 %v946_v24  ;;  %v533_v24 = vld [vmem:[%s532_s15] sm:$0x3] }
 0x77e   :  { %1070 = vmatpush1.bf16.msra.mxu1 %v2769_v53  ;;  %1101 = vmatprep.mubr.bf16.mxu1 %v2270_v2  ;;  %v2177_v2 = vld [vmem:[#allocation6 + $0x64] ss:$8 sps:$4 sm:$0xff]   ;;  %v477_v53 = vld [vmem:[%s476_s19] sm:$0x3] }
 0x77f   :  { %1071 = vmatprep.subr.bf16.mxu1 %v2167_v25  ;;  %479 = vst.msk [vmem:[#allocation2 + $0x66] ss:$8 sm:$0x3] %vm2399_vm0, %v477_v53  ;;  %v540_v25 = vld [vmem:[%s539_s17] sm:$0x3]  ;;  %v2099_v53 = vld [vmem:[#allocation7 + $0x18] sm:$0xff]  }
 0x780   :  { %535 = vst.msk [vmem:[#allocation2 + $0x76] ss:$8 sm:$0x3] %vm2399_vm0, %v533_v24  ;;  %542 = vst.msk [vmem:[#allocation2 + $0x77] ss:$8 sm:$0x3] %vm2399_vm0, %v540_v25 }
 0x781   :  { %v2117_v24 = vld [vmem:[%s3062_s9 + $0x28] sm:$0xff]   ;;  %v1910_v25 = vld [vmem:[%s3059_s6] ss:$0 sm:$0xff] }
 0x782   :  { %1072 = vmatpush1.bf16.msra.mxu1 %v2168_v27 }
 0x783   :  { %1073 = vmatprep.subr.bf16.mxu1 %v2169_v28 }
 0x786   :  { %1074 = vmatpush1.bf16.msra.mxu1 %v2170_v29 }
 0x787   :  { %1075 = vmatprep.subr.bf16.mxu1 %v2171_v30 }
 0x78a   :  { %1076 = vmatpush1.bf16.msra.mxu1 %v2172_v31 }
 0x78b   :  { %1077 = vmatprep.subr.bf16.mxu1 %v2173_v32 }
 0x78e   :  { %1078 = vmatpush1.bf16.msra.mxu1 %v2174_v33 }
 0x78f   :  { %1079 = vmatprep.subr.bf16.mxu1 %v2175_v34  ;;  %v2088_v34 = vld [vmem:[%s3056_s3] sm:$0xff]  }
 0x792   :  { %1080 = vmatpush1.bf16.msra.mxu1 %v2176_v35  ;;  %v2271_v35 = vmov 0.0  }
 0x793   :  { %1081 = vmatprep.subr.bf16.mxu1 %v2177_v2  ;;  %1973 = vmatprep.subr.bf16.mxu0 %v2271_v35  ;;  %v2090_v2 = vld [vmem:[%s3056_s3 + $0x10] sm:$0xff]  }
 0x796   :  { %1082 = vmatpush1.bf16.msra.mxu1 %v2463_v21 }
 0x797   :  { %1083 = vmatprep.subr.bf16.mxu1 %v2468_v23 }
 0x79a   :  { %1084 = vmatpush1.bf16.msra.mxu1 %v2481_v26  ;;  %v435_v26 = vld [vmem:[%s434_s27] sm:$0x3]  ;;  %s490_s27 = scalar_lea.vmem %s3054_s1, %s1870_s23  ;;  %s1880_s23 = sshll.u32 %s1879_s16, 1 }
 0x79b   :  { %437 = vst.msk [vmem:[#allocation2 + $0x60] ss:$8 sm:$0x3] %vm2399_vm0, %v435_v26  ;;  %v491_v14 = vld [vmem:[%s490_s27] sm:$0x3]  ;;  %s525_s28 = scalar_lea.vmem %s3054_s1, %s1880_s23  ;;  %1993 = vmatprep.subr.bf16.mxu1 %v2271_v35 }
 0x79c   :  { %493 = vst.msk [vmem:[#allocation2 + $0x70] ss:$8 sm:$0x3] %vm2399_vm0, %v491_v14  ;;  %v526_v1 = vld [vmem:[%s525_s28] sm:$0x3]  ;;  %v2111_v14 = vld [vmem:[#allocation9 + $0x38] sm:$0xff]  }
 0x79d   :  { %528 = vst.msk [vmem:[#allocation2 + $0x75] ss:$8 sm:$0x3] %vm2399_vm0, %v526_v1  ;;  %v2097_v26 = vld [vmem:[#allocation7 + $0x8] sm:$0xff]  }
 0x79e   :  { %v2116_v1 = vld [vmem:[%s3062_s9 + $0x20] sm:$0xff]  }
 0x7a2   :  { %v1005_v16 = vld [vmem:[#allocation2 + $0x60] sm:$0xff]  ;;  %v1006_v18 = vld [vmem:[#allocation2 + $0x68] sm:$0xff] }
 0x850   :  { %v981_v38 = vpop.f32.mrb[8].mxu1 }
 0x851   :  { %v988_v0 = vadd.f32 %v981_v38, %v944_v36  ;;  %v983_v39 = vpop.f32.mrb[9].mxu1  ;;  %v2091_v36 = vld [vmem:[%s3056_s3 + $0x18] sm:$0xff]   ;;  %v2093_v38 = vld [vmem:[%s3056_s3 + $0x28] sm:$0xff]  }
 0x852   :  { %v989_v40 = vadd.f32 %v983_v39, %v945_v37  ;;  %v985_v41 = vpop.f32.mrb[10].mxu1  ;;  %v2092_v37 = vld [vmem:[%s3056_s3 + $0x20] sm:$0xff]  }
 0x853   :  { %2150 = vtanh.f32 %v988_v0  ;;  %v986_v42 = vpop.f32.mrb[11].mxu1  ;;  %v2094_v0 = vld [vmem:[%s3056_s3 + $0x30] sm:$0xff]  }
 0x854   :  { %2152 = vtanh.f32 %v989_v40 }
 0x85d   :  { %v2151_v43 = vpop.eup %2150 }
 0x85e   :  { %v2153_v44 = vpop.eup %2152  ;;  %v992_v45 = vmul.f32 0.5, %v2151_v43 }
 0x85f   :  { %v994_v46 = vmul.f32 0.5, %v2153_v44 }
 0x860   :  { %v993_v47 = vadd.f32 0.5, %v992_v45 }
 0x861   :  { %v995_v21 = vadd.f32 0.5, %v994_v46 }
 0x862   :  { %996 = vrot.lane.b32.xlu0 %v993_v47, %s2263_s0  ;;  %v1001_v23 = vmul.f32 %v2153_v44, %v993_v47  ;;  %v2095_v47 = vld [vmem:[%s3056_s3 + $0x38] sm:$0xff]  }
 0x863   :  { %998 = vrot.lane.b32.xlu1 %v995_v21, %s2263_s0  ;;  %v2096_v21 = vld [vmem:[#allocation7] sm:$0xff]  }
 0x8d4   :  { %v997_v4 = vpop.permute.xlu0 %996 }
 0x8d5   :  { %v1000_v6 = vmul.f32 %v997_v4, %v2836_v17  ;;  %v999_v10 = vpop.permute.xlu1 %998  ;;  %v505_v17 = vld [vmem:[%s504_s2] sm:$0x3] }
 0x8d6   :  { %507 = vst.msk [vmem:[#allocation2 + $0x72] ss:$8 sm:$0x3] %vm2399_vm0, %v505_v17  ;;  %v2101_v4 = vld [vmem:[#allocation7 + $0x28] sm:$0xff]   ;;  %v2113_v17 = vld [vmem:[%s3062_s9 + $0x8] sm:$0xff]  }
 0x8d7   :  { %v2893_v7 = vadd.f32 %v1001_v23, %v1000_v6 }
 0x8d9   :  { %2154 = vtanh.f32 %v2893_v7 }
 0x8dd   :  { %v1066_v39 = vld [vmem:[#allocation2 + $0x70] sm:$0xff]  ;;  %v1067_v41 = vld [vmem:[#allocation2 + $0x78] sm:$0xff] }
 0x8e3   :  { %v2155_v9 = vpop.eup %2154 }
 0x8e4   :  { %v1004_v11 = vmul.f32 %v2155_v9, %v999_v10 }
 0x8e6   :  { %v1007_v13 = vpack.c.bf16 %v1004_v11, %v1004_v11  ;;  %v2102_v11 = vld [vmem:[#allocation7 + $0x30] sm:$0xff]  }
 0x8e8   :  { %1041 = vmatmul.mubr.bf16.vlgmr.msra.gmra.mrb[12].mxu0 %v1007_v13  ;;  %v2103_v13 = vld [vmem:[#allocation7 + $0x38] sm:$0xff]  }
 0x8e9   :  { %1974 = vmatpush3.bf16.msra.mxu0 %v2088_v34  ;;  %1989 = vmatprep.mubr.msk.bf16.mxu0 %vm2272_vm1, %v2271_v35  ;;  %v2118_v34 = vld [vmem:[%s3062_s9 + $0x30] sm:$0xff]  }
 0x8ea   :  { %1975 = vmatprep.subr.bf16.mxu0 %v2271_v35 }
 0x8ed   :  { %1976 = vmatpush3.bf16.msra.mxu0 %v2089_v8  ;;  %v2119_v8 = vld [vmem:[%s3062_s9 + $0x38] sm:$0xff]  }
 0x8ee   :  { %1977 = vmatprep.subr.bf16.mxu0 %v2271_v35 }
 0x8f1   :  { %1978 = vmatpush3.bf16.msra.mxu0 %v2090_v2  ;;  %v1919_v2 = vld [vmem:[%s3061_s8] ss:$0 sm:$0xff] }
 0x8f2   :  { %1979 = vmatprep.subr.bf16.mxu0 %v2271_v35 }
 0x8f5   :  { %1980 = vmatpush3.bf16.msra.mxu0 %v2091_v36 }
 0x8f6   :  { %1981 = vmatprep.subr.bf16.mxu0 %v2271_v35 }
 0x8f9   :  { %1982 = vmatpush3.bf16.msra.mxu0 %v2092_v37 }
 0x8fa   :  { %1983 = vmatprep.subr.bf16.mxu0 %v2271_v35 }
 0x8fd   :  { %1984 = vmatpush3.bf16.msra.mxu0 %v2093_v38 }
 0x8fe   :  { %1985 = vmatprep.subr.bf16.mxu0 %v2271_v35 }
 0x901   :  { %1986 = vmatpush3.bf16.msra.mxu0 %v2094_v0 }
 0x902   :  { %1987 = vmatprep.subr.bf16.mxu0 %v2271_v35 }
 0x905   :  { %1988 = vmatpush3.bf16.msra.mxu0 %v2095_v47 }
 0x906   :  { %2013 = vmatprep.subr.bf16.mxu0 %v2271_v35 }
 0x9bb   :  { %v1042_v54 = vpop.f32.mrb[12].mxu0 }
 0x9bc   :  { %v1049_v20 = vadd.f32 %v1042_v54, %v1005_v16  ;;  %v1044_v55 = vpop.f32.mrb[13].mxu0  ;;  %v2104_v16 = vld [vmem:[#allocation9] sm:$0xff]   ;;  %v2106_v54 = vld [vmem:[#allocation9 + $0x10] sm:$0xff]  }
 0x9bd   :  { %v1050_v56 = vadd.f32 %v1044_v55, %v1006_v18  ;;  %v1046_v57 = vpop.f32.mrb[14].mxu0  ;;  %v2105_v18 = vld [vmem:[#allocation9 + $0x8] sm:$0xff]   ;;  %v2108_v55 = vld [vmem:[#allocation9 + $0x20] sm:$0xff]  }
 0x9be   :  { %2156 = vtanh.f32 %v1049_v20  ;;  %v1047_v58 = vpop.f32.mrb[15].mxu0  ;;  %v2107_v20 = vld [vmem:[#allocation9 + $0x18] sm:$0xff]   ;;  %v1901_v57 = vld [vmem:[%s3057_s4] ss:$0 sm:$0xff] }
 0x9bf   :  { %2158 = vtanh.f32 %v1050_v56  ;;  %v2109_v56 = vld [vmem:[#allocation9 + $0x28] sm:$0xff]  }
 0x9c8   :  { %v2157_v59 = vpop.eup %2156 }
 0x9c9   :  { %v2159_v60 = vpop.eup %2158  ;;  %v1053_v61 = vmul.f32 0.5, %v2157_v59 }
 0x9ca   :  { %v1055_v62 = vmul.f32 0.5, %v2159_v60 }
 0x9cb   :  { %v1054_v63 = vadd.f32 0.5, %v1053_v61 }
 0x9cc   :  { %v1056_v5 = vadd.f32 0.5, %v1055_v62 }
 0x9cd   :  { %1057 = vrot.lane.b32.xlu0 %v1054_v63, %s2263_s0  ;;  %v1062_v12 = vmul.f32 %v2159_v60, %v1054_v63 }
 0x9ce   :  { %1059 = vrot.lane.b32.xlu1 %v1056_v5, %s2263_s0 }
 0xa3f   :  { %v1058_v27 = vpop.permute.xlu0 %1057 }
 0xa40   :  { %v1061_v28 = vmul.f32 %v1058_v27, %v2893_v7  ;;  %v1060_v31 = vpop.permute.xlu1 %1059 }
 0xa42   :  { %v2945_v29 = vadd.f32 %v1062_v12, %v1061_v28  ;;  %v2110_v12 = vld [vmem:[#allocation9 + $0x30] sm:$0xff]  }
 0xa44   :  { %2160 = vtanh.f32 %v2945_v29 }
 0xa4e   :  { %v2161_v30 = vpop.eup %2160 }
 0xa4f   :  { %v1065_v32 = vmul.f32 %v2161_v30, %v1060_v31 }
 0xa51   :  { %v1068_v33 = vpack.c.bf16 %v1065_v32, %v1065_v32 }
 0xa53   :  { %1102 = vmatmul.mubr.bf16.vlgmr.msra.gmra.mrb[12].mxu1 %v1068_v33 }
 0xa54   :  { %2009 = vmatprep.mubr.msk.bf16.mxu1 %vm2272_vm1, %v2271_v35  ;;  %1994 = vmatpush3.bf16.msra.mxu1 %v2096_v21 }
 0xa55   :  { %1995 = vmatprep.subr.bf16.mxu1 %v2271_v35 }
 0xa58   :  { %1996 = vmatpush3.bf16.msra.mxu1 %v2097_v26 }
 0xa59   :  { %1997 = vmatprep.subr.bf16.mxu1 %v2271_v35 }
 0xa5c   :  { %1998 = vmatpush3.bf16.msra.mxu1 %v2098_v51 }
 0xa5d   :  { %1999 = vmatprep.subr.bf16.mxu1 %v2271_v35 }
 0xa60   :  { %2000 = vmatpush3.bf16.msra.mxu1 %v2099_v53 }
 0xa61   :  { %2001 = vmatprep.subr.bf16.mxu1 %v2271_v35 }
 0xa64   :  { %2002 = vmatpush3.bf16.msra.mxu1 %v2100_v3 }
 0xa65   :  { %2003 = vmatprep.subr.bf16.mxu1 %v2271_v35 }
 0xa68   :  { %2004 = vmatpush3.bf16.msra.mxu1 %v2101_v4 }
 0xa69   :  { %2005 = vmatprep.subr.bf16.mxu1 %v2271_v35 }
 0xa6c   :  { %2006 = vmatpush3.bf16.msra.mxu1 %v2102_v11 }
 0xa6d   :  { %2007 = vmatprep.subr.bf16.mxu1 %v2271_v35 }
 0xa70   :  { %2008 = vmatpush3.bf16.msra.mxu1 %v2103_v13 }
 0xa71   :  { %2033 = vmatprep.subr.bf16.mxu1 %v2271_v35 }
 0xb26   :  { %v1103_v40 = vpop.f32.mrb[12].mxu1 }
 0xb27   :  { %v1110_v42 = vadd.f32 %v1103_v40, %v1066_v39  ;;  %v1105_v43 = vpop.f32.mrb[13].mxu1 }
 0xb28   :  { %v1107_v44 = vpop.f32.mrb[14].mxu1  ;;  %v1111_v45 = vadd.f32 %v1105_v43, %v1067_v41 }
 0xb29   :  { %2162 = vtanh.f32 %v1110_v42  ;;  %v1108_v46 = vpop.f32.mrb[15].mxu1 }
 0xb2a   :  { %2164 = vtanh.f32 %v1111_v45 }
 0xb33   :  { %v2163_v23 = vpop.eup %2162 }
 0xb34   :  { %v1114_v48 = vmul.f32 0.5, %v2163_v23  ;;  %v2165_v50 = vpop.eup %2164 }
 0xb36   :  { %v1115_v49 = vadd.f32 0.5, %v1114_v48 }
 0xb38   :  { %1116 = vrot.lane.b32.xlu0 %v1115_v49, %s2263_s0  ;;  %v1119_v52 = vmul.f32 %v2165_v50, %v1115_v49 }
 0xbaa   :  { %v1117_v6 = vpop.permute.xlu0 %1116 }
 0xbab   :  { %v1118_v7 = vmul.f32 %v1117_v6, %v2945_v29 }
 0xbad   :  { %v1120_v9 = vadd.f32 %v1119_v52, %v1118_v7 }
 0xbaf   :  { %v1121_v10 = vpack.c.bf16 %v1120_v9, %v1120_v9 }
 0xbb1   :  { %1990 = vmatmul.mubr.bf16.vlgmr.msra.gmra.mrb[16].mxu0 %v1121_v10 }
 0xbb2   :  { %2029 = vmatprep.mubr.msk.bf16.mxu0 %vm2272_vm1, %v2271_v35  ;;  %2014 = vmatpush3.bf16.msra.mxu0 %v2104_v16 }
 0xbb3   :  { %2015 = vmatprep.subr.bf16.mxu0 %v2271_v35 }
 0xbb6   :  { %2016 = vmatpush3.bf16.msra.mxu0 %v2105_v18 }
 0xbb7   :  { %2017 = vmatprep.subr.bf16.mxu0 %v2271_v35 }
 0xbba   :  { %2018 = vmatpush3.bf16.msra.mxu0 %v2106_v54 }
 0xbbb   :  { %2019 = vmatprep.subr.bf16.mxu0 %v2271_v35 }
 0xbbe   :  { %2020 = vmatpush3.bf16.msra.mxu0 %v2107_v20 }
 0xbbf   :  { %2021 = vmatprep.subr.bf16.mxu0 %v2271_v35 }
 0xbc2   :  { %2022 = vmatpush3.bf16.msra.mxu0 %v2108_v55 }
 0xbc3   :  { %2023 = vmatprep.subr.bf16.mxu0 %v2271_v35 }
 0xbc6   :  { %2024 = vmatpush3.bf16.msra.mxu0 %v2109_v56 }
 0xbc7   :  { %2025 = vmatprep.subr.bf16.mxu0 %v2271_v35 }
 0xbca   :  { %2026 = vmatpush3.bf16.msra.mxu0 %v2110_v12 }
 0xbcb   :  { %2027 = vmatprep.subr.bf16.mxu0 %v2271_v35 }
 0xbce   :  { %2028 = vmatpush3.bf16.msra.mxu0 %v2111_v14 }
 0xc84   :  { %v1227_v58 = vpop.f32.mrb[16].mxu0 }
 0xc85   :  { %v1228_v59 = vadd.f32 %v1901_v57, %v1227_v58  ;;  %v1991_v60 = vpop.f32.mrb[17].mxu0 }
 0xc86   :  { %v1230_v61 = vpop.f32.mrb[18].mxu0 }
 0xc87   :  { %v1233_v62 = vmax.f32 %v1228_v59, 0.0  ;;  %v1992_v63 = vpop.f32.mrb[19].mxu0 }
 0xc89   :  { %v1234_v5 = vpack.c.bf16 %v1233_v62, %v1233_v62 }
 0xc8b   :  { %2010 = vmatmul.mubr.bf16.vlgmr.msra.gmra.mrb[16].mxu1 %v1234_v5 }
 0xc8c   :  { %2049 = vmatprep.mubr.msk.bf16.mxu1 %vm2272_vm1, %v2271_v35  ;;  %2034 = vmatpush3.bf16.msra.mxu1 %v2112_v15 }
 0xc8d   :  { %2035 = vmatprep.subr.bf16.mxu1 %v2271_v35 }
 0xc90   :  { %2036 = vmatpush3.bf16.msra.mxu1 %v2113_v17 }
 0xc91   :  { %2037 = vmatprep.subr.bf16.mxu1 %v2271_v35 }
 0xc94   :  { %2038 = vmatpush3.bf16.msra.mxu1 %v2114_v19 }
 0xc95   :  { %2039 = vmatprep.subr.bf16.mxu1 %v2271_v35 }
 0xc98   :  { %2040 = vmatpush3.bf16.msra.mxu1 %v2115_v22 }
 0xc99   :  { %2041 = vmatprep.subr.bf16.mxu1 %v2271_v35 }
 0xc9c   :  { %2042 = vmatpush3.bf16.msra.mxu1 %v2116_v1 }
 0xc9d   :  { %2043 = vmatprep.subr.bf16.mxu1 %v2271_v35 }
 0xca0   :  { %2044 = vmatpush3.bf16.msra.mxu1 %v2117_v24 }
 0xca1   :  { %2045 = vmatprep.subr.bf16.mxu1 %v2271_v35 }
 0xca4   :  { %2046 = vmatpush3.bf16.msra.mxu1 %v2118_v34 }
 0xca5   :  { %2047 = vmatprep.subr.bf16.mxu1 %v2271_v35  ;;  %v1928_v35 = vld [vmem:[%s3063_s10] ss:$0 sm:$0xff] }
 0xca8   :  { %2048 = vmatpush3.bf16.msra.mxu1 %v2119_v8 }
 0xd5e   :  { %v1340_v27 = vpop.f32.mrb[16].mxu1 }
 0xd5f   :  { %v1341_v28 = vadd.f32 %v1910_v25, %v1340_v27  ;;  %v2011_v29 = vpop.f32.mrb[17].mxu1 }
 0xd60   :  { %v1343_v30 = vpop.f32.mrb[18].mxu1 }
 0xd61   :  { %v1346_v31 = vmax.f32 %v1341_v28, 0.0  ;;  %v2012_v32 = vpop.f32.mrb[19].mxu1 }
 0xd63   :  { %v1347_v33 = vpack.c.bf16 %v1346_v31, %v1346_v31 }
 0xd65   :  { %2030 = vmatmul.mubr.bf16.vlgmr.msra.gmra.mrb[20].mxu0 %v1347_v33 }
 0xe38   :  { %v1453_v36 = vpop.f32.mrb[20].mxu0 }
 0xe39   :  { %v1454_v37 = vadd.f32 %v1919_v2, %v1453_v36  ;;  %v2031_v38 = vpop.f32.mrb[21].mxu0 }
 0xe3a   :  { %v1456_v0 = vpop.f32.mrb[22].mxu0 }
 0xe3b   :  { %v1459_v39 = vadd.f32 %v1454_v37, %v1233_v62  ;;  %v2032_v40 = vpop.f32.mrb[23].mxu0 }
 0xe3d   :  { %v1460_v41 = vpack.c.bf16 %v1459_v39, %v1459_v39 }
 0xe3f   :  { %2050 = vmatmul.mubr.bf16.vlgmr.msra.gmra.mrb[20].mxu1 %v1460_v41 }
 0xf12   :  { %v1566_v42 = vpop.f32.mrb[20].mxu1 }
 0xf13   :  { %v1567_v43 = vadd.f32 %v1928_v35, %v1566_v42  ;;  %v2051_v44 = vpop.f32.mrb[21].mxu1 }
 0xf14   :  { %v1569_v45 = vpop.f32.mrb[22].mxu1 }
 0xf15   :  { %1573 = vst.msk [vmem:[%s3064_s11] sm:$0xff] %vm1572_vm2, %v1567_v43  ;;  %v2052_v46 = vpop.f32.mrb[23].mxu1 }
 0xf16   :  { %1578 = vsyncpa [#allocation4], 1 }
 0xf17   :  { %1579 = vsyncpa [#allocation8], 1 }
 0xf18   :  { %1580 = vsyncpa [#allocation5], 1 }

</bundles_post_ra>
